<compile_context>
chip_gen: v7x
topology: tpu7x:2x2x1
jax: 0.10.0
libtpu: 0.0.40
codegen_flags: <defaults>
</compile_context>

<pallas_src>
import functools

import jax
import jax.numpy as jnp
from jax.experimental import pallas as pl
from jax.experimental.pallas import tpu as pltpu


# ---------------------------------------------------------------------------
# Fused bottleneck kernel.  One grid step = one image.
#   x_ref  : (H*W, Cin)        unpadded flat NHWC activation (original dtype)
#   w1_ref : (Cin, width)      conv1 weight (matmul form, compute dtype)
#   w2_ref : (9, width, width) conv2 weight, k = kh*3 + kw, (in, out) per tap
#   w3_ref : (width, Cout)     conv3 weight
#   o_ref  : (H*W, Cout)       unpadded flat output (out dtype)
#   a1_ref : (slab_rows, width) compute-dtype scratch holding the conv1
#            activation laid out with row stride `wr` (>= W+1), a zero tail
#            after each row and zero halo rows, so every 3x3 tap is a plain
#            constant-offset row window (no im2col, no in-kernel reshapes).
# ---------------------------------------------------------------------------
def _bottleneck_kernel(x_ref, w1_ref, w2_ref, w3_ref, o_ref, a1_ref, *,
                       h_img, w_img, wr, lead, rows, compute_dtype):
    f32 = jnp.float32
    n_chunks = (h_img + rows - 1) // rows

    # Zero the padded conv1 slab.  The zero halo/tails are exactly
    # relu(conv1(0)) = 0 because conv1 has no bias and norm_layer=None, so the
    # 3x3 window trick below reproduces conv2d(padding=1) for interior pixels.
    a1_ref[...] = jnp.zeros_like(a1_ref)

    # ---- pass 1: conv1 (1x1) + ReLU on real rows only, placed row-by-row ----
    for c in range(n_chunks):
        h0 = c * rows
        r = min(rows, h_img - h0)
        xc = x_ref[pl.ds(h0 * w_img, r * w_img), :].astype(compute_dtype)
        a1c = jnp.dot(xc, w1_ref[...], preferred_element_type=f32)
        a1c = jnp.maximum(a1c, 0.0).astype(compute_dtype)
        for i in range(r):
            a1_ref[pl.ds(lead + (h0 + i) * wr, w_img), :] = \
                a1c[i * w_img:(i + 1) * w_img, :]

    # ---- pass 2: conv2 (3x3, pad=1) as 9 shifted matmuls accumulated in
    #      registers, then ReLU -> conv3 (1x1) -> +identity -> ReLU ----------
    for c in range(n_chunks):
        h0 = c * rows
        r = min(rows, h_img - h0)
        m = r * wr                              # chunk positions (incl. pad cols)
        acc = None
        for k in range(9):
            kh, kw = k // 3, k % 3
            start = lead + (h0 + kh - 1) * wr + (kw - 1)   # static flat offset
            tap = a1_ref[pl.ds(start, m), :]               # compute dtype, no cast
            contrib = jnp.dot(tap, w2_ref[k], preferred_element_type=f32)
            acc = contrib if acc is None else acc + contrib
        a2 = jnp.maximum(acc, 0.0).astype(compute_dtype)    # (m, width)
        y = jnp.dot(a2, w3_ref[...], preferred_element_type=f32)  # (m, Cout) f32

        # Residual add in f32 from the ORIGINAL-dtype x, store interior rows only.
        for i in range(r):
            h = h0 + i
            res = x_ref[pl.ds(h * w_img, w_img), :].astype(f32)
            row = y[i * wr: i * wr + w_img, :]
            o_ref[pl.ds(h * w_img, w_img), :] = \
                jnp.maximum(row + res, 0.0).astype(o_ref.dtype)


# ---------------------------------------------------------------------------
# NHWC entry point (preferred: no layout traffic outside the kernel).
# ---------------------------------------------------------------------------
def bottleneck_forward_nhwc(x_nhwc, w1, w2, w3, *,
                            compute_dtype=jnp.bfloat16, out_dtype=None):
    """
    x_nhwc : (N, H, W, inplanes)
    w1     : (width, inplanes, 1, 1)   conv1 weight (PyTorch OIHW)
    w2     : (width, width, 3, 3)      conv2 weight
    w3     : (planes*4, width, 1, 1)   conv3 weight
    Returns (N, H, W, planes*4) in `out_dtype` (defaults to x dtype).
    """
    N, H, W, Cin = x_nhwc.shape
    width = w1.shape[0]
    Cout = w3.shape[0]
    if Cout != Cin:
        raise ValueError("downsample=None requires inplanes == planes * expansion")
    out_dtype = x_nhwc.dtype if out_dtype is None else jnp.dtype(out_dtype)

    # Padded row stride: sublane-align (multiple of 8) when the extra pad
    # columns cost <= 25% wasted conv2/conv3 positions; otherwise stay compact
    # (protects the MXU-bound 7x7 stage from FLOP waste).
    wr_aligned = ((W + 2 + 7) // 8) * 8
    WR = wr_aligned if 4 * wr_aligned <= 5 * (W + 2) else (W + 2)
    LEAD = WR + 8                                # top halo row + alignment slack
    slab_rows = (H + 2) * WR + 16                # LEAD + H rows + bottom halo + slack

    # Row-chunk size for register-accumulated conv2 (~256 positions per chunk
    # keeps the f32 accumulator close to the vreg file).
    ROWS = max(1, min(H, 256 // WR))

    x_flat = x_nhwc.reshape(N, H * W, Cin)       # free reshape; no pad / no cast

    # Conv weights (PyTorch OIHW) -> matmul form, cast once for the MXU.
    W1 = jnp.transpose(w1[:, :, 0, 0]).astype(compute_dtype)              # (Cin, width)
    W2 = jnp.transpose(w2, (2, 3, 1, 0)).reshape(9, width, width)         # (kh*3+kw, in, out)
    W2 = W2.astype(compute_dtype)
    W3 = jnp.transpose(w3[:, :, 0, 0]).astype(compute_dtype)              # (width, Cout)

    xb = jnp.dtype(x_nhwc.dtype).itemsize
    ob = jnp.dtype(out_dtype).itemsize
    cb = jnp.dtype(compute_dtype).itemsize

    # VMEM budget: double-buffered I/O blocks + resident weights + a1 slab +
    # headroom for chunk temporaries; capped at 75% of the detected per-core
    # VMEM (so v5e/v6e get their full 128 MiB headroom, v7x stays safe).
    est = (2 * H * W * (Cin * xb + Cout * ob)
           + (Cin * width + 9 * width * width + width * Cout) * cb
           + slab_rows * width * cb
           + 4 * ROWS * WR * (width + Cout) * 4
           + 2 * ROWS * W * max(Cin, width) * 4)
    try:
        vmem_cap = int(getattr(pltpu.get_tpu_info(), "vmem_capacity_bytes",
                               64 * 2 ** 20))
    except Exception:
        vmem_cap = 64 * 2 ** 20                   # v7x-safe fallback
    vmem_limit = int(min(max(2 * est, 8 * 2 ** 20), (vmem_cap * 3) // 4))

    flops = 2 * N * (H * W * Cin * width          # conv1 (interior only)
                     + H * WR * 9 * width * width  # conv2 (incl. pad cols)
                     + H * WR * width * Cout)      # conv3 (incl. pad cols)
    bytes_accessed = (N * H * W * (Cin * xb + Cout * ob)
                      + (Cin * width + 9 * width * width + width * Cout) * cb)
    cost = pl.CostEstimate(flops=flops, transcendentals=0,
                           bytes_accessed=bytes_accessed)

    kernel = functools.partial(_bottleneck_kernel, h_img=H, w_img=W, wr=WR,
                               lead=LEAD, rows=ROWS, compute_dtype=compute_dtype)

    out_flat = pl.pallas_call(
        kernel,
        out_shape=jax.ShapeDtypeStruct((N, H * W, Cout), out_dtype),
        grid_spec=pltpu.PrefetchScalarGridSpec(
            num_scalar_prefetch=0,
            grid=(N,),
            in_specs=[
                pl.BlockSpec((None, H * W, Cin), lambda n: (n, 0, 0)),
                pl.BlockSpec((Cin, width), lambda n: (0, 0)),            # VMEM-resident
                pl.BlockSpec((9, width, width), lambda n: (0, 0, 0)),    # VMEM-resident
                pl.BlockSpec((width, Cout), lambda n: (0, 0)),           # VMEM-resident
            ],
            out_specs=pl.BlockSpec((None, H * W, Cout), lambda n: (n, 0, 0)),
            scratch_shapes=[
                pltpu.VMEM((slab_rows, width), compute_dtype),   # padded conv1 slab
            ],
        ),
        compiler_params=pltpu.CompilerParams(
            dimension_semantics=("parallel",),      # batch across v7x TensorCores
            vmem_limit_bytes=vmem_limit,
        ),
        cost_estimate=cost,
    )(x_flat, W1, W2, W3)

    return out_flat.reshape(N, H, W, Cout)


# ---------------------------------------------------------------------------
# NCHW compatibility wrapper (matches the PyTorch module signature).  For best
# performance keep activations NHWC end-to-end and call bottleneck_forward_nhwc
# directly — these two transposes are the only layout traffic left outside the
# kernel.
# ---------------------------------------------------------------------------
def bottleneck_forward(x_nchw, w1, w2, w3, *,
                       compute_dtype=jnp.bfloat16, out_dtype=None):
    x_nhwc = jnp.transpose(x_nchw, (0, 2, 3, 1))
    out = bottleneck_forward_nhwc(x_nhwc, w1, w2, w3,
                                  compute_dtype=compute_dtype,
                                  out_dtype=out_dtype)
    return jnp.transpose(out, (0, 3, 1, 2))


# ---------------------------------------------------------------------------
# Pure-JAX f32 reference (for verification)
# ---------------------------------------------------------------------------
def bottleneck_reference(x, w1, w2, w3):
    dn = jax.lax.conv_dimension_numbers(x.shape, w1.shape, ("NCHW", "OIHW", "NCHW"))
    out = jax.lax.conv_general_dilated(x, w1, (1, 1), "VALID", dimension_numbers=dn)
    out = jnp.maximum(out, 0.0)
    dn2 = jax.lax.conv_dimension_numbers(out.shape, w2.shape, ("NCHW", "OIHW", "NCHW"))
    out = jax.lax.conv_general_dilated(out, w2, (1, 1), ((1, 1), (1, 1)),
                                       dimension_numbers=dn2)
    out = jnp.maximum(out, 0.0)
    dn3 = jax.lax.conv_dimension_numbers(out.shape, w3.shape, ("NCHW", "OIHW", "NCHW"))
    out = jax.lax.conv_general_dilated(out, w3, (1, 1), "VALID", dimension_numbers=dn3)
    return jnp.maximum(out + x, 0.0)


if __name__ == "__main__":
    # Small shapes consistent with the module: identity residual requires
    # inplanes == planes * expansion (downsample=None).
    N, H, W = 2, 16, 16
    planes = 4
    expansion = 4
    inplanes = planes * expansion        # 16
    width = planes                       # base_width=64, groups=1 -> width == planes

    key = jax.random.PRNGKey(0)
    kx, k1, k2, k3 = jax.random.split(key, 4)
    x = jax.random.normal(kx, (N, inplanes, H, W), dtype=jnp.float32)
    w1 = jax.random.normal(k1, (width, inplanes, 1, 1), dtype=jnp.float32) * 0.1
    w2 = jax.random.normal(k2, (width, width, 3, 3), dtype=jnp.float32) * 0.1
    w3 = jax.random.normal(k3, (inplanes, width, 1, 1), dtype=jnp.float32) * 0.1

    fwd = jax.jit(bottleneck_forward, static_argnames=("compute_dtype", "out_dtype"))
    ref = bottleneck_reference(x, w1, w2, w3)

    # Structural check: f32 compute path must match the f32 conv reference tightly.
    out_f32 = jax.block_until_ready(fwd(x, w1, w2, w3, compute_dtype=jnp.float32))
    assert out_f32.shape == (N, inplanes, H, W)
    assert jnp.allclose(out_f32, ref, atol=1e-4, rtol=1e-4), "f32 kernel mismatch vs reference"

    # Performance path: bf16 MXU inputs, f32 accumulation, f32 residual.
    out_bf16 = jax.block_until_ready(fwd(x, w1, w2, w3, compute_dtype=jnp.bfloat16))
    assert out_bf16.shape == (N, inplanes, H, W)
    assert jnp.allclose(out_bf16, ref, atol=5e-2, rtol=5e-2), "bf16 kernel mismatch vs reference"

    # bf16 output writeback (halves output HBM traffic for stacked blocks).
    out_bf16o = jax.block_until_ready(
        fwd(x, w1, w2, w3, compute_dtype=jnp.bfloat16, out_dtype=jnp.bfloat16))
    assert out_bf16o.dtype == jnp.bfloat16
    assert jnp.allclose(out_bf16o.astype(jnp.float32), ref, atol=1e-1, rtol=1e-1), \
        "bf16-out kernel mismatch vs reference"

    print("KERNEL_OK")
</pallas_src>

<mosaic_0001>
module attributes {stable_mosaic.version = 11 : i64} {
  func.func @_bottleneck_kernel(%arg0: i32, %arg1: memref<1x256x16xf32, #tpu.memory_space<vmem>>, %arg2: memref<16x4xf32, #tpu.memory_space<vmem>>, %arg3: memref<9x4x4xf32, #tpu.memory_space<vmem>>, %arg4: memref<4x16xf32, #tpu.memory_space<vmem>>, %arg5: memref<1x256x16xf32, #tpu.memory_space<vmem>>, %arg6: memref<340x4xf32, #tpu.memory_space<vmem>>) attributes {dimension_semantics = [#tpu.dimension_semantics<parallel>], iteration_bounds = array<i64: 2>, scalar_prefetch = 0 : i64, scratch_operands = 1 : i64, tpu.core_type = #tpu.core_type<tc>, window_params = [{transform_indices = @transform_0, window_bounds = array<i64: 1, 256, 16>}, {pipeline_mode = #tpu.pipeline_mode<synchronous>, transform_indices = @transform_1, window_bounds = array<i64: 16, 4>}, {pipeline_mode = #tpu.pipeline_mode<synchronous>, transform_indices = @transform_2, window_bounds = array<i64: 9, 4, 4>}, {pipeline_mode = #tpu.pipeline_mode<synchronous>, transform_indices = @transform_3, window_bounds = array<i64: 4, 16>}, {transform_indices = @transform_4, window_bounds = array<i64: 1, 256, 16>}]} {
    %cst = arith.constant 0.000000e+00 : f32
    %0 = vector.broadcast %cst : f32 to vector<340x4xf32>
    %c0 = arith.constant 0 : index
    %c0_0 = arith.constant 0 : index
    %1 = vector.load %arg6[%c0, %c0_0] : memref<340x4xf32, #tpu.memory_space<vmem>>, vector<340x4xf32>
    tpu.vector_store %arg6[%c0, %c0_0], %0 {strides = array<i32>} : memref<340x4xf32, #tpu.memory_space<vmem>>, vector<340x4xf32>,
    %c0_1 = arith.constant 0 : index
    %c0_2 = arith.constant 0 : index
    %c0_3 = arith.constant 0 : index
    %2 = vector.load %arg1[%c0_1, %c0_2, %c0_3] : memref<1x256x16xf32, #tpu.memory_space<vmem>>, vector<1x224x16xf32>
    %3 = vector.shape_cast %2 : vector<1x224x16xf32> to vector<224x16xf32>
    %c0_4 = arith.constant 0 : index
    %c0_5 = arith.constant 0 : index
    %4 = vector.load %arg2[%c0_4, %c0_5] : memref<16x4xf32, #tpu.memory_space<vmem>>, vector<16x4xf32>
    %cst_6 = arith.constant dense<0.000000e+00> : vector<224x4xf32>
    %5 = tpu.matmul %3, %4, %cst_6 {dimension_numbers = #tpu.dot_dimension_numbers<[1], [0], [0], [1], [0, 0, 1, 1], [], []>} : vector<224x16xf32>, vector<16x4xf32>, vector<224x4xf32> -> vector<224x4xf32>
    %cst_7 = arith.constant 0.000000e+00 : f32
    %6 = vector.broadcast %cst_7 : f32 to vector<224x4xf32>
    %7 = arith.maximumf %5, %6 : vector<224x4xf32>
    %8 = vector.extract_strided_slice %7 {offsets = [0, 0], sizes = [16, 4], strides = [1, 1]} : vector<224x4xf32> to vector<16x4xf32>
    %c26 = arith.constant 26 : index
    %c0_8 = arith.constant 0 : index
    %9 = vector.load %arg6[%c26, %c0_8] : memref<340x4xf32, #tpu.memory_space<vmem>>, vector<16x4xf32>
    tpu.vector_store %arg6[%c26, %c0_8], %8 {strides = array<i32>} : memref<340x4xf32, #tpu.memory_space<vmem>>, vector<16x4xf32>,
    %10 = vector.extract_strided_slice %7 {offsets = [16, 0], sizes = [16, 4], strides = [1, 1]} : vector<224x4xf32> to vector<16x4xf32>
    %c44 = arith.constant 44 : index
    %c0_9 = arith.constant 0 : index
    %11 = vector.load %arg6[%c44, %c0_9] : memref<340x4xf32, #tpu.memory_space<vmem>>, vector<16x4xf32>
    tpu.vector_store %arg6[%c44, %c0_9], %10 {strides = array<i32>} : memref<340x4xf32, #tpu.memory_space<vmem>>, vector<16x4xf32>,
    %12 = vector.extract_strided_slice %7 {offsets = [32, 0], sizes = [16, 4], strides = [1, 1]} : vector<224x4xf32> to vector<16x4xf32>
    %c62 = arith.constant 62 : index
    %c0_10 = arith.constant 0 : index
    %13 = vector.load %arg6[%c62, %c0_10] : memref<340x4xf32, #tpu.memory_space<vmem>>, vector<16x4xf32>
    tpu.vector_store %arg6[%c62, %c0_10], %12 {strides = array<i32>} : memref<340x4xf32, #tpu.memory_space<vmem>>, vector<16x4xf32>,
    %14 = vector.extract_strided_slice %7 {offsets = [48, 0], sizes = [16, 4], strides = [1, 1]} : vector<224x4xf32> to vector<16x4xf32>
    %c80 = arith.constant 80 : index
    %c0_11 = arith.constant 0 : index
    %15 = vector.load %arg6[%c80, %c0_11] : memref<340x4xf32, #tpu.memory_space<vmem>>, vector<16x4xf32>
    tpu.vector_store %arg6[%c80, %c0_11], %14 {strides = array<i32>} : memref<340x4xf32, #tpu.memory_space<vmem>>, vector<16x4xf32>,
    %16 = vector.extract_strided_slice %7 {offsets = [64, 0], sizes = [16, 4], strides = [1, 1]} : vector<224x4xf32> to vector<16x4xf32>
    %c98 = arith.constant 98 : index
    %c0_12 = arith.constant 0 : index
    %17 = vector.load %arg6[%c98, %c0_12] : memref<340x4xf32, #tpu.memory_space<vmem>>, vector<16x4xf32>
    tpu.vector_store %arg6[%c98, %c0_12], %16 {strides = array<i32>} : memref<340x4xf32, #tpu.memory_space<vmem>>, vector<16x4xf32>,
    %18 = vector.extract_strided_slice %7 {offsets = [80, 0], sizes = [16, 4], strides = [1, 1]} : vector<224x4xf32> to vector<16x4xf32>
    %c116 = arith.constant 116 : index
    %c0_13 = arith.constant 0 : index
    %19 = vector.load %arg6[%c116, %c0_13] : memref<340x4xf32, #tpu.memory_space<vmem>>, vector<16x4xf32>
    tpu.vector_store %arg6[%c116, %c0_13], %18 {strides = array<i32>} : memref<340x4xf32, #tpu.memory_space<vmem>>, vector<16x4xf32>,
    %20 = vector.extract_strided_slice %7 {offsets = [96, 0], sizes = [16, 4], strides = [1, 1]} : vector<224x4xf32> to vector<16x4xf32>
    %c134 = arith.constant 134 : index
    %c0_14 = arith.constant 0 : index
    %21 = vector.load %arg6[%c134, %c0_14] : memref<340x4xf32, #tpu.memory_space<vmem>>, vector<16x4xf32>
    tpu.vector_store %arg6[%c134, %c0_14], %20 {strides = array<i32>} : memref<340x4xf32, #tpu.memory_space<vmem>>, vector<16x4xf32>,
    %22 = vector.extract_strided_slice %7 {offsets = [112, 0], sizes = [16, 4], strides = [1, 1]} : vector<224x4xf32> to vector<16x4xf32>
    %c152 = arith.constant 152 : index
    %c0_15 = arith.constant 0 : index
    %23 = vector.load %arg6[%c152, %c0_15] : memref<340x4xf32, #tpu.memory_space<vmem>>, vector<16x4xf32>
    tpu.vector_store %arg6[%c152, %c0_15], %22 {strides = array<i32>} : memref<340x4xf32, #tpu.memory_space<vmem>>, vector<16x4xf32>,
    %24 = vector.extract_strided_slice %7 {offsets = [128, 0], sizes = [16, 4], strides = [1, 1]} : vector<224x4xf32> to vector<16x4xf32>
    %c170 = arith.constant 170 : index
    %c0_16 = arith.constant 0 : index
    %25 = vector.load %arg6[%c170, %c0_16] : memref<340x4xf32, #tpu.memory_space<vmem>>, vector<16x4xf32>
    tpu.vector_store %arg6[%c170, %c0_16], %24 {strides = array<i32>} : memref<340x4xf32, #tpu.memory_space<vmem>>, vector<16x4xf32>,
    %26 = vector.extract_strided_slice %7 {offsets = [144, 0], sizes = [16, 4], strides = [1, 1]} : vector<224x4xf32> to vector<16x4xf32>
    %c188 = arith.constant 188 : index
    %c0_17 = arith.constant 0 : index
    %27 = vector.load %arg6[%c188, %c0_17] : memref<340x4xf32, #tpu.memory_space<vmem>>, vector<16x4xf32>
    tpu.vector_store %arg6[%c188, %c0_17], %26 {strides = array<i32>} : memref<340x4xf32, #tpu.memory_space<vmem>>, vector<16x4xf32>,
    %28 = vector.extract_strided_slice %7 {offsets = [160, 0], sizes = [16, 4], strides = [1, 1]} : vector<224x4xf32> to vector<16x4xf32>
    %c206 = arith.constant 206 : index
    %c0_18 = arith.constant 0 : index
    %29 = vector.load %arg6[%c206, %c0_18] : memref<340x4xf32, #tpu.memory_space<vmem>>, vector<16x4xf32>
    tpu.vector_store %arg6[%c206, %c0_18], %28 {strides = array<i32>} : memref<340x4xf32, #tpu.memory_space<vmem>>, vector<16x4xf32>,
    %30 = vector.extract_strided_slice %7 {offsets = [176, 0], sizes = [16, 4], strides = [1, 1]} : vector<224x4xf32> to vector<16x4xf32>
    %c224 = arith.constant 224 : index
    %c0_19 = arith.constant 0 : index
    %31 = vector.load %arg6[%c224, %c0_19] : memref<340x4xf32, #tpu.memory_space<vmem>>, vector<16x4xf32>
    tpu.vector_store %arg6[%c224, %c0_19], %30 {strides = array<i32>} : memref<340x4xf32, #tpu.memory_space<vmem>>, vector<16x4xf32>,
    %32 = vector.extract_strided_slice %7 {offsets = [192, 0], sizes = [16, 4], strides = [1, 1]} : vector<224x4xf32> to vector<16x4xf32>
    %c242 = arith.constant 242 : index
    %c0_20 = arith.constant 0 : index
    %33 = vector.load %arg6[%c242, %c0_20] : memref<340x4xf32, #tpu.memory_space<vmem>>, vector<16x4xf32>
    tpu.vector_store %arg6[%c242, %c0_20], %32 {strides = array<i32>} : memref<340x4xf32, #tpu.memory_space<vmem>>, vector<16x4xf32>,
    %34 = vector.extract_strided_slice %7 {offsets = [208, 0], sizes = [16, 4], strides = [1, 1]} : vector<224x4xf32> to vector<16x4xf32>
    %c260 = arith.constant 260 : index
    %c0_21 = arith.constant 0 : index
    %35 = vector.load %arg6[%c260, %c0_21] : memref<340x4xf32, #tpu.memory_space<vmem>>, vector<16x4xf32>
    tpu.vector_store %arg6[%c260, %c0_21], %34 {strides = array<i32>} : memref<340x4xf32, #tpu.memory_space<vmem>>, vector<16x4xf32>,
    %c0_22 = arith.constant 0 : index
    %c224_23 = arith.constant 224 : index
    %c0_24 = arith.constant 0 : index
    %36 = vector.load %arg1[%c0_22, %c224_23, %c0_24] : memref<1x256x16xf32, #tpu.memory_space<vmem>>, vector<1x32x16xf32>
    %37 = vector.shape_cast %36 : vector<1x32x16xf32> to vector<32x16xf32>
    %c0_25 = arith.constant 0 : index
    %c0_26 = arith.constant 0 : index
    %38 = vector.load %arg2[%c0_25, %c0_26] : memref<16x4xf32, #tpu.memory_space<vmem>>, vector<16x4xf32>
    %cst_27 = arith.constant dense<0.000000e+00> : vector<32x4xf32>
    %39 = tpu.matmul %37, %38, %cst_27 {dimension_numbers = #tpu.dot_dimension_numbers<[1], [0], [0], [1], [0, 0, 1, 1], [], []>} : vector<32x16xf32>, vector<16x4xf32>, vector<32x4xf32> -> vector<32x4xf32>
    %cst_28 = arith.constant 0.000000e+00 : f32
    %40 = vector.broadcast %cst_28 : f32 to vector<32x4xf32>
    %41 = arith.maximumf %39, %40 : vector<32x4xf32>
    %42 = vector.extract_strided_slice %41 {offsets = [0, 0], sizes = [16, 4], strides = [1, 1]} : vector<32x4xf32> to vector<16x4xf32>
    %c278 = arith.constant 278 : index
    %c0_29 = arith.constant 0 : index
    %43 = vector.load %arg6[%c278, %c0_29] : memref<340x4xf32, #tpu.memory_space<vmem>>, vector<16x4xf32>
    tpu.vector_store %arg6[%c278, %c0_29], %42 {strides = array<i32>} : memref<340x4xf32, #tpu.memory_space<vmem>>, vector<16x4xf32>,
    %44 = vector.extract_strided_slice %41 {offsets = [16, 0], sizes = [16, 4], strides = [1, 1]} : vector<32x4xf32> to vector<16x4xf32>
    %c296 = arith.constant 296 : index
    %c0_30 = arith.constant 0 : index
    %45 = vector.load %arg6[%c296, %c0_30] : memref<340x4xf32, #tpu.memory_space<vmem>>, vector<16x4xf32>
    tpu.vector_store %arg6[%c296, %c0_30], %44 {strides = array<i32>} : memref<340x4xf32, #tpu.memory_space<vmem>>, vector<16x4xf32>,
    %c7 = arith.constant 7 : index
    %c0_31 = arith.constant 0 : index
    %46 = vector.load %arg6[%c7, %c0_31] : memref<340x4xf32, #tpu.memory_space<vmem>>, vector<252x4xf32>
    %c0_32 = arith.constant 0 : index
    %c0_33 = arith.constant 0 : index
    %c0_34 = arith.constant 0 : index
    %47 = vector.load %arg3[%c0_32, %c0_33, %c0_34] : memref<9x4x4xf32, #tpu.memory_space<vmem>>, vector<1x4x4xf32>
    %48 = vector.shape_cast %47 : vector<1x4x4xf32> to vector<4x4xf32>
    %cst_35 = arith.constant dense<0.000000e+00> : vector<252x4xf32>
    %49 = tpu.matmul %46, %48, %cst_35 {dimension_numbers = #tpu.dot_dimension_numbers<[1], [0], [0], [1], [0, 0, 1, 1], [], []>} : vector<252x4xf32>, vector<4x4xf32>, vector<252x4xf32> -> vector<252x4xf32>
    %c8 = arith.constant 8 : index
    %c0_36 = arith.constant 0 : index
    %50 = vector.load %arg6[%c8, %c0_36] : memref<340x4xf32, #tpu.memory_space<vmem>>, vector<252x4xf32>
    %c1 = arith.constant 1 : index
    %c0_37 = arith.constant 0 : index
    %c0_38 = arith.constant 0 : index
    %51 = vector.load %arg3[%c1, %c0_37, %c0_38] : memref<9x4x4xf32, #tpu.memory_space<vmem>>, vector<1x4x4xf32>
    %52 = vector.shape_cast %51 : vector<1x4x4xf32> to vector<4x4xf32>
    %cst_39 = arith.constant dense<0.000000e+00> : vector<252x4xf32>
    %53 = tpu.matmul %50, %52, %cst_39 {dimension_numbers = #tpu.dot_dimension_numbers<[1], [0], [0], [1], [0, 0, 1, 1], [], []>} : vector<252x4xf32>, vector<4x4xf32>, vector<252x4xf32> -> vector<252x4xf32>
    %54 = arith.addf %49, %53 : vector<252x4xf32>
    %c9 = arith.constant 9 : index
    %c0_40 = arith.constant 0 : index
    %55 = vector.load %arg6[%c9, %c0_40] : memref<340x4xf32, #tpu.memory_space<vmem>>, vector<252x4xf32>
    %c2 = arith.constant 2 : index
    %c0_41 = arith.constant 0 : index
    %c0_42 = arith.constant 0 : index
    %56 = vector.load %arg3[%c2, %c0_41, %c0_42] : memref<9x4x4xf32, #tpu.memory_space<vmem>>, vector<1x4x4xf32>
    %57 = vector.shape_cast %56 : vector<1x4x4xf32> to vector<4x4xf32>
    %cst_43 = arith.constant dense<0.000000e+00> : vector<252x4xf32>
    %58 = tpu.matmul %55, %57, %cst_43 {dimension_numbers = #tpu.dot_dimension_numbers<[1], [0], [0], [1], [0, 0, 1, 1], [], []>} : vector<252x4xf32>, vector<4x4xf32>, vector<252x4xf32> -> vector<252x4xf32>
    %59 = arith.addf %54, %58 : vector<252x4xf32>
    %c25 = arith.constant 25 : index
    %c0_44 = arith.constant 0 : index
    %60 = vector.load %arg6[%c25, %c0_44] : memref<340x4xf32, #tpu.memory_space<vmem>>, vector<252x4xf32>
    %c3 = arith.constant 3 : index
    %c0_45 = arith.constant 0 : index
    %c0_46 = arith.constant 0 : index
    %61 = vector.load %arg3[%c3, %c0_45, %c0_46] : memref<9x4x4xf32, #tpu.memory_space<vmem>>, vector<1x4x4xf32>
    %62 = vector.shape_cast %61 : vector<1x4x4xf32> to vector<4x4xf32>
    %cst_47 = arith.constant dense<0.000000e+00> : vector<252x4xf32>
    %63 = tpu.matmul %60, %62, %cst_47 {dimension_numbers = #tpu.dot_dimension_numbers<[1], [0], [0], [1], [0, 0, 1, 1], [], []>} : vector<252x4xf32>, vector<4x4xf32>, vector<252x4xf32> -> vector<252x4xf32>
    %64 = arith.addf %59, %63 : vector<252x4xf32>
    %c26_48 = arith.constant 26 : index
    %c0_49 = arith.constant 0 : index
    %65 = vector.load %arg6[%c26_48, %c0_49] : memref<340x4xf32, #tpu.memory_space<vmem>>, vector<252x4xf32>
    %c4 = arith.constant 4 : index
    %c0_50 = arith.constant 0 : index
    %c0_51 = arith.constant 0 : index
    %66 = vector.load %arg3[%c4, %c0_50, %c0_51] : memref<9x4x4xf32, #tpu.memory_space<vmem>>, vector<1x4x4xf32>
    %67 = vector.shape_cast %66 : vector<1x4x4xf32> to vector<4x4xf32>
    %cst_52 = arith.constant dense<0.000000e+00> : vector<252x4xf32>
    %68 = tpu.matmul %65, %67, %cst_52 {dimension_numbers = #tpu.dot_dimension_numbers<[1], [0], [0], [1], [0, 0, 1, 1], [], []>} : vector<252x4xf32>, vector<4x4xf32>, vector<252x4xf32> -> vector<252x4xf32>
    %69 = arith.addf %64, %68 : vector<252x4xf32>
    %c27 = arith.constant 27 : index
    %c0_53 = arith.constant 0 : index
    %70 = vector.load %arg6[%c27, %c0_53] : memref<340x4xf32, #tpu.memory_space<vmem>>, vector<252x4xf32>
    %c5 = arith.constant 5 : index
    %c0_54 = arith.constant 0 : index
    %c0_55 = arith.constant 0 : index
    %71 = vector.load %arg3[%c5, %c0_54, %c0_55] : memref<9x4x4xf32, #tpu.memory_space<vmem>>, vector<1x4x4xf32>
    %72 = vector.shape_cast %71 : vector<1x4x4xf32> to vector<4x4xf32>
    %cst_56 = arith.constant dense<0.000000e+00> : vector<252x4xf32>
    %73 = tpu.matmul %70, %72, %cst_56 {dimension_numbers = #tpu.dot_dimension_numbers<[1], [0], [0], [1], [0, 0, 1, 1], [], []>} : vector<252x4xf32>, vector<4x4xf32>, vector<252x4xf32> -> vector<252x4xf32>
    %74 = arith.addf %69, %73 : vector<252x4xf32>
    %c43 = arith.constant 43 : index
    %c0_57 = arith.constant 0 : index
    %75 = vector.load %arg6[%c43, %c0_57] : memref<340x4xf32, #tpu.memory_space<vmem>>, vector<252x4xf32>
    %c6 = arith.constant 6 : index
    %c0_58 = arith.constant 0 : index
    %c0_59 = arith.constant 0 : index
    %76 = vector.load %arg3[%c6, %c0_58, %c0_59] : memref<9x4x4xf32, #tpu.memory_space<vmem>>, vector<1x4x4xf32>
    %77 = vector.shape_cast %76 : vector<1x4x4xf32> to vector<4x4xf32>
    %cst_60 = arith.constant dense<0.000000e+00> : vector<252x4xf32>
    %78 = tpu.matmul %75, %77, %cst_60 {dimension_numbers = #tpu.dot_dimension_numbers<[1], [0], [0], [1], [0, 0, 1, 1], [], []>} : vector<252x4xf32>, vector<4x4xf32>, vector<252x4xf32> -> vector<252x4xf32>
    %79 = arith.addf %74, %78 : vector<252x4xf32>
    %c44_61 = arith.constant 44 : index
    %c0_62 = arith.constant 0 : index
    %80 = vector.load %arg6[%c44_61, %c0_62] : memref<340x4xf32, #tpu.memory_space<vmem>>, vector<252x4xf32>
    %c7_63 = arith.constant 7 : index
    %c0_64 = arith.constant 0 : index
    %c0_65 = arith.constant 0 : index
    %81 = vector.load %arg3[%c7_63, %c0_64, %c0_65] : memref<9x4x4xf32, #tpu.memory_space<vmem>>, vector<1x4x4xf32>
    %82 = vector.shape_cast %81 : vector<1x4x4xf32> to vector<4x4xf32>
    %cst_66 = arith.constant dense<0.000000e+00> : vector<252x4xf32>
    %83 = tpu.matmul %80, %82, %cst_66 {dimension_numbers = #tpu.dot_dimension_numbers<[1], [0], [0], [1], [0, 0, 1, 1], [], []>} : vector<252x4xf32>, vector<4x4xf32>, vector<252x4xf32> -> vector<252x4xf32>
    %84 = arith.addf %79, %83 : vector<252x4xf32>
    %c45 = arith.constant 45 : index
    %c0_67 = arith.constant 0 : index
    %85 = vector.load %arg6[%c45, %c0_67] : memref<340x4xf32, #tpu.memory_space<vmem>>, vector<252x4xf32>
    %c8_68 = arith.constant 8 : index
    %c0_69 = arith.constant 0 : index
    %c0_70 = arith.constant 0 : index
    %86 = vector.load %arg3[%c8_68, %c0_69, %c0_70] : memref<9x4x4xf32, #tpu.memory_space<vmem>>, vector<1x4x4xf32>
    %87 = vector.shape_cast %86 : vector<1x4x4xf32> to vector<4x4xf32>
    %cst_71 = arith.constant dense<0.000000e+00> : vector<252x4xf32>
    %88 = tpu.matmul %85, %87, %cst_71 {dimension_numbers = #tpu.dot_dimension_numbers<[1], [0], [0], [1], [0, 0, 1, 1], [], []>} : vector<252x4xf32>, vector<4x4xf32>, vector<252x4xf32> -> vector<252x4xf32>
    %89 = arith.addf %84, %88 : vector<252x4xf32>
    %cst_72 = arith.constant 0.000000e+00 : f32
    %90 = vector.broadcast %cst_72 : f32 to vector<252x4xf32>
    %91 = arith.maximumf %89, %90 : vector<252x4xf32>
    %c0_73 = arith.constant 0 : index
    %c0_74 = arith.constant 0 : index
    %92 = vector.load %arg4[%c0_73, %c0_74] : memref<4x16xf32, #tpu.memory_space<vmem>>, vector<4x16xf32>
    %cst_75 = arith.constant dense<0.000000e+00> : vector<252x16xf32>
    %93 = tpu.matmul %91, %92, %cst_75 {dimension_numbers = #tpu.dot_dimension_numbers<[1], [0], [0], [1], [0, 0, 1, 1], [], []>} : vector<252x4xf32>, vector<4x16xf32>, vector<252x16xf32> -> vector<252x16xf32>
    %c0_76 = arith.constant 0 : index
    %c0_77 = arith.constant 0 : index
    %c0_78 = arith.constant 0 : index
    %94 = vector.load %arg1[%c0_76, %c0_77, %c0_78] : memref<1x256x16xf32, #tpu.memory_space<vmem>>, vector<1x16x16xf32>
    %95 = vector.shape_cast %94 : vector<1x16x16xf32> to vector<16x16xf32>
    %96 = vector.extract_strided_slice %93 {offsets = [0, 0], sizes = [16, 16], strides = [1, 1]} : vector<252x16xf32> to vector<16x16xf32>
    %97 = arith.addf %96, %95 : vector<16x16xf32>
    %cst_79 = arith.constant 0.000000e+00 : f32
    %98 = vector.broadcast %cst_79 : f32 to vector<16x16xf32>
    %99 = arith.maximumf %97, %98 : vector<16x16xf32>
    %c0_80 = arith.constant 0 : index
    %c0_81 = arith.constant 0 : index
    %c0_82 = arith.constant 0 : index
    %100 = vector.load %arg5[%c0_80, %c0_81, %c0_82] : memref<1x256x16xf32, #tpu.memory_space<vmem>>, vector<1x16x16xf32>
    %101 = vector.shape_cast %100 : vector<1x16x16xf32> to vector<16x16xf32>
    %102 = vector.shape_cast %99 : vector<16x16xf32> to vector<1x16x16xf32>
    tpu.vector_store %arg5[%c0_80, %c0_81, %c0_82], %102 {strides = array<i32>} : memref<1x256x16xf32, #tpu.memory_space<vmem>>, vector<1x16x16xf32>,
    %c0_83 = arith.constant 0 : index
    %c16 = arith.constant 16 : index
    %c0_84 = arith.constant 0 : index
    %103 = vector.load %arg1[%c0_83, %c16, %c0_84] : memref<1x256x16xf32, #tpu.memory_space<vmem>>, vector<1x16x16xf32>
    %104 = vector.shape_cast %103 : vector<1x16x16xf32> to vector<16x16xf32>
    %105 = vector.extract_strided_slice %93 {offsets = [18, 0], sizes = [16, 16], strides = [1, 1]} : vector<252x16xf32> to vector<16x16xf32>
    %106 = arith.addf %105, %104 : vector<16x16xf32>
    %cst_85 = arith.constant 0.000000e+00 : f32
    %107 = vector.broadcast %cst_85 : f32 to vector<16x16xf32>
    %108 = arith.maximumf %106, %107 : vector<16x16xf32>
    %c0_86 = arith.constant 0 : index
    %c16_87 = arith.constant 16 : index
    %c0_88 = arith.constant 0 : index
    %109 = vector.load %arg5[%c0_86, %c16_87, %c0_88] : memref<1x256x16xf32, #tpu.memory_space<vmem>>, vector<1x16x16xf32>
    %110 = vector.shape_cast %109 : vector<1x16x16xf32> to vector<16x16xf32>
    %111 = vector.shape_cast %108 : vector<16x16xf32> to vector<1x16x16xf32>
    tpu.vector_store %arg5[%c0_86, %c16_87, %c0_88], %111 {strides = array<i32>} : memref<1x256x16xf32, #tpu.memory_space<vmem>>, vector<1x16x16xf32>,
    %c0_89 = arith.constant 0 : index
    %c32 = arith.constant 32 : index
    %c0_90 = arith.constant 0 : index
    %112 = vector.load %arg1[%c0_89, %c32, %c0_90] : memref<1x256x16xf32, #tpu.memory_space<vmem>>, vector<1x16x16xf32>
    %113 = vector.shape_cast %112 : vector<1x16x16xf32> to vector<16x16xf32>
    %114 = vector.extract_strided_slice %93 {offsets = [36, 0], sizes = [16, 16], strides = [1, 1]} : vector<252x16xf32> to vector<16x16xf32>
    %115 = arith.addf %114, %113 : vector<16x16xf32>
    %cst_91 = arith.constant 0.000000e+00 : f32
    %116 = vector.broadcast %cst_91 : f32 to vector<16x16xf32>
    %117 = arith.maximumf %115, %116 : vector<16x16xf32>
    %c0_92 = arith.constant 0 : index
    %c32_93 = arith.constant 32 : index
    %c0_94 = arith.constant 0 : index
    %118 = vector.load %arg5[%c0_92, %c32_93, %c0_94] : memref<1x256x16xf32, #tpu.memory_space<vmem>>, vector<1x16x16xf32>
    %119 = vector.shape_cast %118 : vector<1x16x16xf32> to vector<16x16xf32>
    %120 = vector.shape_cast %117 : vector<16x16xf32> to vector<1x16x16xf32>
    tpu.vector_store %arg5[%c0_92, %c32_93, %c0_94], %120 {strides = array<i32>} : memref<1x256x16xf32, #tpu.memory_space<vmem>>, vector<1x16x16xf32>,
    %c0_95 = arith.constant 0 : index
    %c48 = arith.constant 48 : index
    %c0_96 = arith.constant 0 : index
    %121 = vector.load %arg1[%c0_95, %c48, %c0_96] : memref<1x256x16xf32, #tpu.memory_space<vmem>>, vector<1x16x16xf32>
    %122 = vector.shape_cast %121 : vector<1x16x16xf32> to vector<16x16xf32>
    %123 = vector.extract_strided_slice %93 {offsets = [54, 0], sizes = [16, 16], strides = [1, 1]} : vector<252x16xf32> to vector<16x16xf32>
    %124 = arith.addf %123, %122 : vector<16x16xf32>
    %cst_97 = arith.constant 0.000000e+00 : f32
    %125 = vector.broadcast %cst_97 : f32 to vector<16x16xf32>
    %126 = arith.maximumf %124, %125 : vector<16x16xf32>
    %c0_98 = arith.constant 0 : index
    %c48_99 = arith.constant 48 : index
    %c0_100 = arith.constant 0 : index
    %127 = vector.load %arg5[%c0_98, %c48_99, %c0_100] : memref<1x256x16xf32, #tpu.memory_space<vmem>>, vector<1x16x16xf32>
    %128 = vector.shape_cast %127 : vector<1x16x16xf32> to vector<16x16xf32>
    %129 = vector.shape_cast %126 : vector<16x16xf32> to vector<1x16x16xf32>
    tpu.vector_store %arg5[%c0_98, %c48_99, %c0_100], %129 {strides = array<i32>} : memref<1x256x16xf32, #tpu.memory_space<vmem>>, vector<1x16x16xf32>,
    %c0_101 = arith.constant 0 : index
    %c64 = arith.constant 64 : index
    %c0_102 = arith.constant 0 : index
    %130 = vector.load %arg1[%c0_101, %c64, %c0_102] : memref<1x256x16xf32, #tpu.memory_space<vmem>>, vector<1x16x16xf32>
    %131 = vector.shape_cast %130 : vector<1x16x16xf32> to vector<16x16xf32>
    %132 = vector.extract_strided_slice %93 {offsets = [72, 0], sizes = [16, 16], strides = [1, 1]} : vector<252x16xf32> to vector<16x16xf32>
    %133 = arith.addf %132, %131 : vector<16x16xf32>
    %cst_103 = arith.constant 0.000000e+00 : f32
    %134 = vector.broadcast %cst_103 : f32 to vector<16x16xf32>
    %135 = arith.maximumf %133, %134 : vector<16x16xf32>
    %c0_104 = arith.constant 0 : index
    %c64_105 = arith.constant 64 : index
    %c0_106 = arith.constant 0 : index
    %136 = vector.load %arg5[%c0_104, %c64_105, %c0_106] : memref<1x256x16xf32, #tpu.memory_space<vmem>>, vector<1x16x16xf32>
    %137 = vector.shape_cast %136 : vector<1x16x16xf32> to vector<16x16xf32>
    %138 = vector.shape_cast %135 : vector<16x16xf32> to vector<1x16x16xf32>
    tpu.vector_store %arg5[%c0_104, %c64_105, %c0_106], %138 {strides = array<i32>} : memref<1x256x16xf32, #tpu.memory_space<vmem>>, vector<1x16x16xf32>,
    %c0_107 = arith.constant 0 : index
    %c80_108 = arith.constant 80 : index
    %c0_109 = arith.constant 0 : index
    %139 = vector.load %arg1[%c0_107, %c80_108, %c0_109] : memref<1x256x16xf32, #tpu.memory_space<vmem>>, vector<1x16x16xf32>
    %140 = vector.shape_cast %139 : vector<1x16x16xf32> to vector<16x16xf32>
    %141 = vector.extract_strided_slice %93 {offsets = [90, 0], sizes = [16, 16], strides = [1, 1]} : vector<252x16xf32> to vector<16x16xf32>
    %142 = arith.addf %141, %140 : vector<16x16xf32>
    %cst_110 = arith.constant 0.000000e+00 : f32
    %143 = vector.broadcast %cst_110 : f32 to vector<16x16xf32>
    %144 = arith.maximumf %142, %143 : vector<16x16xf32>
    %c0_111 = arith.constant 0 : index
    %c80_112 = arith.constant 80 : index
    %c0_113 = arith.constant 0 : index
    %145 = vector.load %arg5[%c0_111, %c80_112, %c0_113] : memref<1x256x16xf32, #tpu.memory_space<vmem>>, vector<1x16x16xf32>
    %146 = vector.shape_cast %145 : vector<1x16x16xf32> to vector<16x16xf32>
    %147 = vector.shape_cast %144 : vector<16x16xf32> to vector<1x16x16xf32>
    tpu.vector_store %arg5[%c0_111, %c80_112, %c0_113], %147 {strides = array<i32>} : memref<1x256x16xf32, #tpu.memory_space<vmem>>, vector<1x16x16xf32>,
    %c0_114 = arith.constant 0 : index
    %c96 = arith.constant 96 : index
    %c0_115 = arith.constant 0 : index
    %148 = vector.load %arg1[%c0_114, %c96, %c0_115] : memref<1x256x16xf32, #tpu.memory_space<vmem>>, vector<1x16x16xf32>
    %149 = vector.shape_cast %148 : vector<1x16x16xf32> to vector<16x16xf32>
    %150 = vector.extract_strided_slice %93 {offsets = [108, 0], sizes = [16, 16], strides = [1, 1]} : vector<252x16xf32> to vector<16x16xf32>
    %151 = arith.addf %150, %149 : vector<16x16xf32>
    %cst_116 = arith.constant 0.000000e+00 : f32
    %152 = vector.broadcast %cst_116 : f32 to vector<16x16xf32>
    %153 = arith.maximumf %151, %152 : vector<16x16xf32>
    %c0_117 = arith.constant 0 : index
    %c96_118 = arith.constant 96 : index
    %c0_119 = arith.constant 0 : index
    %154 = vector.load %arg5[%c0_117, %c96_118, %c0_119] : memref<1x256x16xf32, #tpu.memory_space<vmem>>, vector<1x16x16xf32>
    %155 = vector.shape_cast %154 : vector<1x16x16xf32> to vector<16x16xf32>
    %156 = vector.shape_cast %153 : vector<16x16xf32> to vector<1x16x16xf32>
    tpu.vector_store %arg5[%c0_117, %c96_118, %c0_119], %156 {strides = array<i32>} : memref<1x256x16xf32, #tpu.memory_space<vmem>>, vector<1x16x16xf32>,
    %c0_120 = arith.constant 0 : index
    %c112 = arith.constant 112 : index
    %c0_121 = arith.constant 0 : index
    %157 = vector.load %arg1[%c0_120, %c112, %c0_121] : memref<1x256x16xf32, #tpu.memory_space<vmem>>, vector<1x16x16xf32>
    %158 = vector.shape_cast %157 : vector<1x16x16xf32> to vector<16x16xf32>
    %159 = vector.extract_strided_slice %93 {offsets = [126, 0], sizes = [16, 16], strides = [1, 1]} : vector<252x16xf32> to vector<16x16xf32>
    %160 = arith.addf %159, %158 : vector<16x16xf32>
    %cst_122 = arith.constant 0.000000e+00 : f32
    %161 = vector.broadcast %cst_122 : f32 to vector<16x16xf32>
    %162 = arith.maximumf %160, %161 : vector<16x16xf32>
    %c0_123 = arith.constant 0 : index
    %c112_124 = arith.constant 112 : index
    %c0_125 = arith.constant 0 : index
    %163 = vector.load %arg5[%c0_123, %c112_124, %c0_125] : memref<1x256x16xf32, #tpu.memory_space<vmem>>, vector<1x16x16xf32>
    %164 = vector.shape_cast %163 : vector<1x16x16xf32> to vector<16x16xf32>
    %165 = vector.shape_cast %162 : vector<16x16xf32> to vector<1x16x16xf32>
    tpu.vector_store %arg5[%c0_123, %c112_124, %c0_125], %165 {strides = array<i32>} : memref<1x256x16xf32, #tpu.memory_space<vmem>>, vector<1x16x16xf32>,
    %c0_126 = arith.constant 0 : index
    %c128 = arith.constant 128 : index
    %c0_127 = arith.constant 0 : index
    %166 = vector.load %arg1[%c0_126, %c128, %c0_127] : memref<1x256x16xf32, #tpu.memory_space<vmem>>, vector<1x16x16xf32>
    %167 = vector.shape_cast %166 : vector<1x16x16xf32> to vector<16x16xf32>
    %168 = vector.extract_strided_slice %93 {offsets = [144, 0], sizes = [16, 16], strides = [1, 1]} : vector<252x16xf32> to vector<16x16xf32>
    %169 = arith.addf %168, %167 : vector<16x16xf32>
    %cst_128 = arith.constant 0.000000e+00 : f32
    %170 = vector.broadcast %cst_128 : f32 to vector<16x16xf32>
    %171 = arith.maximumf %169, %170 : vector<16x16xf32>
    %c0_129 = arith.constant 0 : index
    %c128_130 = arith.constant 128 : index
    %c0_131 = arith.constant 0 : index
    %172 = vector.load %arg5[%c0_129, %c128_130, %c0_131] : memref<1x256x16xf32, #tpu.memory_space<vmem>>, vector<1x16x16xf32>
    %173 = vector.shape_cast %172 : vector<1x16x16xf32> to vector<16x16xf32>
    %174 = vector.shape_cast %171 : vector<16x16xf32> to vector<1x16x16xf32>
    tpu.vector_store %arg5[%c0_129, %c128_130, %c0_131], %174 {strides = array<i32>} : memref<1x256x16xf32, #tpu.memory_space<vmem>>, vector<1x16x16xf32>,
    %c0_132 = arith.constant 0 : index
    %c144 = arith.constant 144 : index
    %c0_133 = arith.constant 0 : index
    %175 = vector.load %arg1[%c0_132, %c144, %c0_133] : memref<1x256x16xf32, #tpu.memory_space<vmem>>, vector<1x16x16xf32>
    %176 = vector.shape_cast %175 : vector<1x16x16xf32> to vector<16x16xf32>
    %177 = vector.extract_strided_slice %93 {offsets = [162, 0], sizes = [16, 16], strides = [1, 1]} : vector<252x16xf32> to vector<16x16xf32>
    %178 = arith.addf %177, %176 : vector<16x16xf32>
    %cst_134 = arith.constant 0.000000e+00 : f32
    %179 = vector.broadcast %cst_134 : f32 to vector<16x16xf32>
    %180 = arith.maximumf %178, %179 : vector<16x16xf32>
    %c0_135 = arith.constant 0 : index
    %c144_136 = arith.constant 144 : index
    %c0_137 = arith.constant 0 : index
    %181 = vector.load %arg5[%c0_135, %c144_136, %c0_137] : memref<1x256x16xf32, #tpu.memory_space<vmem>>, vector<1x16x16xf32>
    %182 = vector.shape_cast %181 : vector<1x16x16xf32> to vector<16x16xf32>
    %183 = vector.shape_cast %180 : vector<16x16xf32> to vector<1x16x16xf32>
    tpu.vector_store %arg5[%c0_135, %c144_136, %c0_137], %183 {strides = array<i32>} : memref<1x256x16xf32, #tpu.memory_space<vmem>>, vector<1x16x16xf32>,
    %c0_138 = arith.constant 0 : index
    %c160 = arith.constant 160 : index
    %c0_139 = arith.constant 0 : index
    %184 = vector.load %arg1[%c0_138, %c160, %c0_139] : memref<1x256x16xf32, #tpu.memory_space<vmem>>, vector<1x16x16xf32>
    %185 = vector.shape_cast %184 : vector<1x16x16xf32> to vector<16x16xf32>
    %186 = vector.extract_strided_slice %93 {offsets = [180, 0], sizes = [16, 16], strides = [1, 1]} : vector<252x16xf32> to vector<16x16xf32>
    %187 = arith.addf %186, %185 : vector<16x16xf32>
    %cst_140 = arith.constant 0.000000e+00 : f32
    %188 = vector.broadcast %cst_140 : f32 to vector<16x16xf32>
    %189 = arith.maximumf %187, %188 : vector<16x16xf32>
    %c0_141 = arith.constant 0 : index
    %c160_142 = arith.constant 160 : index
    %c0_143 = arith.constant 0 : index
    %190 = vector.load %arg5[%c0_141, %c160_142, %c0_143] : memref<1x256x16xf32, #tpu.memory_space<vmem>>, vector<1x16x16xf32>
    %191 = vector.shape_cast %190 : vector<1x16x16xf32> to vector<16x16xf32>
    %192 = vector.shape_cast %189 : vector<16x16xf32> to vector<1x16x16xf32>
    tpu.vector_store %arg5[%c0_141, %c160_142, %c0_143], %192 {strides = array<i32>} : memref<1x256x16xf32, #tpu.memory_space<vmem>>, vector<1x16x16xf32>,
    %c0_144 = arith.constant 0 : index
    %c176 = arith.constant 176 : index
    %c0_145 = arith.constant 0 : index
    %193 = vector.load %arg1[%c0_144, %c176, %c0_145] : memref<1x256x16xf32, #tpu.memory_space<vmem>>, vector<1x16x16xf32>
    %194 = vector.shape_cast %193 : vector<1x16x16xf32> to vector<16x16xf32>
    %195 = vector.extract_strided_slice %93 {offsets = [198, 0], sizes = [16, 16], strides = [1, 1]} : vector<252x16xf32> to vector<16x16xf32>
    %196 = arith.addf %195, %194 : vector<16x16xf32>
    %cst_146 = arith.constant 0.000000e+00 : f32
    %197 = vector.broadcast %cst_146 : f32 to vector<16x16xf32>
    %198 = arith.maximumf %196, %197 : vector<16x16xf32>
    %c0_147 = arith.constant 0 : index
    %c176_148 = arith.constant 176 : index
    %c0_149 = arith.constant 0 : index
    %199 = vector.load %arg5[%c0_147, %c176_148, %c0_149] : memref<1x256x16xf32, #tpu.memory_space<vmem>>, vector<1x16x16xf32>
    %200 = vector.shape_cast %199 : vector<1x16x16xf32> to vector<16x16xf32>
    %201 = vector.shape_cast %198 : vector<16x16xf32> to vector<1x16x16xf32>
    tpu.vector_store %arg5[%c0_147, %c176_148, %c0_149], %201 {strides = array<i32>} : memref<1x256x16xf32, #tpu.memory_space<vmem>>, vector<1x16x16xf32>,
    %c0_150 = arith.constant 0 : index
    %c192 = arith.constant 192 : index
    %c0_151 = arith.constant 0 : index
    %202 = vector.load %arg1[%c0_150, %c192, %c0_151] : memref<1x256x16xf32, #tpu.memory_space<vmem>>, vector<1x16x16xf32>
    %203 = vector.shape_cast %202 : vector<1x16x16xf32> to vector<16x16xf32>
    %204 = vector.extract_strided_slice %93 {offsets = [216, 0], sizes = [16, 16], strides = [1, 1]} : vector<252x16xf32> to vector<16x16xf32>
    %205 = arith.addf %204, %203 : vector<16x16xf32>
    %cst_152 = arith.constant 0.000000e+00 : f32
    %206 = vector.broadcast %cst_152 : f32 to vector<16x16xf32>
    %207 = arith.maximumf %205, %206 : vector<16x16xf32>
    %c0_153 = arith.constant 0 : index
    %c192_154 = arith.constant 192 : index
    %c0_155 = arith.constant 0 : index
    %208 = vector.load %arg5[%c0_153, %c192_154, %c0_155] : memref<1x256x16xf32, #tpu.memory_space<vmem>>, vector<1x16x16xf32>
    %209 = vector.shape_cast %208 : vector<1x16x16xf32> to vector<16x16xf32>
    %210 = vector.shape_cast %207 : vector<16x16xf32> to vector<1x16x16xf32>
    tpu.vector_store %arg5[%c0_153, %c192_154, %c0_155], %210 {strides = array<i32>} : memref<1x256x16xf32, #tpu.memory_space<vmem>>, vector<1x16x16xf32>,
    %c0_156 = arith.constant 0 : index
    %c208 = arith.constant 208 : index
    %c0_157 = arith.constant 0 : index
    %211 = vector.load %arg1[%c0_156, %c208, %c0_157] : memref<1x256x16xf32, #tpu.memory_space<vmem>>, vector<1x16x16xf32>
    %212 = vector.shape_cast %211 : vector<1x16x16xf32> to vector<16x16xf32>
    %213 = vector.extract_strided_slice %93 {offsets = [234, 0], sizes = [16, 16], strides = [1, 1]} : vector<252x16xf32> to vector<16x16xf32>
    %214 = arith.addf %213, %212 : vector<16x16xf32>
    %cst_158 = arith.constant 0.000000e+00 : f32
    %215 = vector.broadcast %cst_158 : f32 to vector<16x16xf32>
    %216 = arith.maximumf %214, %215 : vector<16x16xf32>
    %c0_159 = arith.constant 0 : index
    %c208_160 = arith.constant 208 : index
    %c0_161 = arith.constant 0 : index
    %217 = vector.load %arg5[%c0_159, %c208_160, %c0_161] : memref<1x256x16xf32, #tpu.memory_space<vmem>>, vector<1x16x16xf32>
    %218 = vector.shape_cast %217 : vector<1x16x16xf32> to vector<16x16xf32>
    %219 = vector.shape_cast %216 : vector<16x16xf32> to vector<1x16x16xf32>
    tpu.vector_store %arg5[%c0_159, %c208_160, %c0_161], %219 {strides = array<i32>} : memref<1x256x16xf32, #tpu.memory_space<vmem>>, vector<1x16x16xf32>,
    %c259 = arith.constant 259 : index
    %c0_162 = arith.constant 0 : index
    %220 = vector.load %arg6[%c259, %c0_162] : memref<340x4xf32, #tpu.memory_space<vmem>>, vector<36x4xf32>
    %c0_163 = arith.constant 0 : index
    %c0_164 = arith.constant 0 : index
    %c0_165 = arith.constant 0 : index
    %221 = vector.load %arg3[%c0_163, %c0_164, %c0_165] : memref<9x4x4xf32, #tpu.memory_space<vmem>>, vector<1x4x4xf32>
    %222 = vector.shape_cast %221 : vector<1x4x4xf32> to vector<4x4xf32>
    %cst_166 = arith.constant dense<0.000000e+00> : vector<36x4xf32>
    %223 = tpu.matmul %220, %222, %cst_166 {dimension_numbers = #tpu.dot_dimension_numbers<[1], [0], [0], [1], [0, 0, 1, 1], [], []>} : vector<36x4xf32>, vector<4x4xf32>, vector<36x4xf32> -> vector<36x4xf32>
    %c260_167 = arith.constant 260 : index
    %c0_168 = arith.constant 0 : index
    %224 = vector.load %arg6[%c260_167, %c0_168] : memref<340x4xf32, #tpu.memory_space<vmem>>, vector<36x4xf32>
    %c1_169 = arith.constant 1 : index
    %c0_170 = arith.constant 0 : index
    %c0_171 = arith.constant 0 : index
    %225 = vector.load %arg3[%c1_169, %c0_170, %c0_171] : memref<9x4x4xf32, #tpu.memory_space<vmem>>, vector<1x4x4xf32>
    %226 = vector.shape_cast %225 : vector<1x4x4xf32> to vector<4x4xf32>
    %cst_172 = arith.constant dense<0.000000e+00> : vector<36x4xf32>
    %227 = tpu.matmul %224, %226, %cst_172 {dimension_numbers = #tpu.dot_dimension_numbers<[1], [0], [0], [1], [0, 0, 1, 1], [], []>} : vector<36x4xf32>, vector<4x4xf32>, vector<36x4xf32> -> vector<36x4xf32>
    %228 = arith.addf %223, %227 : vector<36x4xf32>
    %c261 = arith.constant 261 : index
    %c0_173 = arith.constant 0 : index
    %229 = vector.load %arg6[%c261, %c0_173] : memref<340x4xf32, #tpu.memory_space<vmem>>, vector<36x4xf32>
    %c2_174 = arith.constant 2 : index
    %c0_175 = arith.constant 0 : index
    %c0_176 = arith.constant 0 : index
    %230 = vector.load %arg3[%c2_174, %c0_175, %c0_176] : memref<9x4x4xf32, #tpu.memory_space<vmem>>, vector<1x4x4xf32>
    %231 = vector.shape_cast %230 : vector<1x4x4xf32> to vector<4x4xf32>
    %cst_177 = arith.constant dense<0.000000e+00> : vector<36x4xf32>
    %232 = tpu.matmul %229, %231, %cst_177 {dimension_numbers = #tpu.dot_dimension_numbers<[1], [0], [0], [1], [0, 0, 1, 1], [], []>} : vector<36x4xf32>, vector<4x4xf32>, vector<36x4xf32> -> vector<36x4xf32>
    %233 = arith.addf %228, %232 : vector<36x4xf32>
    %c277 = arith.constant 277 : index
    %c0_178 = arith.constant 0 : index
    %234 = vector.load %arg6[%c277, %c0_178] : memref<340x4xf32, #tpu.memory_space<vmem>>, vector<36x4xf32>
    %c3_179 = arith.constant 3 : index
    %c0_180 = arith.constant 0 : index
    %c0_181 = arith.constant 0 : index
    %235 = vector.load %arg3[%c3_179, %c0_180, %c0_181] : memref<9x4x4xf32, #tpu.memory_space<vmem>>, vector<1x4x4xf32>
    %236 = vector.shape_cast %235 : vector<1x4x4xf32> to vector<4x4xf32>
    %cst_182 = arith.constant dense<0.000000e+00> : vector<36x4xf32>
    %237 = tpu.matmul %234, %236, %cst_182 {dimension_numbers = #tpu.dot_dimension_numbers<[1], [0], [0], [1], [0, 0, 1, 1], [], []>} : vector<36x4xf32>, vector<4x4xf32>, vector<36x4xf32> -> vector<36x4xf32>
    %238 = arith.addf %233, %237 : vector<36x4xf32>
    %c278_183 = arith.constant 278 : index
    %c0_184 = arith.constant 0 : index
    %239 = vector.load %arg6[%c278_183, %c0_184] : memref<340x4xf32, #tpu.memory_space<vmem>>, vector<36x4xf32>
    %c4_185 = arith.constant 4 : index
    %c0_186 = arith.constant 0 : index
    %c0_187 = arith.constant 0 : index
    %240 = vector.load %arg3[%c4_185, %c0_186, %c0_187] : memref<9x4x4xf32, #tpu.memory_space<vmem>>, vector<1x4x4xf32>
    %241 = vector.shape_cast %240 : vector<1x4x4xf32> to vector<4x4xf32>
    %cst_188 = arith.constant dense<0.000000e+00> : vector<36x4xf32>
    %242 = tpu.matmul %239, %241, %cst_188 {dimension_numbers = #tpu.dot_dimension_numbers<[1], [0], [0], [1], [0, 0, 1, 1], [], []>} : vector<36x4xf32>, vector<4x4xf32>, vector<36x4xf32> -> vector<36x4xf32>
    %243 = arith.addf %238, %242 : vector<36x4xf32>
    %c279 = arith.constant 279 : index
    %c0_189 = arith.constant 0 : index
    %244 = vector.load %arg6[%c279, %c0_189] : memref<340x4xf32, #tpu.memory_space<vmem>>, vector<36x4xf32>
    %c5_190 = arith.constant 5 : index
    %c0_191 = arith.constant 0 : index
    %c0_192 = arith.constant 0 : index
    %245 = vector.load %arg3[%c5_190, %c0_191, %c0_192] : memref<9x4x4xf32, #tpu.memory_space<vmem>>, vector<1x4x4xf32>
    %246 = vector.shape_cast %245 : vector<1x4x4xf32> to vector<4x4xf32>
    %cst_193 = arith.constant dense<0.000000e+00> : vector<36x4xf32>
    %247 = tpu.matmul %244, %246, %cst_193 {dimension_numbers = #tpu.dot_dimension_numbers<[1], [0], [0], [1], [0, 0, 1, 1], [], []>} : vector<36x4xf32>, vector<4x4xf32>, vector<36x4xf32> -> vector<36x4xf32>
    %248 = arith.addf %243, %247 : vector<36x4xf32>
    %c295 = arith.constant 295 : index
    %c0_194 = arith.constant 0 : index
    %249 = vector.load %arg6[%c295, %c0_194] : memref<340x4xf32, #tpu.memory_space<vmem>>, vector<36x4xf32>
    %c6_195 = arith.constant 6 : index
    %c0_196 = arith.constant 0 : index
    %c0_197 = arith.constant 0 : index
    %250 = vector.load %arg3[%c6_195, %c0_196, %c0_197] : memref<9x4x4xf32, #tpu.memory_space<vmem>>, vector<1x4x4xf32>
    %251 = vector.shape_cast %250 : vector<1x4x4xf32> to vector<4x4xf32>
    %cst_198 = arith.constant dense<0.000000e+00> : vector<36x4xf32>
    %252 = tpu.matmul %249, %251, %cst_198 {dimension_numbers = #tpu.dot_dimension_numbers<[1], [0], [0], [1], [0, 0, 1, 1], [], []>} : vector<36x4xf32>, vector<4x4xf32>, vector<36x4xf32> -> vector<36x4xf32>
    %253 = arith.addf %248, %252 : vector<36x4xf32>
    %c296_199 = arith.constant 296 : index
    %c0_200 = arith.constant 0 : index
    %254 = vector.load %arg6[%c296_199, %c0_200] : memref<340x4xf32, #tpu.memory_space<vmem>>, vector<36x4xf32>
    %c7_201 = arith.constant 7 : index
    %c0_202 = arith.constant 0 : index
    %c0_203 = arith.constant 0 : index
    %255 = vector.load %arg3[%c7_201, %c0_202, %c0_203] : memref<9x4x4xf32, #tpu.memory_space<vmem>>, vector<1x4x4xf32>
    %256 = vector.shape_cast %255 : vector<1x4x4xf32> to vector<4x4xf32>
    %cst_204 = arith.constant dense<0.000000e+00> : vector<36x4xf32>
    %257 = tpu.matmul %254, %256, %cst_204 {dimension_numbers = #tpu.dot_dimension_numbers<[1], [0], [0], [1], [0, 0, 1, 1], [], []>} : vector<36x4xf32>, vector<4x4xf32>, vector<36x4xf32> -> vector<36x4xf32>
    %258 = arith.addf %253, %257 : vector<36x4xf32>
    %c297 = arith.constant 297 : index
    %c0_205 = arith.constant 0 : index
    %259 = vector.load %arg6[%c297, %c0_205] : memref<340x4xf32, #tpu.memory_space<vmem>>, vector<36x4xf32>
    %c8_206 = arith.constant 8 : index
    %c0_207 = arith.constant 0 : index
    %c0_208 = arith.constant 0 : index
    %260 = vector.load %arg3[%c8_206, %c0_207, %c0_208] : memref<9x4x4xf32, #tpu.memory_space<vmem>>, vector<1x4x4xf32>
    %261 = vector.shape_cast %260 : vector<1x4x4xf32> to vector<4x4xf32>
    %cst_209 = arith.constant dense<0.000000e+00> : vector<36x4xf32>
    %262 = tpu.matmul %259, %261, %cst_209 {dimension_numbers = #tpu.dot_dimension_numbers<[1], [0], [0], [1], [0, 0, 1, 1], [], []>} : vector<36x4xf32>, vector<4x4xf32>, vector<36x4xf32> -> vector<36x4xf32>
    %263 = arith.addf %258, %262 : vector<36x4xf32>
    %cst_210 = arith.constant 0.000000e+00 : f32
    %264 = vector.broadcast %cst_210 : f32 to vector<36x4xf32>
    %265 = arith.maximumf %263, %264 : vector<36x4xf32>
    %c0_211 = arith.constant 0 : index
    %c0_212 = arith.constant 0 : index
    %266 = vector.load %arg4[%c0_211, %c0_212] : memref<4x16xf32, #tpu.memory_space<vmem>>, vector<4x16xf32>
    %cst_213 = arith.constant dense<0.000000e+00> : vector<36x16xf32>
    %267 = tpu.matmul %265, %266, %cst_213 {dimension_numbers = #tpu.dot_dimension_numbers<[1], [0], [0], [1], [0, 0, 1, 1], [], []>} : vector<36x4xf32>, vector<4x16xf32>, vector<36x16xf32> -> vector<36x16xf32>
    %c0_214 = arith.constant 0 : index
    %c224_215 = arith.constant 224 : index
    %c0_216 = arith.constant 0 : index
    %268 = vector.load %arg1[%c0_214, %c224_215, %c0_216] : memref<1x256x16xf32, #tpu.memory_space<vmem>>, vector<1x16x16xf32>
    %269 = vector.shape_cast %268 : vector<1x16x16xf32> to vector<16x16xf32>
    %270 = vector.extract_strided_slice %267 {offsets = [0, 0], sizes = [16, 16], strides = [1, 1]} : vector<36x16xf32> to vector<16x16xf32>
    %271 = arith.addf %270, %269 : vector<16x16xf32>
    %cst_217 = arith.constant 0.000000e+00 : f32
    %272 = vector.broadcast %cst_217 : f32 to vector<16x16xf32>
    %273 = arith.maximumf %271, %272 : vector<16x16xf32>
    %c0_218 = arith.constant 0 : index
    %c224_219 = arith.constant 224 : index
    %c0_220 = arith.constant 0 : index
    %274 = vector.load %arg5[%c0_218, %c224_219, %c0_220] : memref<1x256x16xf32, #tpu.memory_space<vmem>>, vector<1x16x16xf32>
    %275 = vector.shape_cast %274 : vector<1x16x16xf32> to vector<16x16xf32>
    %276 = vector.shape_cast %273 : vector<16x16xf32> to vector<1x16x16xf32>
    tpu.vector_store %arg5[%c0_218, %c224_219, %c0_220], %276 {strides = array<i32>} : memref<1x256x16xf32, #tpu.memory_space<vmem>>, vector<1x16x16xf32>,
    %c0_221 = arith.constant 0 : index
    %c240 = arith.constant 240 : index
    %c0_222 = arith.constant 0 : index
    %277 = vector.load %arg1[%c0_221, %c240, %c0_222] : memref<1x256x16xf32, #tpu.memory_space<vmem>>, vector<1x16x16xf32>
    %278 = vector.shape_cast %277 : vector<1x16x16xf32> to vector<16x16xf32>
    %279 = vector.extract_strided_slice %267 {offsets = [18, 0], sizes = [16, 16], strides = [1, 1]} : vector<36x16xf32> to vector<16x16xf32>
    %280 = arith.addf %279, %278 : vector<16x16xf32>
    %cst_223 = arith.constant 0.000000e+00 : f32
    %281 = vector.broadcast %cst_223 : f32 to vector<16x16xf32>
    %282 = arith.maximumf %280, %281 : vector<16x16xf32>
    %c0_224 = arith.constant 0 : index
    %c240_225 = arith.constant 240 : index
    %c0_226 = arith.constant 0 : index
    %283 = vector.load %arg5[%c0_224, %c240_225, %c0_226] : memref<1x256x16xf32, #tpu.memory_space<vmem>>, vector<1x16x16xf32>
    %284 = vector.shape_cast %283 : vector<1x16x16xf32> to vector<16x16xf32>
    %285 = vector.shape_cast %282 : vector<16x16xf32> to vector<1x16x16xf32>
    tpu.vector_store %arg5[%c0_224, %c240_225, %c0_226], %285 {strides = array<i32>} : memref<1x256x16xf32, #tpu.memory_space<vmem>>, vector<1x16x16xf32>,
    return
  }
  func.func @transform_0(%arg0: i32) -> (i32, i32, i32) {
    %c0_i32 = arith.constant 0 : i32
    %c0_i32_0 = arith.constant 0 : i32
    %c0_i32_1 = arith.constant 0 : i32
    return %arg0, %c0_i32, %c0_i32_0 : i32, i32, i32
  }
  func.func @transform_1(%arg0: i32) -> (i32, i32) {
    %c0_i32 = arith.constant 0 : i32
    %c0_i32_0 = arith.constant 0 : i32
    %c0_i32_1 = arith.constant 0 : i32
    return %c0_i32, %c0_i32_0 : i32, i32
  }
  func.func @transform_2(%arg0: i32) -> (i32, i32, i32) {
    %c0_i32 = arith.constant 0 : i32
    %c0_i32_0 = arith.constant 0 : i32
    %c0_i32_1 = arith.constant 0 : i32
    %c0_i32_2 = arith.constant 0 : i32
    return %c0_i32, %c0_i32_0, %c0_i32_1 : i32, i32, i32
  }
  func.func @transform_3(%arg0: i32) -> (i32, i32) {
    %c0_i32 = arith.constant 0 : i32
    %c0_i32_0 = arith.constant 0 : i32
    %c0_i32_1 = arith.constant 0 : i32
    return %c0_i32, %c0_i32_0 : i32, i32
  }
  func.func @transform_4(%arg0: i32) -> (i32, i32, i32) {
    %c0_i32 = arith.constant 0 : i32
    %c0_i32_0 = arith.constant 0 : i32
    %c0_i32_1 = arith.constant 0 : i32
    return %arg0, %c0_i32, %c0_i32_0 : i32, i32, i32
  }
}

</mosaic_0001>

<bundles_post_ra>
// kernel: bottleneck_forward.1
= control target key start
LH: loop header
LB: loop body
LE: loop exit
PB: predicated region body
PF: predicated region fallthrough
CT: control target
= control target key end

     0   :  { %s8014_s15 = smov 0   ;;  %s9214_s0 = inlined_call_operand.vmem [shape: f32[2,256,16], index: 0, kind: input, shape index: {}]   ;;  %s9215_s1 = inlined_call_operand.vmem [shape: f32[16,4], index: 1, kind: input, shape index: {}]   ;;  %s9216_s2 = inlined_call_operand.vmem [shape: f32[9,4,4], index: 2, kind: input, shape index: {}]   ;;  %s9217_s3 = inlined_call_operand.vmem [shape: f32[4,16], index: 3, kind: input, shape index: {}]   ;;  %s9218_s4 = inlined_call_operand.vmem [shape: f32[2,256,16], index: 4, kind: output, shape index: {}]  }
   0x1 LB: > { %s6020_s16 = sadd.s32 4294967295, %s7985_s15   ;;  %p6024_p0 = scmp.ge.s32.totalorder %s7985_s15, 1  ;;  %s7985_s15 = sphi %s8014_s15, %s14_s15  }
   0x2   : > { %p162_p1 = scmp.lt.s32.totalorder %s7985_s15, 3 }
   0x4   : > { %p163_p2 = pnand %p6024_p0, %p162_p1 }
   0x5   : > { %v271_v0 = vld [vmem:[%s9215_s1] sm:$0xff] (!%p163_p2)  ;;  %v272_v1 = vld [vmem:[%s9215_s1 + $0x8] sm:$0xff] (!%p163_p2)  ;;  %p188_p3 = scmp.lt.s32.totalorder (!%p163_p2), %s6020_s16, 1  ;;  %vm198_vm0 = vcmask (!%p163_p2), 31744   ;;  %v7987_v3 = vmov (!%p163_p2), 0.0   ;;  %vm273_vm1 = vcmask (!%p163_p2), 130048  }
   0x6   : > { %166 = sbr.rel (%p163_p2) target bundleno = 1512 (0x5e8), region = 36  ;;  %v7623_v2 = vpack.c.bf16 (!%p163_p2), %v272_v1, %v271_v0  ;;  %203 = vst.msk [vmem:[#allocation2 + $0x20] sm:$0xff] (!%p163_p2), %vm198_vm0, %v7987_v3  ;;  %204 = vst.msk [vmem:[#allocation2 + $0x28] sm:$0xff] (!%p163_p2), %vm198_vm0, %v7987_v3  ;;  %vm893_vm2 = vcmask (!%p163_p2), 1043456   ;;  %v6128_v36 = vld [vmem:[%s9216_s2 + $0x8] sm:$0xf] (!%p163_p2) }
   0x7   : > { %199 = vst.msk [vmem:[#allocation2] sm:$0xff] (!%p163_p2), %vm198_vm0, %v7987_v3  ;;  %200 = vst.msk [vmem:[#allocation2 + $0x8] sm:$0xff] (!%p163_p2), %vm198_vm0, %v7987_v3  ;;  %v6061_v37 = vld [vmem:[%s9216_s2 + $0x4] sm:$0xf] (!%p163_p2)  ;;  %v6162_v42 = vld [vmem:[%s9216_s2 + $0xc] sm:$0xf] (!%p163_p2) }
   0x8   : > { %201 = vst.msk [vmem:[#allocation2 + $0x10] sm:$0xff] (!%p163_p2), %vm198_vm0, %v7987_v3  ;;  %202 = vst.msk [vmem:[#allocation2 + $0x18] sm:$0xff] (!%p163_p2), %vm198_vm0, %v7987_v3  ;;  %7624 = vmatprep.subr.bf16.mxu0 (!%p163_p2), %v7623_v2  ;;  %7631 = vmatprep.subr.bf16.mxu1 (!%p163_p2), %v7623_v2  ;;  %v762_v43 = vld [vmem:[%s9216_s2] sm:$0xf] (!%p163_p2)  ;;  %v8211_v44 = vld [vmem:[%s9216_s2 + $0x10] sm:$0xf] (!%p163_p2) }
   0x9   : > { %205 = vst.msk [vmem:[#allocation2 + $0x30] sm:$0xff] (!%p163_p2), %vm198_vm0, %v7987_v3  ;;  %206 = vst.msk [vmem:[#allocation2 + $0x38] sm:$0xff] (!%p163_p2), %vm198_vm0, %v7987_v3  ;;  %7626 = vmatpush3.bf16.msra.mxu0 (!%p163_p2), %v7623_v2  ;;  %7632 = vmatpush3.bf16.msra.mxu1 (!%p163_p2), %v7623_v2  ;;  %vm7988_vm3 = vmmov (!%p163_p2), 0   ;;  %vm4545_vm4 = vcmask (!%p163_p2), 1041408   ;;  %vm4558_vm5 = vcmask (!%p163_p2), 130050   ;;  %vm4588_vm6 = vcmask (!%p163_p2), 1045504  }
   0xa   : > { %207 = vst.msk [vmem:[#allocation2 + $0x40] sm:$0xff] (!%p163_p2), %vm198_vm0, %v7987_v3  ;;  %208 = vst.msk [vmem:[#allocation2 + $0x48] sm:$0xff] (!%p163_p2), %vm198_vm0, %v7987_v3  ;;  %7628 = vmatprep.subr.bf16.mxu0 (!%p163_p2), %v7623_v2  ;;  %7053 = vmatprep.subr.msk.mxu1 (!%p163_p2), %vm893_vm2, %v6128_v36  ;;  %vm4561_vm7 = vcmask (!%p163_p2), 123904   ;;  %vm4579_vm8 = vcmask (!%p163_p2), 130052   ;;  %vm4582_vm9 = vcmask (!%p163_p2), 125952   ;;  %vm4601_vm10 = vcmask (!%p163_p2), 130054  }
   0xb   : > { %209 = vst.msk [vmem:[#allocation2 + $0x50] sm:$0xff] (!%p163_p2), %vm198_vm0, %v7987_v3  ;;  %210 = vst.msk [vmem:[#allocation2 + $0x58] sm:$0xff] (!%p163_p2), %vm198_vm0, %v7987_v3  ;;  %vm4604_vm11 = vcmask (!%p163_p2), 128000  }
   0xc   : > { %211 = vst.msk [vmem:[#allocation2 + $0x60] sm:$0xff] (!%p163_p2), %vm198_vm0, %v7987_v3  ;;  %212 = vst.msk [vmem:[#allocation2 + $0x68] sm:$0xff] (!%p163_p2), %vm198_vm0, %v7987_v3 }
   0xd   : > { %s9220_s16 = smov (!%p188_p3, %s6020_s16), 1  ;;  %213 = vst.msk [vmem:[#allocation2 + $0x70] sm:$0xff] %vm198_vm0, %v7987_v3  ;;  %214 = vst.msk [vmem:[#allocation2 + $0x78] sm:$0xff] %vm198_vm0, %v7987_v3 }
   0xe   : > { %215 = vst.msk [vmem:[#allocation2 + $0x80] sm:$0xff] %vm198_vm0, %v7987_v3  ;;  %216 = vst.msk [vmem:[#allocation2 + $0x88] sm:$0xff] %vm198_vm0, %v7987_v3  ;;  %s6469_s21 = sshll.u32 %s9220_s16, 8  ;;  %v763_v38 = vld [vmem:[#allocation2 + $0x8] sm:$0xff] }
   0xf   : > { %217 = vst.msk [vmem:[#allocation2 + $0x90] sm:$0xff] %vm198_vm0, %v7987_v3  ;;  %218 = vst.msk [vmem:[#allocation2 + $0x98] sm:$0xff] %vm198_vm0, %v7987_v3  ;;  %s8120_s24 = scalar_lea.vmem %s9214_s0, %s6469_s21  ;;  %v1446_v39 = vld [vmem:[#allocation2 + $0x9] sm:$0xff]  ;;  %v1447_v41 = vld [vmem:[#allocation2 + $0x11] sm:$0xff]  ;;  %s9043_s19 = scalar_lea.vmem %s9218_s4, %s6469_s21 }
  0x10   : > { %219 = vst.msk [vmem:[#allocation2 + $0xa0] sm:$0xff] %vm198_vm0, %v7987_v3  ;;  %220 = vst.msk [vmem:[#allocation2 + $0xa8] sm:$0xff] %vm198_vm0, %v7987_v3  ;;  %v243_v4 = vld [vmem:[%s8120_s24] sm:$0xff]  ;;  %v244_v5 = vld [vmem:[%s8120_s24 + $0x8] sm:$0xff] }
  0x11   : > { %221 = vst.msk [vmem:[#allocation2 + $0xb0] sm:$0xff] %vm198_vm0, %v7987_v3  ;;  %222 = vst.msk [vmem:[#allocation2 + $0xb8] sm:$0xff] %vm198_vm0, %v7987_v3  ;;  %v245_v6 = vld [vmem:[%s8120_s24 + $0x10] sm:$0xff]  ;;  %6901 = vmatprep.mubr.msk.f32.mxu0 %vm273_vm1, %v243_v4  ;;  %v246_v7 = vld [vmem:[%s8120_s24 + $0x18] sm:$0xff] }
  0x12   : > { %223 = vst.msk [vmem:[#allocation2 + $0xc0] sm:$0xff] %vm198_vm0, %v7987_v3  ;;  %224 = vst.msk [vmem:[#allocation2 + $0xc8] sm:$0xff] %vm198_vm0, %v7987_v3  ;;  %6902 = vmatmul.mubr.msk.f32.vlgmr.msra.gmra.mrb[0].mxu0 %vm273_vm1, %v244_v5  ;;  %v247_v8 = vld [vmem:[%s8120_s24 + $0x20] sm:$0xff]  ;;  %v248_v9 = vld [vmem:[%s8120_s24 + $0x28] sm:$0xff] }
  0x13   : > { %225 = vst.msk [vmem:[#allocation2 + $0xd0] sm:$0xff] %vm198_vm0, %v7987_v3  ;;  %226 = vst.msk [vmem:[#allocation2 + $0xd8] sm:$0xff] %vm198_vm0, %v7987_v3  ;;  %6904 = vmatprep.mubr.msk.f32.mxu0 %vm273_vm1, %v245_v6  ;;  %7630 = vmatpush3.bf16.msra.mxu0 %v7623_v2  ;;  %v249_v10 = vld [vmem:[%s8120_s24 + $0x30] sm:$0xff]  ;;  %v250_v11 = vld [vmem:[%s8120_s24 + $0x38] sm:$0xff] }
  0x14   : > { %227 = vst.msk [vmem:[#allocation2 + $0xe0] sm:$0xff] %vm198_vm0, %v7987_v3  ;;  %228 = vst.msk [vmem:[#allocation2 + $0xe8] sm:$0xff] %vm198_vm0, %v7987_v3  ;;  %v251_v12 = vld [vmem:[%s8120_s24 + $0x40] sm:$0xff]  ;;  %v252_v13 = vld [vmem:[%s8120_s24 + $0x48] sm:$0xff]  ;;  %6953 = vmatprep.subr.msk.mxu0 %vm893_vm2, %v6061_v37 }
  0x15   : > { %229 = vst.msk [vmem:[#allocation2 + $0xf0] sm:$0xff] %vm198_vm0, %v7987_v3  ;;  %230 = vst.msk [vmem:[#allocation2 + $0xf8] sm:$0xff] %vm198_vm0, %v7987_v3  ;;  %v253_v14 = vld [vmem:[%s8120_s24 + $0x50] sm:$0xff]  ;;  %v254_v15 = vld [vmem:[%s8120_s24 + $0x58] sm:$0xff] }
  0x16   : > { %231 = vst.msk [vmem:[#allocation2 + $0x100] sm:$0xff] %vm198_vm0, %v7987_v3  ;;  %232 = vst.msk [vmem:[#allocation2 + $0x108] sm:$0xff] %vm198_vm0, %v7987_v3  ;;  %6905 = vmatmul.mubr.msk.f32.gmra.mrb[2].mxu0 %vm273_vm1, %v246_v7  ;;  %v255_v16 = vld [vmem:[%s8120_s24 + $0x60] sm:$0xff]  ;;  %v256_v17 = vld [vmem:[%s8120_s24 + $0x68] sm:$0xff] }
  0x17   : > { %233 = vst.msk [vmem:[#allocation2 + $0x110] sm:$0xff] %vm198_vm0, %v7987_v3  ;;  %234 = vst.msk [vmem:[#allocation2 + $0x118] sm:$0xff] %vm198_vm0, %v7987_v3  ;;  %6907 = vmatprep.mubr.msk.f32.mxu0 %vm273_vm1, %v247_v8  ;;  %v257_v18 = vld [vmem:[%s8120_s24 + $0x70] sm:$0xff]  ;;  %v258_v19 = vld [vmem:[%s8120_s24 + $0x78] sm:$0xff] }
  0x18   : > { %235 = vst.msk [vmem:[#allocation2 + $0x120] sm:$0xff] %vm198_vm0, %v7987_v3  ;;  %236 = vst.msk [vmem:[#allocation2 + $0x128] sm:$0xff] %vm198_vm0, %v7987_v3  ;;  %v259_v20 = vld [vmem:[%s8120_s24 + $0x80] sm:$0xff]  ;;  %v260_v21 = vld [vmem:[%s8120_s24 + $0x88] sm:$0xff] }
  0x19   : > { %237 = vst.msk [vmem:[#allocation2 + $0x130] sm:$0xff] %vm198_vm0, %v7987_v3  ;;  %238 = vst.msk [vmem:[#allocation2 + $0x138] sm:$0xff] %vm198_vm0, %v7987_v3  ;;  %v261_v22 = vld [vmem:[%s8120_s24 + $0x90] sm:$0xff]  ;;  %v262_v23 = vld [vmem:[%s8120_s24 + $0x98] sm:$0xff] }
  0x1a   : > { %239 = vst.msk [vmem:[#allocation2 + $0x140] sm:$0xff] %vm198_vm0, %v7987_v3  ;;  %240 = vst.msk [vmem:[#allocation2 + $0x148] sm:$0xff] %vm198_vm0, %v7987_v3  ;;  %6908 = vmatmul.mubr.msk.f32.gmra.mrb[4].mxu0 %vm273_vm1, %v248_v9  ;;  %v263_v24 = vld [vmem:[%s8120_s24 + $0xa0] sm:$0xff]  ;;  %v264_v25 = vld [vmem:[%s8120_s24 + $0xa8] sm:$0xff] }
  0x1b   : > { %6910 = vmatprep.mubr.msk.f32.mxu0 %vm273_vm1, %v249_v10  ;;  %v265_v26 = vld [vmem:[%s8120_s24 + $0xb0] sm:$0xff]  ;;  %v266_v27 = vld [vmem:[%s8120_s24 + $0xb8] sm:$0xff]  ;;  %v267_v28 = vld [vmem:[%s8120_s24 + $0xc0] sm:$0xff] }
  0x1c   : > { %v268_v29 = vld [vmem:[%s8120_s24 + $0xc8] sm:$0xff]  ;;  %v269_v30 = vld [vmem:[%s8120_s24 + $0xd0] sm:$0xff]  ;;  %v270_v31 = vld [vmem:[%s8120_s24 + $0xd8] sm:$0xff] }
  0x1d   : > { %v619_v32 = vld [vmem:[%s8120_s24 + $0xe0] sm:$0xff]  ;;  %v620_v33 = vld [vmem:[%s8120_s24 + $0xe8] sm:$0xff]  ;;  %v621_v34 = vld [vmem:[%s8120_s24 + $0xf0] sm:$0xff] }
  0x1e   : > { %6911 = vmatmul.mubr.msk.f32.gmra.mrb[6].mxu0 %vm273_vm1, %v250_v11  ;;  %6950 = vmatprep.mubr.msk.f32.mxu1 %vm273_vm1, %v621_v34  ;;  %v622_v35 = vld [vmem:[%s8120_s24 + $0xf8] sm:$0xff]  ;;  %v764_v40 = vld [vmem:[#allocation2 + $0x10] sm:$0xff] }
  0x1f   : > { %6913 = vmatprep.mubr.msk.f32.mxu0 %vm273_vm1, %v251_v12  ;;  %6951 = vmatmul.mubr.msk.f32.vlgmr.msra.gmra.mrb[0].mxu1 %vm273_vm1, %v622_v35 }
  0x20   : > { %7054 = vmatpush3.msk.msra.mxu1 %vm893_vm2, %v6128_v36  ;;  %7055 = vmatprep.mubr.msk.f32.mxu1 %vm198_vm0, %v1446_v39 }
  0x21   : > { %7103 = vmatprep.subr.msk.mxu1 %vm893_vm2, %v6162_v42 }
  0x22   : > { %6914 = vmatmul.mubr.msk.f32.gmra.mrb[8].mxu0 %vm273_vm1, %v252_v13 }
  0x23   : > { %6916 = vmatprep.mubr.msk.f32.mxu0 %vm273_vm1, %v253_v14  ;;  %7056 = vmatmul.mubr.msk.f32.vlgmr.msra.gmra.mrb[2].mxu1 %vm198_vm0, %v1447_v41 }
  0x24   : > { %7104 = vmatpush3.msk.msra.mxu1 %vm893_vm2, %v6162_v42 }
  0x25   : > { %7153 = vmatprep.subr.msk.mxu1 %vm893_vm2, %v8211_v44 }
  0x26   : > { %6917 = vmatmul.mubr.msk.f32.gmra.mrb[10].mxu0 %vm273_vm1, %v254_v15 }
  0x27   : > { %6919 = vmatprep.mubr.msk.f32.mxu0 %vm273_vm1, %v255_v16 }
  0x2a   : > { %6920 = vmatmul.mubr.msk.f32.gmra.mrb[12].mxu0 %vm273_vm1, %v256_v17 }
  0x2b   : > { %6922 = vmatprep.mubr.msk.f32.mxu0 %vm273_vm1, %v257_v18 }
  0x2e   : > { %6923 = vmatmul.mubr.msk.f32.gmra.mrb[14].mxu0 %vm273_vm1, %v258_v19 }
  0x2f   : > { %6925 = vmatprep.mubr.msk.f32.mxu0 %vm273_vm1, %v259_v20 }
  0x32   : > { %6926 = vmatmul.mubr.msk.f32.gmra.mrb[16].mxu0 %vm273_vm1, %v260_v21 }
  0x33   : > { %6928 = vmatprep.mubr.msk.f32.mxu0 %vm273_vm1, %v261_v22 }
  0x36   : > { %6929 = vmatmul.mubr.msk.f32.gmra.mrb[18].mxu0 %vm273_vm1, %v262_v23 }
  0x37   : > { %6931 = vmatprep.mubr.msk.f32.mxu0 %vm273_vm1, %v263_v24 }
  0x3a   : > { %6932 = vmatmul.mubr.msk.f32.gmra.mrb[20].mxu0 %vm273_vm1, %v264_v25 }
  0x3b   : > { %6934 = vmatprep.mubr.msk.f32.mxu0 %vm273_vm1, %v265_v26 }
  0x3e   : > { %6935 = vmatmul.mubr.msk.f32.gmra.mrb[22].mxu0 %vm273_vm1, %v266_v27 }
  0x3f   : > { %6937 = vmatprep.mubr.msk.f32.mxu0 %vm273_vm1, %v267_v28 }
  0x42   : > { %6938 = vmatmul.mubr.msk.f32.gmra.mrb[24].mxu0 %vm273_vm1, %v268_v29 }
  0x43   : > { %6940 = vmatprep.mubr.msk.f32.mxu0 %vm273_vm1, %v269_v30 }
  0x46   : > { %6941 = vmatmul.mubr.msk.f32.gmra.mrb[26].mxu0 %vm273_vm1, %v270_v31 }
  0x47   : > { %6947 = vmatprep.mubr.msk.f32.mxu0 %vm273_vm1, %v619_v32 }
  0x4a   : > { %6948 = vmatmul.mubr.msk.f32.vlgmr.msra.gmra.mrb[28].mxu0 %vm273_vm1, %v620_v33 }
  0x4b   : > { %6954 = vmatpush3.msk.msra.mxu0 %vm893_vm2, %v6061_v37  ;;  %6955 = vmatprep.mubr.msk.f32.mxu0 %vm198_vm0, %v763_v38 }
  0x4c   : > { %7003 = vmatprep.subr.msk.mxu0 %vm893_vm2, %v762_v43 }
  0x4e   : > { %6956 = vmatmul.mubr.msk.f32.vlgmr.msra.gmra.mrb[30].mxu0 %vm198_vm0, %v764_v40 }
  0x4f   : > { %7004 = vmatpush3.msk.msra.mxu0 %vm893_vm2, %v762_v43 }
  0xe5   : > { %v6903_v45 = vpop.f32.mrb[0].mxu0 }
  0xe6   : > { %v564_v46 = vmax.f32 %v6903_v45, 0.0  ;;  %v424_v47 = vpop.f32.mrb[1].mxu0 }
  0xe7   : > { %v563_v48 = vmax.f32 %v424_v47, 0.0 }
  0xe8   : > { %592 = vst.msk [vmem:[#allocation2 + $0x22] sm:$0xff] %vm198_vm0, %v564_v46 }
  0xe9   : > { %591 = vst.msk [vmem:[#allocation2 + $0x1a] sm:$0xff] %vm198_vm0, %v563_v48  ;;  %v6906_v49 = vpop.f32.mrb[2].mxu0 }
  0xea   : > { %v566_v50 = vmax.f32 %v6906_v49, 0.0  ;;  %v434_v51 = vpop.f32.mrb[3].mxu0 }
  0xeb   : > { %v565_v52 = vmax.f32 %v434_v51, 0.0 }
  0xec   : > { %594 = vst.msk [vmem:[#allocation2 + $0x34] sm:$0xff] %vm198_vm0, %v566_v50 }
  0xed   : > { %593 = vst.msk [vmem:[#allocation2 + $0x2c] sm:$0xff] %vm198_vm0, %v565_v52  ;;  %v6909_v53 = vpop.f32.mrb[4].mxu0 }
  0xee   : > { %v568_v54 = vmax.f32 %v6909_v53, 0.0  ;;  %v444_v55 = vpop.f32.mrb[5].mxu0 }
  0xef   : > { %v567_v56 = vmax.f32 %v444_v55, 0.0 }
  0xf0   : > { %596 = vst.msk [vmem:[#allocation2 + $0x46] sm:$0xff] %vm198_vm0, %v568_v54  ;;  %v765_v57 = vld [vmem:[#allocation2 + $0x18] sm:$0xff]  ;;  %v766_v59 = vld [vmem:[#allocation2 + $0x20] sm:$0xff] }
  0xf1   : > { %v8222_v58 = vld [vmem:[#allocation2 + $0x19] sm:$0xff]  ;;  %595 = vst.msk [vmem:[#allocation2 + $0x3e] sm:$0xff] %vm198_vm0, %v567_v56  ;;  %v6912_v60 = vpop.f32.mrb[6].mxu0  ;;  %6958 = vmatprep.mubr.msk.f32.mxu0 %vm198_vm0, %v765_v57  ;;  %v8228_v61 = vld [vmem:[#allocation2 + $0x21] sm:$0xff] }
  0xf2   : > { %7058 = vmatprep.mubr.msk.f32.mxu1 %vm198_vm0, %v8222_v58  ;;  %v570_v62 = vmax.f32 %v6912_v60, 0.0  ;;  %v454_v63 = vpop.f32.mrb[7].mxu0  ;;  %6959 = vmatmul.mubr.msk.f32.gmra.mrb[32].mxu0 %vm198_vm0, %v766_v59 }
  0xf3   : > { %7059 = vmatmul.mubr.msk.f32.gmra.mrb[4].mxu1 %vm198_vm0, %v8228_v61  ;;  %v569_v0 = vmax.f32 %v454_v63, 0.0 }
  0xf4   : > { %598 = vst.msk [vmem:[#allocation2 + $0x58] sm:$0xff] %vm198_vm0, %v570_v62  ;;  %v767_v1 = vld [vmem:[#allocation2 + $0x28] sm:$0xff]  ;;  %v768_v4 = vld [vmem:[#allocation2 + $0x30] sm:$0xff] }
  0xf5   : > { %v8234_v2 = vld [vmem:[#allocation2 + $0x29] sm:$0xff]  ;;  %597 = vst.msk [vmem:[#allocation2 + $0x50] sm:$0xff] %vm198_vm0, %v569_v0  ;;  %v6915_v5 = vpop.f32.mrb[8].mxu0  ;;  %6961 = vmatprep.mubr.msk.f32.mxu0 %vm198_vm0, %v767_v1  ;;  %v8240_v6 = vld [vmem:[#allocation2 + $0x31] sm:$0xff] }
  0xf6   : > { %7061 = vmatprep.mubr.msk.f32.mxu1 %vm198_vm0, %v8234_v2  ;;  %v572_v7 = vmax.f32 %v6915_v5, 0.0  ;;  %v464_v8 = vpop.f32.mrb[9].mxu0  ;;  %6962 = vmatmul.mubr.msk.f32.gmra.mrb[34].mxu0 %vm198_vm0, %v768_v4 }
  0xf7   : > { %7062 = vmatmul.mubr.msk.f32.gmra.mrb[6].mxu1 %vm198_vm0, %v8240_v6  ;;  %v571_v9 = vmax.f32 %v464_v8, 0.0  ;;  %v771_v17 = vld [vmem:[#allocation2 + $0x48] sm:$0xff] }
  0xf8   : > { %600 = vst.msk [vmem:[#allocation2 + $0x6a] sm:$0xff] %vm198_vm0, %v572_v7  ;;  %v769_v10 = vld [vmem:[#allocation2 + $0x38] sm:$0xff]  ;;  %v770_v12 = vld [vmem:[#allocation2 + $0x40] sm:$0xff] }
  0xf9   : > { %v8246_v11 = vld [vmem:[#allocation2 + $0x39] sm:$0xff]  ;;  %599 = vst.msk [vmem:[#allocation2 + $0x62] sm:$0xff] %vm198_vm0, %v571_v9  ;;  %v6918_v13 = vpop.f32.mrb[10].mxu0  ;;  %6964 = vmatprep.mubr.msk.f32.mxu0 %vm198_vm0, %v769_v10  ;;  %v8252_v14 = vld [vmem:[#allocation2 + $0x41] sm:$0xff] }
  0xfa   : > { %7064 = vmatprep.mubr.msk.f32.mxu1 %vm198_vm0, %v8246_v11  ;;  %v574_v15 = vmax.f32 %v6918_v13, 0.0  ;;  %v474_v16 = vpop.f32.mrb[11].mxu0  ;;  %6965 = vmatmul.mubr.msk.f32.gmra.mrb[36].mxu0 %vm198_vm0, %v770_v12 }
  0xfb   : > { %7065 = vmatmul.mubr.msk.f32.gmra.mrb[8].mxu1 %vm198_vm0, %v8252_v14  ;;  %v573_v18 = vmax.f32 %v474_v16, 0.0  ;;  %6967 = vmatprep.mubr.msk.f32.mxu0 %vm198_vm0, %v771_v17  ;;  %v773_v25 = vld [vmem:[#allocation2 + $0x58] sm:$0xff] }
  0xfc   : > { %602 = vst.msk [vmem:[#allocation2 + $0x7c] sm:$0xff] %vm198_vm0, %v574_v15  ;;  %v8259_v19 = vld [vmem:[#allocation2 + $0x49] sm:$0xff]  ;;  %v8261_v21 = vld [vmem:[#allocation2 + $0x51] sm:$0xff]  ;;  %v8269_v26 = vld [vmem:[#allocation2 + $0x59] sm:$0xff] }
  0xfd   : > { %v772_v20 = vld [vmem:[#allocation2 + $0x50] sm:$0xff]  ;;  %601 = vst.msk [vmem:[#allocation2 + $0x74] sm:$0xff] %vm198_vm0, %v573_v18  ;;  %v6921_v22 = vpop.f32.mrb[12].mxu0  ;;  %7067 = vmatprep.mubr.msk.f32.mxu1 %vm198_vm0, %v8259_v19 }
  0xfe   : > { %v576_v23 = vmax.f32 %v6921_v22, 0.0  ;;  %v484_v24 = vpop.f32.mrb[13].mxu0  ;;  %6968 = vmatmul.mubr.msk.f32.gmra.mrb[38].mxu0 %vm198_vm0, %v772_v20 }
  0xff   : > { %7068 = vmatmul.mubr.msk.f32.gmra.mrb[10].mxu1 %vm198_vm0, %v8261_v21  ;;  %v575_v27 = vmax.f32 %v484_v24, 0.0  ;;  %6970 = vmatprep.mubr.msk.f32.mxu0 %vm198_vm0, %v773_v25 }
 0x100   : > { %7070 = vmatprep.mubr.msk.f32.mxu1 %vm198_vm0, %v8269_v26  ;;  %604 = vst.msk [vmem:[#allocation2 + $0x8e] sm:$0xff] %vm198_vm0, %v576_v23  ;;  %v774_v28 = vld [vmem:[#allocation2 + $0x60] sm:$0xff]  ;;  %v775_v33 = vld [vmem:[#allocation2 + $0x68] sm:$0xff] }
 0x101   : > { %v8275_v29 = vld [vmem:[#allocation2 + $0x61] sm:$0xff]  ;;  %603 = vst.msk [vmem:[#allocation2 + $0x86] sm:$0xff] %vm198_vm0, %v575_v27  ;;  %v6924_v30 = vpop.f32.mrb[14].mxu0  ;;  %v8281_v34 = vld [vmem:[#allocation2 + $0x69] sm:$0xff] }
 0x102   : > { %v578_v31 = vmax.f32 %v6924_v30, 0.0  ;;  %v494_v32 = vpop.f32.mrb[15].mxu0  ;;  %6971 = vmatmul.mubr.msk.f32.gmra.mrb[40].mxu0 %vm198_vm0, %v774_v28 }
 0x103   : > { %7071 = vmatmul.mubr.msk.f32.gmra.mrb[12].mxu1 %vm198_vm0, %v8275_v29  ;;  %v577_v35 = vmax.f32 %v494_v32, 0.0  ;;  %6973 = vmatprep.mubr.msk.f32.mxu0 %vm198_vm0, %v775_v33 }
 0x104   : > { %7073 = vmatprep.mubr.msk.f32.mxu1 %vm198_vm0, %v8281_v34  ;;  %606 = vst.msk [vmem:[#allocation2 + $0xa0] sm:$0xff] %vm198_vm0, %v578_v31  ;;  %v776_v36 = vld [vmem:[#allocation2 + $0x70] sm:$0xff]  ;;  %v777_v41 = vld [vmem:[#allocation2 + $0x78] sm:$0xff] }
 0x105   : > { %v8287_v37 = vld [vmem:[#allocation2 + $0x71] sm:$0xff]  ;;  %605 = vst.msk [vmem:[#allocation2 + $0x98] sm:$0xff] %vm198_vm0, %v577_v35  ;;  %v6927_v38 = vpop.f32.mrb[16].mxu0  ;;  %v8293_v42 = vld [vmem:[#allocation2 + $0x79] sm:$0xff] }
 0x106   : > { %v580_v39 = vmax.f32 %v6927_v38, 0.0  ;;  %v504_v40 = vpop.f32.mrb[17].mxu0  ;;  %6974 = vmatmul.mubr.msk.f32.gmra.mrb[42].mxu0 %vm198_vm0, %v776_v36 }
 0x107   : > { %7074 = vmatmul.mubr.msk.f32.gmra.mrb[14].mxu1 %vm198_vm0, %v8287_v37  ;;  %v579_v43 = vmax.f32 %v504_v40, 0.0  ;;  %6976 = vmatprep.mubr.msk.f32.mxu0 %vm198_vm0, %v777_v41  ;;  %v780_v55 = vld [vmem:[#allocation2 + $0x90] sm:$0xff] }
 0x108   : > { %7076 = vmatprep.mubr.msk.f32.mxu1 %vm198_vm0, %v8293_v42  ;;  %608 = vst.msk [vmem:[#allocation2 + $0xb2] sm:$0xff] %vm198_vm0, %v580_v39  ;;  %v778_v45 = vld [vmem:[#allocation2 + $0x80] sm:$0xff]  ;;  %v779_v50 = vld [vmem:[#allocation2 + $0x88] sm:$0xff] }
 0x109   : > { %v8299_v46 = vld [vmem:[#allocation2 + $0x81] sm:$0xff]  ;;  %607 = vst.msk [vmem:[#allocation2 + $0xaa] sm:$0xff] %vm198_vm0, %v579_v43  ;;  %v6930_v47 = vpop.f32.mrb[18].mxu0  ;;  %v8305_v51 = vld [vmem:[#allocation2 + $0x89] sm:$0xff] }
 0x10a   : > { %v582_v48 = vmax.f32 %v6930_v47, 0.0  ;;  %v514_v49 = vpop.f32.mrb[19].mxu0  ;;  %6977 = vmatmul.mubr.msk.f32.gmra.mrb[44].mxu0 %vm198_vm0, %v778_v45 }
 0x10b   : > { %7077 = vmatmul.mubr.msk.f32.gmra.mrb[16].mxu1 %vm198_vm0, %v8299_v46  ;;  %v581_v52 = vmax.f32 %v514_v49, 0.0  ;;  %6979 = vmatprep.mubr.msk.f32.mxu0 %vm198_vm0, %v779_v50  ;;  %v782_v4 = vld [vmem:[#allocation2 + $0xa0] sm:$0xff] }
 0x10c   : > { %7079 = vmatprep.mubr.msk.f32.mxu1 %vm198_vm0, %v8305_v51  ;;  %610 = vst.msk [vmem:[#allocation2 + $0xc4] sm:$0xff] %vm198_vm0, %v582_v48  ;;  %v8311_v53 = vld [vmem:[#allocation2 + $0x91] sm:$0xff]  ;;  %v8317_v60 = vld [vmem:[#allocation2 + $0x99] sm:$0xff]  ;;  %v8326_v5 = vld [vmem:[#allocation2 + $0xa1] sm:$0xff] }
 0x10d   : > { %609 = vst.msk [vmem:[#allocation2 + $0xbc] sm:$0xff] %vm198_vm0, %v581_v52  ;;  %v6933_v54 = vpop.f32.mrb[20].mxu0  ;;  %v781_v59 = vld [vmem:[#allocation2 + $0x98] sm:$0xff] }
 0x10e   : > { %v584_v56 = vmax.f32 %v6933_v54, 0.0  ;;  %v524_v57 = vpop.f32.mrb[21].mxu0  ;;  %6980 = vmatmul.mubr.msk.f32.gmra.mrb[46].mxu0 %vm198_vm0, %v780_v55  ;;  %v730_v55 = vld [vmem:[#allocation2 + $0x7] sm:$0xff] }
 0x10f   : > { %7080 = vmatmul.mubr.msk.f32.gmra.mrb[18].mxu1 %vm198_vm0, %v8311_v53  ;;  %v583_v62 = vmax.f32 %v524_v57, 0.0  ;;  %6982 = vmatprep.mubr.msk.f32.mxu0 %vm198_vm0, %v781_v59  ;;  %v731_v59 = vld [vmem:[#allocation2 + $0xf] sm:$0xff] }
 0x110   : > { %7082 = vmatprep.mubr.msk.f32.mxu1 %vm198_vm0, %v8317_v60  ;;  %612 = vst.msk [vmem:[#allocation2 + $0xd6] sm:$0xff] %vm198_vm0, %v584_v56  ;;  %v783_v63 = vld [vmem:[#allocation2 + $0xa8] sm:$0xff]  ;;  %v784_v12 = vld [vmem:[#allocation2 + $0xb0] sm:$0xff] }
 0x111   : > { %v8323_v0 = vld [vmem:[#allocation2 + $0xa9] sm:$0xff]  ;;  %611 = vst.msk [vmem:[#allocation2 + $0xce] sm:$0xff] %vm198_vm0, %v583_v62  ;;  %v6936_v1 = vpop.f32.mrb[22].mxu0  ;;  %v8336_v13 = vld [vmem:[#allocation2 + $0xb1] sm:$0xff] }
 0x112   : > { %v586_v7 = vmax.f32 %v6936_v1, 0.0  ;;  %v534_v8 = vpop.f32.mrb[23].mxu0  ;;  %6983 = vmatmul.mubr.msk.f32.gmra.mrb[48].mxu0 %vm198_vm0, %v782_v4  ;;  %v8400_v62 = vld [vmem:[%s9216_s2 + $0x14] sm:$0xf]  ;;  %v734_v1 = vld [vmem:[#allocation2 + $0x27] sm:$0xff] }
 0x113   : > { %7083 = vmatmul.mubr.msk.f32.gmra.mrb[20].mxu1 %vm198_vm0, %v8326_v5  ;;  %v585_v9 = vmax.f32 %v534_v8, 0.0  ;;  %6985 = vmatprep.mubr.msk.f32.mxu0 %vm198_vm0, %v783_v63  ;;  %v732_v63 = vld [vmem:[#allocation2 + $0x17] sm:$0xff] }
 0x114   : > { %7085 = vmatprep.mubr.msk.f32.mxu1 %vm198_vm0, %v8323_v0  ;;  %614 = vst.msk [vmem:[#allocation2 + $0xe8] sm:$0xff] %vm198_vm0, %v586_v7  ;;  %v785_v17 = vld [vmem:[#allocation2 + $0xb8] sm:$0xff]  ;;  %v786_v23 = vld [vmem:[#allocation2 + $0xc0] sm:$0xff] }
 0x115   : > { %613 = vst.msk [vmem:[#allocation2 + $0xe0] sm:$0xff] %vm198_vm0, %v585_v9  ;;  %v6939_v10 = vpop.f32.mrb[24].mxu0  ;;  %v8341_v18 = vld [vmem:[#allocation2 + $0xb9] sm:$0xff]  ;;  %v8348_v24 = vld [vmem:[#allocation2 + $0xc1] sm:$0xff] }
 0x116   : > { %v588_v15 = vmax.f32 %v6939_v10, 0.0  ;;  %v544_v16 = vpop.f32.mrb[25].mxu0  ;;  %6986 = vmatmul.mubr.msk.f32.gmra.mrb[50].mxu0 %vm198_vm0, %v784_v12  ;;  %v745_v9 = vld [vmem:[#allocation2 + $0x7f] sm:$0xff] }
 0x117   : > { %7086 = vmatmul.mubr.msk.f32.gmra.mrb[22].mxu1 %vm198_vm0, %v8336_v13  ;;  %v587_v20 = vmax.f32 %v544_v16, 0.0  ;;  %6988 = vmatprep.mubr.msk.f32.mxu0 %vm198_vm0, %v785_v17  ;;  %v789_v39 = vld [vmem:[#allocation2 + $0xd8] sm:$0xff] }
 0x118   : > { %7088 = vmatprep.mubr.msk.f32.mxu1 %vm198_vm0, %v8341_v18  ;;  %616 = vst.msk [vmem:[#allocation2 + $0xfa] sm:$0xff] %vm198_vm0, %v588_v15  ;;  %v787_v28 = vld [vmem:[#allocation2 + $0xc8] sm:$0xff]  ;;  %v788_v33 = vld [vmem:[#allocation2 + $0xd0] sm:$0xff] }
 0x119   : > { %615 = vst.msk [vmem:[#allocation2 + $0xf2] sm:$0xff] %vm198_vm0, %v587_v20  ;;  %v6942_v22 = vpop.f32.mrb[26].mxu0  ;;  %v8353_v30 = vld [vmem:[#allocation2 + $0xc9] sm:$0xff]  ;;  %v8360_v35 = vld [vmem:[#allocation2 + $0xd1] sm:$0xff] }
 0x11a   : > { %v590_v25 = vmax.f32 %v6942_v22, 0.0  ;;  %v554_v27 = vpop.f32.mrb[27].mxu0  ;;  %6989 = vmatmul.mubr.msk.f32.gmra.mrb[52].mxu0 %vm198_vm0, %v786_v23  ;;  %v754_v10 = vld [vmem:[#allocation2 + $0xc7] sm:$0xff]  ;;  %v755_v12 = vld [vmem:[#allocation2 + $0xcf] sm:$0xff] }
 0x11b   : > { %7089 = vmatmul.mubr.msk.f32.gmra.mrb[24].mxu1 %vm198_vm0, %v8348_v24  ;;  %v589_v31 = vmax.f32 %v554_v27, 0.0  ;;  %6991 = vmatprep.mubr.msk.f32.mxu0 %vm198_vm0, %v787_v28  ;;  %v791_v47 = vld [vmem:[#allocation2 + $0xe8] sm:$0xff]  ;;  %v8502_v28 = vld [vmem:[%s9216_s2 + $0x18] sm:$0xf] }
 0x11c   : > { %7091 = vmatprep.mubr.msk.f32.mxu1 %vm198_vm0, %v8353_v30  ;;  %618 = vst.msk [vmem:[#allocation2 + $0x10c] sm:$0xff] %vm198_vm0, %v590_v25  ;;  %v8365_v40 = vld [vmem:[#allocation2 + $0xd9] sm:$0xff]  ;;  %v8372_v45 = vld [vmem:[#allocation2 + $0xe1] sm:$0xff]  ;;  %v8377_v48 = vld [vmem:[#allocation2 + $0xe9] sm:$0xff] }
 0x11d   : > { %617 = vst.msk [vmem:[#allocation2 + $0x104] sm:$0xff] %vm198_vm0, %v589_v31  ;;  %v6949_v32 = vpop.f32.mrb[28].mxu0  ;;  %v790_v43 = vld [vmem:[#allocation2 + $0xe0] sm:$0xff]  ;;  %v2229_v31 = vld [vmem:[#allocation2 + $0x32] sm:$0xff] }
 0x11e   : > { %v723_v36 = vmax.f32 %v6949_v32, 0.0  ;;  %v703_v38 = vpop.f32.mrb[29].mxu0  ;;  %6992 = vmatmul.mubr.msk.f32.gmra.mrb[54].mxu0 %vm198_vm0, %v788_v33  ;;  %v757_v15 = vld [vmem:[#allocation2 + $0xdf] sm:$0xff]  ;;  %v758_v16 = vld [vmem:[#allocation2 + $0xe7] sm:$0xff] }
 0x11f   : > { %7092 = vmatmul.mubr.msk.f32.gmra.mrb[26].mxu1 %vm198_vm0, %v8360_v35  ;;  %v722_v41 = vmax.f32 %v703_v38, 0.0  ;;  %6994 = vmatprep.mubr.msk.f32.mxu0 %vm198_vm0, %v789_v39  ;;  %v794_v56 = vld [vmem:[#allocation2 + $0x100] sm:$0xf] }
 0x120   : > { %7094 = vmatprep.mubr.msk.f32.mxu1 %vm198_vm0, %v8365_v40  ;;  %727 = vst.msk [vmem:[#allocation2 + $0x11e] sm:$0xff] %vm198_vm0, %v723_v36  ;;  %v792_v49 = vld [vmem:[#allocation2 + $0xf0] sm:$0xff]  ;;  %v793_v52 = vld [vmem:[#allocation2 + $0xf8] sm:$0xff]  ;;  %v2227_v27 = vld [vmem:[#allocation2 + $0x22] sm:$0xff] }
 0x121   : > { %726 = vst.msk [vmem:[#allocation2 + $0x116] sm:$0xff] %vm198_vm0, %v722_v41  ;;  %v8382_v50 = vld [vmem:[#allocation2 + $0xf1] sm:$0xff]  ;;  %v8387_v54 = vld [vmem:[#allocation2 + $0xf9] sm:$0xff]  ;;  %v2231_v33 = vld [vmem:[#allocation2 + $0x42] sm:$0xff] }
 0x122   : > { %6995 = vmatmul.mubr.msk.f32.gmra.mrb[56].mxu0 %vm198_vm0, %v790_v43  ;;  %v759_v17 = vld [vmem:[#allocation2 + $0xef] sm:$0xff]  ;;  %v760_v20 = vld [vmem:[#allocation2 + $0xf7] sm:$0xff]  ;;  %v761_v23 = vld [vmem:[#allocation2 + $0xff] sm:$0xf] }
 0x123   : > { %7095 = vmatmul.mubr.msk.f32.gmra.mrb[28].mxu1 %vm198_vm0, %v8372_v45  ;;  %6997 = vmatprep.mubr.msk.f32.mxu0 %vm198_vm0, %v791_v47  ;;  %v2226_v25 = vld [vmem:[#allocation2 + $0x1a] sm:$0xff]  ;;  %v2233_v36 = vld [vmem:[#allocation2 + $0x52] sm:$0xff]  ;;  %v2235_v39 = vld [vmem:[#allocation2 + $0x62] sm:$0xff] }
 0x124   : > { %7097 = vmatprep.mubr.msk.f32.mxu1 %vm198_vm0, %v8377_v48  ;;  %v1477_v57 = vld [vmem:[#allocation2 + $0x101] sm:$0xf]  ;;  %v1866_v22 = vld [vmem:[#allocation2 + $0x109] sm:$0xff]  ;;  %v2237_v41 = vld [vmem:[#allocation2 + $0x72] sm:$0xff] }
 0x125   : > { %v2230_v32 = vld [vmem:[#allocation2 + $0x3a] sm:$0xff]  ;;  %v2240_v47 = vld [vmem:[#allocation2 + $0x8a] sm:$0xff] }
 0x126   : > { %6998 = vmatmul.mubr.msk.f32.gmra.mrb[58].mxu0 %vm198_vm0, %v792_v49  ;;  %v2234_v38 = vld [vmem:[#allocation2 + $0x5a] sm:$0xff] }
 0x127   : > { %7098 = vmatmul.mubr.msk.f32.gmra.mrb[30].mxu1 %vm198_vm0, %v8382_v50  ;;  %7000 = vmatprep.mubr.msk.f32.mxu0 %vm198_vm0, %v793_v52  ;;  %v2238_v43 = vld [vmem:[#allocation2 + $0x7a] sm:$0xff]  ;;  %v2244_v52 = vld [vmem:[#allocation2 + $0xaa] sm:$0xff] }
 0x128   : > { %7100 = vmatprep.mubr.msk.f32.mxu1 %vm198_vm0, %v8387_v54  ;;  %v2242_v49 = vld [vmem:[#allocation2 + $0x9a] sm:$0xff] }
 0x12a   : > { %7001 = vmatmul.mubr.msk.f32.gmra.mrb[60].mxu0 %vm198_vm0, %v794_v56  ;;  %v2247_v56 = vld [vmem:[#allocation2 + $0xc2] sm:$0xff] }
 0x12b   : > { %7101 = vmatmul.mubr.msk.f32.gmra.mrb[32].mxu1 %vm198_vm0, %v1477_v57  ;;  %7005 = vmatprep.mubr.msk.f32.mxu0 %vm198_vm0, %v730_v55  ;;  %v2246_v55 = vld [vmem:[#allocation2 + $0xba] sm:$0xff]  ;;  %v2248_v57 = vld [vmem:[#allocation2 + $0xca] sm:$0xff] }
 0x12c   : > { %7105 = vmatprep.mubr.msk.f32.mxu1 %vm198_vm0, %v8222_v58  ;;  %v733_v58 = vld [vmem:[#allocation2 + $0x1f] sm:$0xff] }
 0x12e   : > { %7006 = vmatmul.mubr.msk.f32.vlgmr.msra.gmra.mrb[30].mxu0 %vm198_vm0, %v731_v59  ;;  %v2249_v59 = vld [vmem:[#allocation2 + $0xd2] sm:$0xff] }
 0x12f   : > { %7106 = vmatmul.mubr.msk.f32.vlgmr.msra.gmra.mrb[2].mxu1 %vm198_vm0, %v8228_v61  ;;  %7008 = vmatprep.mubr.msk.f32.mxu0 %vm198_vm0, %v732_v63  ;;  %v736_v61 = vld [vmem:[#allocation2 + $0x37] sm:$0xff]  ;;  %v2251_v63 = vld [vmem:[#allocation2 + $0xe2] sm:$0xff] }
 0x130   : > { %7154 = vmatpush3.msk.msra.mxu1 %vm893_vm2, %v8211_v44  ;;  %7108 = vmatprep.mubr.msk.f32.mxu1 %vm198_vm0, %v8234_v2  ;;  %v735_v44 = vld [vmem:[#allocation2 + $0x2f] sm:$0xff]  ;;  %v737_v2 = vld [vmem:[#allocation2 + $0x3f] sm:$0xff] }
 0x131   : > { %7203 = vmatprep.subr.msk.mxu1 %vm893_vm2, %v8400_v62 }
 0x132   : > { %7009 = vmatmul.mubr.msk.f32.gmra.mrb[32].mxu0 %vm198_vm0, %v733_v58  ;;  %v2252_v58 = vld [vmem:[#allocation2 + $0xea] sm:$0xff] }
 0x133   : > { %7109 = vmatmul.mubr.msk.f32.gmra.mrb[4].mxu1 %vm198_vm0, %v8240_v6  ;;  %7011 = vmatprep.mubr.msk.f32.mxu0 %vm198_vm0, %v734_v1  ;;  %v738_v6 = vld [vmem:[#allocation2 + $0x47] sm:$0xff]  ;;  %v2253_v1 = vld [vmem:[#allocation2 + $0xf2] sm:$0xff] }
 0x134   : > { %7111 = vmatprep.mubr.msk.f32.mxu1 %vm198_vm0, %v8246_v11  ;;  %v6952_v11 = vpop.f32.mrb[0].mxu1 }
 0x135   : > { %v725_v4 = vmax.f32 %v6952_v11, 0.0  ;;  %v713_v7 = vpop.f32.mrb[1].mxu1  ;;  %v2616_v11 = vld [vmem:[#allocation2 + $0x1b] sm:$0xff] }
 0x136   : > { %7012 = vmatmul.mubr.msk.f32.gmra.mrb[34].mxu0 %vm198_vm0, %v735_v44  ;;  %v724_v8 = vmax.f32 %v713_v7, 0.0  ;;  %v2254_v44 = vld [vmem:[#allocation2 + $0xfa] sm:$0xff]  ;;  %v2618_v7 = vld [vmem:[#allocation2 + $0x2b] sm:$0xff] }
 0x137   : > { %7112 = vmatmul.mubr.msk.f32.gmra.mrb[6].mxu1 %vm198_vm0, %v8252_v14  ;;  %7014 = vmatprep.mubr.msk.f32.mxu0 %vm198_vm0, %v736_v61  ;;  %v739_v14 = vld [vmem:[#allocation2 + $0x4f] sm:$0xff]  ;;  %729 = vst.msk [vmem:[#allocation2 + $0x130] sm:$0xff] %vm198_vm0, %v725_v4  ;;  %v2255_v61 = vld [vmem:[#allocation2 + $0x102] sm:$0xff]  ;;  %v8543_v4 = vld [vmem:[%s9216_s2 + $0x1c] sm:$0xf] }
 0x138   : > { %7114 = vmatprep.mubr.msk.f32.mxu1 %vm198_vm0, %v8259_v19  ;;  %v740_v19 = vld [vmem:[#allocation2 + $0x57] sm:$0xff]  ;;  %728 = vst.msk [vmem:[#allocation2 + $0x128] sm:$0xff] %vm198_vm0, %v724_v8 }
 0x139   : > { %v2620_v8 = vld [vmem:[#allocation2 + $0x3b] sm:$0xff] }
 0x13a   : > { %7015 = vmatmul.mubr.msk.f32.gmra.mrb[36].mxu0 %vm198_vm0, %v737_v2  ;;  %v2256_v2 = vld [vmem:[#allocation2 + $0x10a] sm:$0xff] }
 0x13b   : > { %7115 = vmatmul.mubr.msk.f32.gmra.mrb[8].mxu1 %vm198_vm0, %v8261_v21  ;;  %7017 = vmatprep.mubr.msk.f32.mxu0 %vm198_vm0, %v738_v6  ;;  %v741_v21 = vld [vmem:[#allocation2 + $0x5f] sm:$0xff]  ;;  %v2257_v6 = vld [vmem:[#allocation2 + $0x112] sm:$0xf] }
 0x13c   : > { %7117 = vmatprep.mubr.msk.f32.mxu1 %vm198_vm0, %v8269_v26  ;;  %v742_v26 = vld [vmem:[#allocation2 + $0x67] sm:$0xff] }
 0x13e   : > { %7018 = vmatmul.mubr.msk.f32.gmra.mrb[38].mxu0 %vm198_vm0, %v739_v14  ;;  %v2617_v14 = vld [vmem:[#allocation2 + $0x23] sm:$0xff] }
 0x13f   : > { %7118 = vmatmul.mubr.msk.f32.gmra.mrb[10].mxu1 %vm198_vm0, %v8275_v29  ;;  %7020 = vmatprep.mubr.msk.f32.mxu0 %vm198_vm0, %v740_v19  ;;  %v743_v29 = vld [vmem:[#allocation2 + $0x6f] sm:$0xff] }
 0x140   : > { %7120 = vmatprep.mubr.msk.f32.mxu1 %vm198_vm0, %v8281_v34  ;;  %v744_v34 = vld [vmem:[#allocation2 + $0x77] sm:$0xff] }
 0x141   : > { %v2619_v19 = vld [vmem:[#allocation2 + $0x33] sm:$0xff] }
 0x142   : > { %7021 = vmatmul.mubr.msk.f32.gmra.mrb[40].mxu0 %vm198_vm0, %v741_v21  ;;  %v2621_v21 = vld [vmem:[#allocation2 + $0x43] sm:$0xff] }
 0x143   : > { %7121 = vmatmul.mubr.msk.f32.gmra.mrb[12].mxu1 %vm198_vm0, %v8287_v37  ;;  %7023 = vmatprep.mubr.msk.f32.mxu0 %vm198_vm0, %v742_v26  ;;  %v746_v37 = vld [vmem:[#allocation2 + $0x87] sm:$0xff] }
 0x144   : > { %7123 = vmatprep.mubr.msk.f32.mxu1 %vm198_vm0, %v8293_v42  ;;  %v747_v42 = vld [vmem:[#allocation2 + $0x8f] sm:$0xff] }
 0x145   : > { %v2622_v26 = vld [vmem:[#allocation2 + $0x4b] sm:$0xff] }
 0x146   : > { %7024 = vmatmul.mubr.msk.f32.gmra.mrb[42].mxu0 %vm198_vm0, %v743_v29  ;;  %v2623_v29 = vld [vmem:[#allocation2 + $0x53] sm:$0xff] }
 0x147   : > { %7124 = vmatmul.mubr.msk.f32.gmra.mrb[14].mxu1 %vm198_vm0, %v8299_v46  ;;  %7026 = vmatprep.mubr.msk.f32.mxu0 %vm198_vm0, %v744_v34  ;;  %v748_v46 = vld [vmem:[#allocation2 + $0x97] sm:$0xff] }
 0x148   : > { %7126 = vmatprep.mubr.msk.f32.mxu1 %vm198_vm0, %v8305_v51  ;;  %v749_v51 = vld [vmem:[#allocation2 + $0x9f] sm:$0xff] }
 0x149   : > { %v2624_v34 = vld [vmem:[#allocation2 + $0x5b] sm:$0xff] }
 0x14a   : > { %7027 = vmatmul.mubr.msk.f32.gmra.mrb[44].mxu0 %vm198_vm0, %v745_v9  ;;  %v2625_v9 = vld [vmem:[#allocation2 + $0x63] sm:$0xff] }
 0x14b   : > { %7127 = vmatmul.mubr.msk.f32.gmra.mrb[16].mxu1 %vm198_vm0, %v8311_v53  ;;  %7029 = vmatprep.mubr.msk.f32.mxu0 %vm198_vm0, %v746_v37  ;;  %v750_v53 = vld [vmem:[#allocation2 + $0xa7] sm:$0xff] }
 0x14c   : > { %7129 = vmatprep.mubr.msk.f32.mxu1 %vm198_vm0, %v8317_v60  ;;  %v751_v60 = vld [vmem:[#allocation2 + $0xaf] sm:$0xff] }
 0x14d   : > { %v2626_v37 = vld [vmem:[#allocation2 + $0x6b] sm:$0xff] }
 0x14e   : > { %7030 = vmatmul.mubr.msk.f32.gmra.mrb[46].mxu0 %vm198_vm0, %v747_v42  ;;  %v2627_v42 = vld [vmem:[#allocation2 + $0x73] sm:$0xff] }
 0x14f   : > { %7130 = vmatmul.mubr.msk.f32.gmra.mrb[18].mxu1 %vm198_vm0, %v8326_v5  ;;  %7032 = vmatprep.mubr.msk.f32.mxu0 %vm198_vm0, %v748_v46  ;;  %v752_v5 = vld [vmem:[#allocation2 + $0xb7] sm:$0xff] }
 0x150   : > { %7132 = vmatprep.mubr.msk.f32.mxu1 %vm198_vm0, %v8323_v0  ;;  %v753_v0 = vld [vmem:[#allocation2 + $0xbf] sm:$0xff] }
 0x151   : > { %v2628_v46 = vld [vmem:[#allocation2 + $0x7b] sm:$0xff] }
 0x152   : > { %7033 = vmatmul.mubr.msk.f32.gmra.mrb[48].mxu0 %vm198_vm0, %v749_v51  ;;  %v2629_v51 = vld [vmem:[#allocation2 + $0x83] sm:$0xff] }
 0x153   : > { %7133 = vmatmul.mubr.msk.f32.gmra.mrb[20].mxu1 %vm198_vm0, %v8336_v13  ;;  %7035 = vmatprep.mubr.msk.f32.mxu0 %vm198_vm0, %v750_v53  ;;  %v756_v13 = vld [vmem:[#allocation2 + $0xd7] sm:$0xff]  ;;  %v2630_v53 = vld [vmem:[#allocation2 + $0x8b] sm:$0xff] }
 0x154   : > { %7135 = vmatprep.mubr.msk.f32.mxu1 %vm198_vm0, %v8341_v18  ;;  %v1865_v18 = vld [vmem:[#allocation2 + $0x101] sm:$0xff] }
 0x156   : > { %7036 = vmatmul.mubr.msk.f32.gmra.mrb[50].mxu0 %vm198_vm0, %v751_v60  ;;  %v2631_v60 = vld [vmem:[#allocation2 + $0x93] sm:$0xff] }
 0x157   : > { %7136 = vmatmul.mubr.msk.f32.gmra.mrb[22].mxu1 %vm198_vm0, %v8348_v24  ;;  %7038 = vmatprep.mubr.msk.f32.mxu0 %vm198_vm0, %v752_v5  ;;  %v1867_v24 = vld [vmem:[#allocation2 + $0x111] sm:$0xf]  ;;  %v2632_v5 = vld [vmem:[#allocation2 + $0x9b] sm:$0xff] }
 0x158   : > { %7138 = vmatprep.mubr.msk.f32.mxu1 %vm198_vm0, %v8353_v30  ;;  %v2228_v30 = vld [vmem:[#allocation2 + $0x2a] sm:$0xff] }
 0x15a   : > { %7039 = vmatmul.mubr.msk.f32.gmra.mrb[52].mxu0 %vm198_vm0, %v753_v0  ;;  %v2633_v0 = vld [vmem:[#allocation2 + $0xa3] sm:$0xff] }
 0x15b   : > { %7139 = vmatmul.mubr.msk.f32.gmra.mrb[24].mxu1 %vm198_vm0, %v8360_v35  ;;  %7041 = vmatprep.mubr.msk.f32.mxu0 %vm198_vm0, %v754_v10  ;;  %v2232_v35 = vld [vmem:[#allocation2 + $0x4a] sm:$0xff] }
 0x15c   : > { %7141 = vmatprep.mubr.msk.f32.mxu1 %vm198_vm0, %v8365_v40  ;;  %v2236_v40 = vld [vmem:[#allocation2 + $0x6a] sm:$0xff] }
 0x15d   : > { %v2634_v10 = vld [vmem:[#allocation2 + $0xab] sm:$0xff] }
 0x15e   : > { %7042 = vmatmul.mubr.msk.f32.gmra.mrb[54].mxu0 %vm198_vm0, %v755_v12  ;;  %v2635_v12 = vld [vmem:[#allocation2 + $0xb3] sm:$0xff] }
 0x15f   : > { %7142 = vmatmul.mubr.msk.f32.gmra.mrb[26].mxu1 %vm198_vm0, %v8372_v45  ;;  %7044 = vmatprep.mubr.msk.f32.mxu0 %vm198_vm0, %v756_v13  ;;  %v2239_v45 = vld [vmem:[#allocation2 + $0x82] sm:$0xff] }
 0x160   : > { %7144 = vmatprep.mubr.msk.f32.mxu1 %vm198_vm0, %v8377_v48  ;;  %v2241_v48 = vld [vmem:[#allocation2 + $0x92] sm:$0xff]  ;;  %v2636_v13 = vld [vmem:[#allocation2 + $0xbb] sm:$0xff] }
 0x162   : > { %7045 = vmatmul.mubr.msk.f32.gmra.mrb[56].mxu0 %vm198_vm0, %v757_v15  ;;  %v2637_v15 = vld [vmem:[#allocation2 + $0xc3] sm:$0xff] }
 0x163   : > { %7145 = vmatmul.mubr.msk.f32.gmra.mrb[28].mxu1 %vm198_vm0, %v8382_v50  ;;  %7047 = vmatprep.mubr.msk.f32.mxu0 %vm198_vm0, %v758_v16  ;;  %v2243_v50 = vld [vmem:[#allocation2 + $0xa2] sm:$0xff]  ;;  %v2638_v16 = vld [vmem:[#allocation2 + $0xcb] sm:$0xff] }
 0x164   : > { %7147 = vmatprep.mubr.msk.f32.mxu1 %vm198_vm0, %v8387_v54  ;;  %v2245_v54 = vld [vmem:[#allocation2 + $0xb2] sm:$0xff] }
 0x166   : > { %7048 = vmatmul.mubr.msk.f32.gmra.mrb[58].mxu0 %vm198_vm0, %v759_v17  ;;  %v2639_v17 = vld [vmem:[#allocation2 + $0xd3] sm:$0xff] }
 0x167   : > { %7148 = vmatmul.mubr.msk.f32.gmra.mrb[30].mxu1 %vm198_vm0, %v1865_v18  ;;  %7050 = vmatprep.mubr.msk.f32.mxu0 %vm198_vm0, %v760_v20  ;;  %v2640_v18 = vld [vmem:[#allocation2 + $0xdb] sm:$0xff]  ;;  %v2641_v20 = vld [vmem:[#allocation2 + $0xe3] sm:$0xff] }
 0x168   : > { %7150 = vmatprep.mubr.msk.f32.mxu1 %vm198_vm0, %v1866_v22  ;;  %v2642_v22 = vld [vmem:[#allocation2 + $0xeb] sm:$0xff] }
 0x16a   : > { %7051 = vmatmul.mubr.msk.f32.gmra.mrb[60].mxu0 %vm198_vm0, %v761_v23  ;;  %v2643_v23 = vld [vmem:[#allocation2 + $0xf3] sm:$0xff] }
 0x16b   : > { %7151 = vmatmul.mubr.msk.f32.gmra.mrb[32].mxu1 %vm198_vm0, %v1867_v24  ;;  %v2644_v24 = vld [vmem:[#allocation2 + $0xfb] sm:$0xff] }
 0x16c   : > { %7155 = vmatprep.mubr.msk.f32.mxu1 %vm198_vm0, %v2226_v25  ;;  %v8577_v25 = vld [vmem:[#allocation2 + $0x103] sm:$0xff] }
 0x16f   : > { %7156 = vmatmul.mubr.msk.f32.vlgmr.msra.gmra.mrb[2].mxu1 %vm198_vm0, %v2227_v27  ;;  %v8581_v27 = vld [vmem:[#allocation2 + $0x10b] sm:$0xff] }
 0x170   : > { %7204 = vmatpush3.msk.msra.mxu1 %vm893_vm2, %v8400_v62  ;;  %7158 = vmatprep.mubr.msk.f32.mxu1 %vm198_vm0, %v2228_v30  ;;  %v2250_v62 = vld [vmem:[#allocation2 + $0xda] sm:$0xff] }
 0x171   : > { %7253 = vmatprep.subr.msk.mxu1 %vm893_vm2, %v8502_v28  ;;  %v8590_v30 = vld [vmem:[%s9216_s2 + $0x20] sm:$0xf] }
 0x173   : > { %7159 = vmatmul.mubr.msk.f32.gmra.mrb[4].mxu1 %vm198_vm0, %v2229_v31 }
 0x174   : > { %7161 = vmatprep.mubr.msk.f32.mxu1 %vm198_vm0, %v2230_v32 }
 0x177   : > { %7162 = vmatmul.mubr.msk.f32.gmra.mrb[6].mxu1 %vm198_vm0, %v2231_v33 }
 0x178   : > { %7164 = vmatprep.mubr.msk.f32.mxu1 %vm198_vm0, %v2232_v35 }
 0x17b   : > { %7165 = vmatmul.mubr.msk.f32.gmra.mrb[8].mxu1 %vm198_vm0, %v2233_v36 }
 0x17c   : > { %7167 = vmatprep.mubr.msk.f32.mxu1 %vm198_vm0, %v2234_v38 }
 0x17f   : > { %7168 = vmatmul.mubr.msk.f32.gmra.mrb[10].mxu1 %vm198_vm0, %v2235_v39 }
 0x180   : > { %7170 = vmatprep.mubr.msk.f32.mxu1 %vm198_vm0, %v2236_v40 }
 0x183   : > { %7171 = vmatmul.mubr.msk.f32.gmra.mrb[12].mxu1 %vm198_vm0, %v2237_v41 }
 0x184   : > { %7173 = vmatprep.mubr.msk.f32.mxu1 %vm198_vm0, %v2238_v43 }
 0x187   : > { %7174 = vmatmul.mubr.msk.f32.gmra.mrb[14].mxu1 %vm198_vm0, %v2239_v45 }
 0x188   : > { %7176 = vmatprep.mubr.msk.f32.mxu1 %vm198_vm0, %v2240_v47 }
 0x18b   : > { %7177 = vmatmul.mubr.msk.f32.gmra.mrb[16].mxu1 %vm198_vm0, %v2241_v48 }
 0x18c   : > { %7179 = vmatprep.mubr.msk.f32.mxu1 %vm198_vm0, %v2242_v49 }
 0x18f   : > { %7180 = vmatmul.mubr.msk.f32.gmra.mrb[18].mxu1 %vm198_vm0, %v2243_v50 }
 0x190   : > { %7182 = vmatprep.mubr.msk.f32.mxu1 %vm198_vm0, %v2244_v52 }
 0x193   : > { %7183 = vmatmul.mubr.msk.f32.gmra.mrb[20].mxu1 %vm198_vm0, %v2245_v54 }
 0x194   : > { %7185 = vmatprep.mubr.msk.f32.mxu1 %vm198_vm0, %v2246_v55 }
 0x197   : > { %7186 = vmatmul.mubr.msk.f32.gmra.mrb[22].mxu1 %vm198_vm0, %v2247_v56 }
 0x198   : > { %7188 = vmatprep.mubr.msk.f32.mxu1 %vm198_vm0, %v2248_v57  ;;  %v8664_v57 = vld [vmem:[#allocation2 + $0x113] sm:$0xff] }
 0x19b   : > { %7189 = vmatmul.mubr.msk.f32.gmra.mrb[24].mxu1 %vm198_vm0, %v2249_v59 }
 0x19c   : > { %7191 = vmatprep.mubr.msk.f32.mxu1 %vm198_vm0, %v2250_v62  ;;  %v8670_v62 = vld [vmem:[#allocation2 + $0x11b] sm:$0xff] }
 0x19f   : > { %7192 = vmatmul.mubr.msk.f32.gmra.mrb[26].mxu1 %vm198_vm0, %v2251_v63 }
 0x1a0   : > { %7194 = vmatprep.mubr.msk.f32.mxu1 %vm198_vm0, %v2252_v58  ;;  %v3037_v58 = vld [vmem:[#allocation2 + $0x123] sm:$0xf] }
 0x1a3   : > { %7195 = vmatmul.mubr.msk.f32.gmra.mrb[28].mxu1 %vm198_vm0, %v2253_v1 }
 0x1a4   : > { %7197 = vmatprep.mubr.msk.f32.mxu1 %vm198_vm0, %v2254_v44  ;;  %v3396_v44 = vld [vmem:[#allocation2 + $0x2c] sm:$0xff] }
 0x1a7   : > { %7198 = vmatmul.mubr.msk.f32.gmra.mrb[30].mxu1 %vm198_vm0, %v2255_v61  ;;  %v4208_v61 = vld [vmem:[%s9217_s3] sm:$0xf] }
 0x1a8   : > { %7200 = vmatprep.mubr.msk.f32.mxu1 %vm198_vm0, %v2256_v2  ;;  %7403 = vmatprep.subr.msk.mxu0 %vm893_vm2, %v4208_v61 }
 0x1a9   : > { %7404 = vmatpush3.msk.msra.mxu0 %vm893_vm2, %v4208_v61  ;;  %v8734_v61 = vld [vmem:[#allocation2 + $0x104] sm:$0xff] }
 0x1aa   : > { %7453 = vmatprep.subr.mxu0 %v7987_v3 }
 0x1ab   : > { %7201 = vmatmul.mubr.msk.f32.gmra.mrb[32].mxu1 %vm198_vm0, %v2257_v6  ;;  %v3397_v6 = vld [vmem:[#allocation2 + $0x34] sm:$0xff] }
 0x1ac   : > { %7205 = vmatprep.mubr.msk.f32.mxu1 %vm198_vm0, %v2616_v11 }
 0x1af   : > { %7206 = vmatmul.mubr.msk.f32.vlgmr.msra.gmra.mrb[2].mxu1 %vm198_vm0, %v2617_v14  ;;  %v3398_v14 = vld [vmem:[#allocation2 + $0x3c] sm:$0xff] }
 0x1b0   : > { %7254 = vmatpush3.msk.msra.mxu1 %vm893_vm2, %v8502_v28  ;;  %7208 = vmatprep.mubr.msk.f32.mxu1 %vm198_vm0, %v2618_v7  ;;  %v2647_v28 = vld [vmem:[#allocation2 + $0x113] sm:$0xf] }
 0x1b1   : > { %7303 = vmatprep.subr.msk.mxu1 %vm893_vm2, %v8543_v4 }
 0x1b3   : > { %7209 = vmatmul.mubr.msk.f32.gmra.mrb[4].mxu1 %vm198_vm0, %v2619_v19 }
 0x1b4   : > { %7211 = vmatprep.mubr.msk.f32.mxu1 %vm198_vm0, %v2620_v8 }
 0x1b7   : > { %7212 = vmatmul.mubr.msk.f32.gmra.mrb[6].mxu1 %vm198_vm0, %v2621_v21 }
 0x1b8   : > { %7214 = vmatprep.mubr.msk.f32.mxu1 %vm198_vm0, %v2622_v26 }
 0x1bb   : > { %7215 = vmatmul.mubr.msk.f32.gmra.mrb[8].mxu1 %vm198_vm0, %v2623_v29 }
 0x1bc   : > { %7217 = vmatprep.mubr.msk.f32.mxu1 %vm198_vm0, %v2624_v34 }
 0x1bf   : > { %7218 = vmatmul.mubr.msk.f32.gmra.mrb[10].mxu1 %vm198_vm0, %v2625_v9 }
 0x1c0   : > { %7220 = vmatprep.mubr.msk.f32.mxu1 %vm198_vm0, %v2626_v37 }
 0x1c3   : > { %7221 = vmatmul.mubr.msk.f32.gmra.mrb[12].mxu1 %vm198_vm0, %v2627_v42 }
 0x1c4   : > { %7223 = vmatprep.mubr.msk.f32.mxu1 %vm198_vm0, %v2628_v46 }
 0x1c7   : > { %7224 = vmatmul.mubr.msk.f32.gmra.mrb[14].mxu1 %vm198_vm0, %v2629_v51 }
 0x1c8   : > { %7226 = vmatprep.mubr.msk.f32.mxu1 %vm198_vm0, %v2630_v53 }
 0x1cb   : > { %7227 = vmatmul.mubr.msk.f32.gmra.mrb[16].mxu1 %vm198_vm0, %v2631_v60 }
 0x1cc   : > { %7229 = vmatprep.mubr.msk.f32.mxu1 %vm198_vm0, %v2632_v5 }
 0x1cf   : > { %7230 = vmatmul.mubr.msk.f32.gmra.mrb[18].mxu1 %vm198_vm0, %v2633_v0 }
 0x1d0   : > { %7232 = vmatprep.mubr.msk.f32.mxu1 %vm198_vm0, %v2634_v10 }
 0x1d3   : > { %7233 = vmatmul.mubr.msk.f32.gmra.mrb[20].mxu1 %vm198_vm0, %v2635_v12 }
 0x1d4   : > { %7235 = vmatprep.mubr.msk.f32.mxu1 %vm198_vm0, %v2636_v13 }
 0x1d7   : > { %7236 = vmatmul.mubr.msk.f32.gmra.mrb[22].mxu1 %vm198_vm0, %v2637_v15 }
 0x1d8   : > { %7238 = vmatprep.mubr.msk.f32.mxu1 %vm198_vm0, %v2638_v16 }
 0x1db   : > { %7239 = vmatmul.mubr.msk.f32.gmra.mrb[24].mxu1 %vm198_vm0, %v2639_v17 }
 0x1dc   : > { %7241 = vmatprep.mubr.msk.f32.mxu1 %vm198_vm0, %v2640_v18 }
 0x1df   : > { %7242 = vmatmul.mubr.msk.f32.gmra.mrb[26].mxu1 %vm198_vm0, %v2641_v20 }
 0x1e0   : > { %7244 = vmatprep.mubr.msk.f32.mxu1 %vm198_vm0, %v2642_v22 }
 0x1e3   : > { %7245 = vmatmul.mubr.msk.f32.gmra.mrb[28].mxu1 %vm198_vm0, %v2643_v23 }
 0x1e4   : > { %7247 = vmatprep.mubr.msk.f32.mxu1 %vm198_vm0, %v2644_v24 }
 0x1e7   : > { %7248 = vmatmul.mubr.msk.f32.gmra.mrb[30].mxu1 %vm198_vm0, %v8577_v25 }
 0x1e8   : > { %7250 = vmatprep.mubr.msk.f32.mxu1 %vm198_vm0, %v8581_v27 }
 0x1eb   : > { %7251 = vmatmul.mubr.msk.f32.gmra.mrb[32].mxu1 %vm198_vm0, %v2647_v28  ;;  %v3419_v28 = vld [vmem:[#allocation2 + $0xe4] sm:$0xff] }
 0x1ec   : > { %7255 = vmatprep.mubr.msk.f32.mxu1 %vm198_vm0, %v2618_v7  ;;  %v3399_v7 = vld [vmem:[#allocation2 + $0x44] sm:$0xff] }
 0x1ef   : > { %7256 = vmatmul.mubr.msk.f32.vlgmr.msra.gmra.mrb[2].mxu1 %vm198_vm0, %v2619_v19 }
 0x1f0   : > { %7304 = vmatpush3.msk.msra.mxu1 %vm893_vm2, %v8543_v4  ;;  %7258 = vmatprep.mubr.msk.f32.mxu1 %vm198_vm0, %v2620_v8  ;;  %v3400_v8 = vld [vmem:[#allocation2 + $0x4c] sm:$0xff] }
 0x1f1   : > { %7353 = vmatprep.subr.msk.mxu1 %vm893_vm2, %v8590_v30 }
 0x1f3   : > { %7259 = vmatmul.mubr.msk.f32.gmra.mrb[4].mxu1 %vm198_vm0, %v2621_v21 }
 0x1f4   : > { %7261 = vmatprep.mubr.msk.f32.mxu1 %vm198_vm0, %v2622_v26  ;;  %v3401_v26 = vld [vmem:[#allocation2 + $0x54] sm:$0xff] }
 0x1f7   : > { %7262 = vmatmul.mubr.msk.f32.gmra.mrb[6].mxu1 %vm198_vm0, %v2623_v29 }
 0x1f8   : > { %7264 = vmatprep.mubr.msk.f32.mxu1 %vm198_vm0, %v2624_v34  ;;  %v3402_v34 = vld [vmem:[#allocation2 + $0x5c] sm:$0xff] }
 0x1fb   : > { %7265 = vmatmul.mubr.msk.f32.gmra.mrb[8].mxu1 %vm198_vm0, %v2625_v9 }
 0x1fc   : > { %7267 = vmatprep.mubr.msk.f32.mxu1 %vm198_vm0, %v2626_v37  ;;  %v3403_v37 = vld [vmem:[#allocation2 + $0x64] sm:$0xff] }
 0x1ff   : > { %7268 = vmatmul.mubr.msk.f32.gmra.mrb[10].mxu1 %vm198_vm0, %v2627_v42 }
 0x200   : > { %7270 = vmatprep.mubr.msk.f32.mxu1 %vm198_vm0, %v2628_v46  ;;  %v3404_v46 = vld [vmem:[#allocation2 + $0x6c] sm:$0xff] }
 0x201   : > { %v8606_v31 = vpop.f32.mrb[30].mxu0 }
 0x202   : > { %v8609_v32 = vpop.f32.mrb[31].mxu0 }
 0x203   : > { %7271 = vmatmul.mubr.msk.f32.gmra.mrb[12].mxu1 %vm198_vm0, %v2629_v51 }
 0x204   : > { %7273 = vmatprep.mubr.msk.f32.mxu1 %vm198_vm0, %v2630_v53  ;;  %v3405_v53 = vld [vmem:[#allocation2 + $0x74] sm:$0xff] }
 0x205   : > { %v8612_v33 = vpop.f32.mrb[32].mxu0 }
 0x206   : > { %v8614_v35 = vpop.f32.mrb[33].mxu0 }
 0x207   : > { %7274 = vmatmul.mubr.msk.f32.gmra.mrb[14].mxu1 %vm198_vm0, %v2631_v60 }
 0x208   : > { %7276 = vmatprep.mubr.msk.f32.mxu1 %vm198_vm0, %v2632_v5  ;;  %v3406_v5 = vld [vmem:[#allocation2 + $0x7c] sm:$0xff] }
 0x209   : > { %v8618_v36 = vpop.f32.mrb[34].mxu0 }
 0x20a   : > { %v8620_v38 = vpop.f32.mrb[35].mxu0 }
 0x20b   : > { %7277 = vmatmul.mubr.msk.f32.gmra.mrb[16].mxu1 %vm198_vm0, %v2633_v0  ;;  %v3407_v0 = vld [vmem:[#allocation2 + $0x84] sm:$0xff] }
 0x20c   : > { %7279 = vmatprep.mubr.msk.f32.mxu1 %vm198_vm0, %v2634_v10  ;;  %v3408_v10 = vld [vmem:[#allocation2 + $0x8c] sm:$0xff] }
 0x20d   : > { %v8624_v39 = vpop.f32.mrb[36].mxu0 }
 0x20e   : > { %v8626_v40 = vpop.f32.mrb[37].mxu0 }
 0x20f   : > { %7280 = vmatmul.mubr.msk.f32.gmra.mrb[18].mxu1 %vm198_vm0, %v2635_v12  ;;  %v3409_v12 = vld [vmem:[#allocation2 + $0x94] sm:$0xff] }
 0x210   : > { %7282 = vmatprep.mubr.msk.f32.mxu1 %vm198_vm0, %v2636_v13  ;;  %v3410_v13 = vld [vmem:[#allocation2 + $0x9c] sm:$0xff] }
 0x211   : > { %v8630_v41 = vpop.f32.mrb[38].mxu0 }
 0x212   : > { %v8632_v43 = vpop.f32.mrb[39].mxu0 }
 0x213   : > { %7283 = vmatmul.mubr.msk.f32.gmra.mrb[20].mxu1 %vm198_vm0, %v2637_v15  ;;  %v3411_v15 = vld [vmem:[#allocation2 + $0xa4] sm:$0xff] }
 0x214   : > { %7285 = vmatprep.mubr.msk.f32.mxu1 %vm198_vm0, %v2638_v16  ;;  %v3412_v16 = vld [vmem:[#allocation2 + $0xac] sm:$0xff] }
 0x215   : > { %v8636_v45 = vpop.f32.mrb[40].mxu0 }
 0x216   : > { %v8638_v47 = vpop.f32.mrb[41].mxu0 }
 0x217   : > { %7286 = vmatmul.mubr.msk.f32.gmra.mrb[22].mxu1 %vm198_vm0, %v2639_v17  ;;  %v3413_v17 = vld [vmem:[#allocation2 + $0xb4] sm:$0xff] }
 0x218   : > { %7288 = vmatprep.mubr.msk.f32.mxu1 %vm198_vm0, %v2640_v18  ;;  %v3414_v18 = vld [vmem:[#allocation2 + $0xbc] sm:$0xff] }
 0x219   : > { %v8642_v48 = vpop.f32.mrb[42].mxu0 }
 0x21a   : > { %v8644_v49 = vpop.f32.mrb[43].mxu0 }
 0x21b   : > { %7289 = vmatmul.mubr.msk.f32.gmra.mrb[24].mxu1 %vm198_vm0, %v2641_v20  ;;  %v3415_v20 = vld [vmem:[#allocation2 + $0xc4] sm:$0xff] }
 0x21c   : > { %7291 = vmatprep.mubr.msk.f32.mxu1 %vm198_vm0, %v2642_v22  ;;  %v3416_v22 = vld [vmem:[#allocation2 + $0xcc] sm:$0xff] }
 0x21d   : > { %v8648_v50 = vpop.f32.mrb[44].mxu0 }
 0x21e   : > { %v8650_v52 = vpop.f32.mrb[45].mxu0 }
 0x21f   : > { %7292 = vmatmul.mubr.msk.f32.gmra.mrb[26].mxu1 %vm198_vm0, %v2643_v23  ;;  %v3417_v23 = vld [vmem:[#allocation2 + $0xd4] sm:$0xff] }
 0x220   : > { %7294 = vmatprep.mubr.msk.f32.mxu1 %vm198_vm0, %v2644_v24  ;;  %v3418_v24 = vld [vmem:[#allocation2 + $0xdc] sm:$0xff] }
 0x221   : > { %v8654_v54 = vpop.f32.mrb[46].mxu0 }
 0x222   : > { %v8656_v55 = vpop.f32.mrb[47].mxu0 }
 0x223   : > { %7295 = vmatmul.mubr.msk.f32.gmra.mrb[28].mxu1 %vm198_vm0, %v8577_v25 }
 0x224   : > { %7297 = vmatprep.mubr.msk.f32.mxu1 %vm198_vm0, %v8581_v27 }
 0x225   : > { %v8662_v56 = vpop.f32.mrb[48].mxu0 }
 0x226   : > { %v8666_v59 = vpop.f32.mrb[49].mxu0 }
 0x227   : > { %7298 = vmatmul.mubr.msk.f32.gmra.mrb[30].mxu1 %vm198_vm0, %v8664_v57 }
 0x228   : > { %7300 = vmatprep.mubr.msk.f32.mxu1 %vm198_vm0, %v8670_v62 }
 0x229   : > { %v8674_v63 = vpop.f32.mrb[50].mxu0 }
 0x22a   : > { %v8676_v1 = vpop.f32.mrb[51].mxu0 }
 0x22b   : > { %7301 = vmatmul.mubr.msk.f32.gmra.mrb[32].mxu1 %vm198_vm0, %v3037_v58  ;;  %v3421_v58 = vld [vmem:[#allocation2 + $0xf4] sm:$0xff] }
 0x22c   : > { %7305 = vmatprep.mubr.msk.f32.mxu1 %vm198_vm0, %v3396_v44  ;;  %v3422_v44 = vld [vmem:[#allocation2 + $0xfc] sm:$0xff] }
 0x22d   : > { %v8685_v2 = vpop.f32.mrb[52].mxu0 }
 0x22e   : > { %v8688_v11 = vpop.f32.mrb[53].mxu0 }
 0x22f   : > { %7306 = vmatmul.mubr.msk.f32.vlgmr.msra.gmra.mrb[2].mxu1 %vm198_vm0, %v3397_v6  ;;  %v8738_v6 = vld [vmem:[#allocation2 + $0x10c] sm:$0xff] }
 0x230   : > { %7354 = vmatpush3.msk.msra.mxu1 %vm893_vm2, %v8590_v30  ;;  %7308 = vmatprep.mubr.msk.f32.mxu1 %vm198_vm0, %v3398_v14  ;;  %v3420_v30 = vld [vmem:[#allocation2 + $0xec] sm:$0xff]  ;;  %v8742_v14 = vld [vmem:[#allocation2 + $0x114] sm:$0xff] }
 0x231   : > { %v8694_v4 = vpop.f32.mrb[54].mxu0 }
 0x232   : > { %v8696_v19 = vpop.f32.mrb[55].mxu0 }
 0x233   : > { %7309 = vmatmul.mubr.msk.f32.gmra.mrb[4].mxu1 %vm198_vm0, %v3399_v7  ;;  %v8746_v7 = vld [vmem:[#allocation2 + $0x11c] sm:$0xff] }
 0x234   : > { %7311 = vmatprep.mubr.msk.f32.mxu1 %vm198_vm0, %v3400_v8  ;;  %v3427_v8 = vld [vmem:[#allocation2 + $0x124] sm:$0xf] }
 0x235   : > { %v8700_v21 = vpop.f32.mrb[56].mxu0 }
 0x236   : > { %v8702_v29 = vpop.f32.mrb[57].mxu0 }
 0x237   : > { %7312 = vmatmul.mubr.msk.f32.gmra.mrb[6].mxu1 %vm198_vm0, %v3401_v26  ;;  %v3786_v26 = vld [vmem:[#allocation2 + $0x2d] sm:$0xff] }
 0x238   : > { %7314 = vmatprep.mubr.msk.f32.mxu1 %vm198_vm0, %v3402_v34  ;;  %v3787_v34 = vld [vmem:[#allocation2 + $0x35] sm:$0xff] }
 0x239   : > { %v8706_v9 = vpop.f32.mrb[58].mxu0 }
 0x23a   : > { %v8708_v42 = vpop.f32.mrb[59].mxu0 }
 0x23b   : > { %7315 = vmatmul.mubr.msk.f32.gmra.mrb[8].mxu1 %vm198_vm0, %v3403_v37  ;;  %v3788_v37 = vld [vmem:[#allocation2 + $0x3d] sm:$0xff] }
 0x23c   : > { %7317 = vmatprep.mubr.msk.f32.mxu1 %vm198_vm0, %v3404_v46  ;;  %v3789_v46 = vld [vmem:[#allocation2 + $0x45] sm:$0xff] }
 0x23d   : > { %v8712_v51 = vpop.f32.mrb[60].mxu0 }
 0x23e   : > { %v8714_v60 = vpop.f32.mrb[61].mxu0 }
 0x23f   : > { %7318 = vmatmul.mubr.msk.f32.gmra.mrb[10].mxu1 %vm198_vm0, %v3405_v53  ;;  %v3790_v53 = vld [vmem:[#allocation2 + $0x4d] sm:$0xff] }
 0x240   : > { %7320 = vmatprep.mubr.msk.f32.mxu1 %vm198_vm0, %v3406_v5  ;;  %v3791_v5 = vld [vmem:[#allocation2 + $0x55] sm:$0xff] }
 0x243   : > { %7321 = vmatmul.mubr.msk.f32.gmra.mrb[12].mxu1 %vm198_vm0, %v3407_v0  ;;  %v3792_v0 = vld [vmem:[#allocation2 + $0x5d] sm:$0xff] }
 0x244   : > { %7323 = vmatprep.mubr.msk.f32.mxu1 %vm198_vm0, %v3408_v10  ;;  %v3793_v10 = vld [vmem:[#allocation2 + $0x65] sm:$0xff] }
 0x247   : > { %7324 = vmatmul.mubr.msk.f32.gmra.mrb[14].mxu1 %vm198_vm0, %v3409_v12  ;;  %v3794_v12 = vld [vmem:[#allocation2 + $0x6d] sm:$0xff] }
 0x248   : > { %7326 = vmatprep.mubr.msk.f32.mxu1 %vm198_vm0, %v3410_v13  ;;  %v3795_v13 = vld [vmem:[#allocation2 + $0x75] sm:$0xff] }
 0x24b   : > { %7327 = vmatmul.mubr.msk.f32.gmra.mrb[16].mxu1 %vm198_vm0, %v3411_v15  ;;  %v3796_v15 = vld [vmem:[#allocation2 + $0x7d] sm:$0xff] }
 0x24c   : > { %7329 = vmatprep.mubr.msk.f32.mxu1 %vm198_vm0, %v3412_v16  ;;  %v3797_v16 = vld [vmem:[#allocation2 + $0x85] sm:$0xff] }
 0x24f   : > { %7330 = vmatmul.mubr.msk.f32.gmra.mrb[18].mxu1 %vm198_vm0, %v3413_v17  ;;  %v3798_v17 = vld [vmem:[#allocation2 + $0x8d] sm:$0xff] }
 0x250   : > { %7332 = vmatprep.mubr.msk.f32.mxu1 %vm198_vm0, %v3414_v18  ;;  %v3799_v18 = vld [vmem:[#allocation2 + $0x95] sm:$0xff] }
 0x253   : > { %7333 = vmatmul.mubr.msk.f32.gmra.mrb[20].mxu1 %vm198_vm0, %v3415_v20  ;;  %v3800_v20 = vld [vmem:[#allocation2 + $0x9d] sm:$0xff] }
 0x254   : > { %7335 = vmatprep.mubr.msk.f32.mxu1 %vm198_vm0, %v3416_v22  ;;  %v3801_v22 = vld [vmem:[#allocation2 + $0xa5] sm:$0xff] }
 0x257   : > { %7336 = vmatmul.mubr.msk.f32.gmra.mrb[22].mxu1 %vm198_vm0, %v3417_v23  ;;  %v3802_v23 = vld [vmem:[#allocation2 + $0xad] sm:$0xff] }
 0x258   : > { %7338 = vmatprep.mubr.msk.f32.mxu1 %vm198_vm0, %v3418_v24  ;;  %v3803_v24 = vld [vmem:[#allocation2 + $0xb5] sm:$0xff] }
 0x25b   : > { %7339 = vmatmul.mubr.msk.f32.gmra.mrb[24].mxu1 %vm198_vm0, %v3419_v28  ;;  %v3804_v28 = vld [vmem:[#allocation2 + $0xbd] sm:$0xff] }
 0x25c   : > { %7341 = vmatprep.mubr.msk.f32.mxu1 %vm198_vm0, %v3420_v30  ;;  %v3805_v30 = vld [vmem:[#allocation2 + $0xc5] sm:$0xff] }
 0x25f   : > { %7342 = vmatmul.mubr.msk.f32.gmra.mrb[26].mxu1 %vm198_vm0, %v3421_v58  ;;  %v3806_v58 = vld [vmem:[#allocation2 + $0xcd] sm:$0xff] }
 0x260   : > { %7344 = vmatprep.mubr.msk.f32.mxu1 %vm198_vm0, %v3422_v44  ;;  %v3807_v44 = vld [vmem:[#allocation2 + $0xd5] sm:$0xff] }
 0x263   : > { %7345 = vmatmul.mubr.msk.f32.gmra.mrb[28].mxu1 %vm198_vm0, %v8734_v61 }
 0x264   : > { %7347 = vmatprep.mubr.msk.f32.mxu1 %vm198_vm0, %v8738_v6 }
 0x267   : > { %7348 = vmatmul.mubr.msk.f32.gmra.mrb[30].mxu1 %vm198_vm0, %v8742_v14 }
 0x268   : > { %7350 = vmatprep.mubr.msk.f32.mxu1 %vm198_vm0, %v8746_v7 }
 0x26b   : > { %7351 = vmatmul.mubr.msk.f32.gmra.mrb[32].mxu1 %vm198_vm0, %v3427_v8  ;;  %v3808_v8 = vld [vmem:[#allocation2 + $0xdd] sm:$0xff] }
 0x26c   : > { %7355 = vmatprep.mubr.msk.f32.mxu1 %vm198_vm0, %v3786_v26  ;;  %v3809_v26 = vld [vmem:[#allocation2 + $0xe5] sm:$0xff] }
 0x26f   : > { %7356 = vmatmul.mubr.msk.f32.vlgmr.msra.gmra.mrb[2].mxu1 %vm198_vm0, %v3787_v34  ;;  %v3810_v34 = vld [vmem:[#allocation2 + $0xed] sm:$0xff] }
 0x270   : > { %7358 = vmatprep.mubr.msk.f32.mxu1 %vm198_vm0, %v3788_v37  ;;  %v3811_v37 = vld [vmem:[#allocation2 + $0xf5] sm:$0xff] }
 0x273   : > { %7359 = vmatmul.mubr.msk.f32.gmra.mrb[4].mxu1 %vm198_vm0, %v3789_v46  ;;  %v3812_v46 = vld [vmem:[#allocation2 + $0xfd] sm:$0xff] }
 0x274   : > { %7361 = vmatprep.mubr.msk.f32.mxu1 %vm198_vm0, %v3790_v53  ;;  %v8778_v53 = vld [vmem:[#allocation2 + $0x105] sm:$0xff] }
 0x277   : > { %7362 = vmatmul.mubr.msk.f32.gmra.mrb[6].mxu1 %vm198_vm0, %v3791_v5  ;;  %v8782_v5 = vld [vmem:[#allocation2 + $0x10d] sm:$0xff] }
 0x278   : > { %7364 = vmatprep.mubr.msk.f32.mxu1 %vm198_vm0, %v3792_v0  ;;  %v8786_v0 = vld [vmem:[#allocation2 + $0x115] sm:$0xff] }
 0x27b   : > { %7365 = vmatmul.mubr.msk.f32.gmra.mrb[8].mxu1 %vm198_vm0, %v3793_v10  ;;  %v8790_v10 = vld [vmem:[#allocation2 + $0x11d] sm:$0xff] }
 0x27c   : > { %7367 = vmatprep.mubr.msk.f32.mxu1 %vm198_vm0, %v3794_v12  ;;  %v3817_v12 = vld [vmem:[#allocation2 + $0x125] sm:$0xf] }
 0x27f   : > { %7368 = vmatmul.mubr.msk.f32.gmra.mrb[10].mxu1 %vm198_vm0, %v3795_v13 }
 0x280   : > { %7370 = vmatprep.mubr.msk.f32.mxu1 %vm198_vm0, %v3796_v15 }
 0x283   : > { %7371 = vmatmul.mubr.msk.f32.gmra.mrb[12].mxu1 %vm198_vm0, %v3797_v16 }
 0x284   : > { %7373 = vmatprep.mubr.msk.f32.mxu1 %vm198_vm0, %v3798_v17 }
 0x287   : > { %7374 = vmatmul.mubr.msk.f32.gmra.mrb[14].mxu1 %vm198_vm0, %v3799_v18 }
 0x288   : > { %7376 = vmatprep.mubr.msk.f32.mxu1 %vm198_vm0, %v3800_v20 }
 0x28b   : > { %7377 = vmatmul.mubr.msk.f32.gmra.mrb[16].mxu1 %vm198_vm0, %v3801_v22 }
 0x28c   : > { %7379 = vmatprep.mubr.msk.f32.mxu1 %vm198_vm0, %v3802_v23 }
 0x28f   : > { %7380 = vmatmul.mubr.msk.f32.gmra.mrb[18].mxu1 %vm198_vm0, %v3803_v24 }
 0x290   : > { %7382 = vmatprep.mubr.msk.f32.mxu1 %vm198_vm0, %v3804_v28  ;;  %v6399_v28 = vld [vmem:[%s9216_s2 + $0x4] sm:$0xf] }
 0x293   : > { %7383 = vmatmul.mubr.msk.f32.gmra.mrb[20].mxu1 %vm198_vm0, %v3805_v30 }
 0x294   : > { %7385 = vmatprep.mubr.msk.f32.mxu1 %vm198_vm0, %v3806_v58 }
 0x297   : > { %7386 = vmatmul.mubr.msk.f32.gmra.mrb[22].mxu1 %vm198_vm0, %v3807_v44 }
 0x298   : > { %7388 = vmatprep.mubr.msk.f32.mxu1 %vm198_vm0, %v3808_v8 }
 0x29b   : > { %7389 = vmatmul.mubr.msk.f32.gmra.mrb[24].mxu1 %vm198_vm0, %v3809_v26 }
 0x29c   : > { %7391 = vmatprep.mubr.msk.f32.mxu1 %vm198_vm0, %v3810_v34 }
 0x29f   : > { %7392 = vmatmul.mubr.msk.f32.gmra.mrb[26].mxu1 %vm198_vm0, %v3811_v37 }
 0x2a0   : > { %7394 = vmatprep.mubr.msk.f32.mxu1 %vm198_vm0, %v3812_v46 }
 0x2a3   : > { %7395 = vmatmul.mubr.msk.f32.gmra.mrb[28].mxu1 %vm198_vm0, %v8778_v53 }
 0x2a4   : > { %7397 = vmatprep.mubr.msk.f32.mxu1 %vm198_vm0, %v8782_v5 }
 0x2a7   : > { %7398 = vmatmul.mubr.msk.f32.gmra.mrb[30].mxu1 %vm198_vm0, %v8786_v0 }
 0x2a8   : > { %7400 = vmatprep.mubr.msk.f32.mxu1 %vm198_vm0, %v8790_v10 }
 0x2ab   : > { %7401 = vmatmul.mubr.msk.f32.gmra.mrb[32].mxu1 %vm198_vm0, %v3817_v12 }
 0x342   : > { %v7357_v13 = vpop.f32.mrb[2].mxu1 }
 0x343   : > { %v7633_v15 = vadd.f32 %v7357_v13, %v8606_v31  ;;  %v3985_v16 = vpop.f32.mrb[3].mxu1 }
 0x344   : > { %v7634_v17 = vadd.f32 %v3985_v16, %v8609_v32 }
 0x345   : > { %v4177_v22 = vmax.f32 %v7633_v15, 0.0 }
 0x346   : > { %v4176_v18 = vmax.f32 %v7634_v17, 0.0  ;;  %v7360_v20 = vpop.f32.mrb[4].mxu1 }
 0x347   : > { %v7635_v23 = vadd.f32 %v7360_v20, %v8612_v33  ;;  %v3995_v24 = vpop.f32.mrb[5].mxu1 }
 0x348   : > { %v7636_v30 = vadd.f32 %v3995_v24, %v8614_v35  ;;  %7405 = vmatprep.mubr.msk.f32.mxu0 %vm198_vm0, %v4176_v18 }
 0x349   : > { %7406 = vmatmul.mubr.msk.f32.vlgmr.msra.gmra.mrb[62].mxu0 %vm198_vm0, %v4177_v22  ;;  %v4179_v58 = vmax.f32 %v7635_v23, 0.0 }
 0x34a   : > { %v4178_v31 = vmax.f32 %v7636_v30, 0.0  ;;  %7454 = vmatpush3.msk.msra.mxu0 %vm893_vm2, %v6399_v28  ;;  %v7363_v32 = vpop.f32.mrb[6].mxu1 }
 0x34b   : > { %v7637_v44 = vadd.f32 %v7363_v32, %v8618_v36  ;;  %v4005_v8 = vpop.f32.mrb[7].mxu1  ;;  %7470 = vmatprep.subr.mxu0 %v7987_v3 }
 0x34c   : > { %v7638_v33 = vadd.f32 %v4005_v8, %v8620_v38  ;;  %7408 = vmatprep.mubr.msk.f32.mxu0 %vm198_vm0, %v4178_v31 }
 0x34d   : > { %7409 = vmatmul.mubr.msk.f32.gmra.mrb[64].mxu0 %vm198_vm0, %v4179_v58  ;;  %v4181_v34 = vmax.f32 %v7637_v44, 0.0 }
 0x34e   : > { %v4180_v35 = vmax.f32 %v7638_v33, 0.0  ;;  %v7366_v26 = vpop.f32.mrb[8].mxu1 }
 0x34f   : > { %v7639_v37 = vadd.f32 %v7366_v26, %v8624_v39  ;;  %v4015_v46 = vpop.f32.mrb[9].mxu1 }
 0x350   : > { %v7640_v12 = vadd.f32 %v4015_v46, %v8626_v40  ;;  %7411 = vmatprep.mubr.msk.f32.mxu0 %vm198_vm0, %v4180_v35 }
 0x351   : > { %7412 = vmatmul.mubr.msk.f32.gmra.mrb[66].mxu0 %vm198_vm0, %v4181_v34  ;;  %v4183_v15 = vmax.f32 %v7639_v37, 0.0 }
 0x352   : > { %v4182_v36 = vmax.f32 %v7640_v12, 0.0  ;;  %v7369_v13 = vpop.f32.mrb[10].mxu1 }
 0x353   : > { %v7641_v38 = vadd.f32 %v7369_v13, %v8630_v41  ;;  %v4025_v16 = vpop.f32.mrb[11].mxu1 }
 0x354   : > { %v7642_v17 = vadd.f32 %v4025_v16, %v8632_v43  ;;  %7414 = vmatprep.mubr.msk.f32.mxu0 %vm198_vm0, %v4182_v36 }
 0x355   : > { %7415 = vmatmul.mubr.msk.f32.gmra.mrb[68].mxu0 %vm198_vm0, %v4183_v15  ;;  %v4185_v20 = vmax.f32 %v7641_v38, 0.0 }
 0x356   : > { %v4184_v39 = vmax.f32 %v7642_v17, 0.0  ;;  %v7372_v18 = vpop.f32.mrb[12].mxu1 }
 0x357   : > { %v7643_v40 = vadd.f32 %v7372_v18, %v8636_v45  ;;  %v4035_v22 = vpop.f32.mrb[13].mxu1 }
 0x358   : > { %v7644_v23 = vadd.f32 %v4035_v22, %v8638_v47  ;;  %7417 = vmatprep.mubr.msk.f32.mxu0 %vm198_vm0, %v4184_v39 }
 0x359   : > { %7418 = vmatmul.mubr.msk.f32.gmra.mrb[70].mxu0 %vm198_vm0, %v4185_v20  ;;  %v4187_v28 = vmax.f32 %v7643_v40, 0.0 }
 0x35a   : > { %v4186_v41 = vmax.f32 %v7644_v23, 0.0  ;;  %v7375_v24 = vpop.f32.mrb[14].mxu1 }
 0x35b   : > { %v7645_v43 = vadd.f32 %v7375_v24, %v8642_v48  ;;  %v4045_v30 = vpop.f32.mrb[15].mxu1 }
 0x35c   : > { %v7646_v31 = vadd.f32 %v4045_v30, %v8644_v49  ;;  %7420 = vmatprep.mubr.msk.f32.mxu0 %vm198_vm0, %v4186_v41 }
 0x35d   : > { %7421 = vmatmul.mubr.msk.f32.gmra.mrb[72].mxu0 %vm198_vm0, %v4187_v28  ;;  %v4189_v58 = vmax.f32 %v7645_v43, 0.0 }
 0x35e   : > { %v4188_v45 = vmax.f32 %v7646_v31, 0.0  ;;  %v7378_v32 = vpop.f32.mrb[16].mxu1 }
 0x35f   : > { %v7647_v47 = vadd.f32 %v7378_v32, %v8648_v50  ;;  %v4055_v44 = vpop.f32.mrb[17].mxu1 }
 0x360   : > { %v7648_v8 = vadd.f32 %v4055_v44, %v8650_v52  ;;  %7423 = vmatprep.mubr.msk.f32.mxu0 %vm198_vm0, %v4188_v45 }
 0x361   : > { %7424 = vmatmul.mubr.msk.f32.gmra.mrb[74].mxu0 %vm198_vm0, %v4189_v58  ;;  %v4191_v35 = vmax.f32 %v7647_v47, 0.0 }
 0x362   : > { %v4190_v48 = vmax.f32 %v7648_v8, 0.0  ;;  %v7381_v33 = vpop.f32.mrb[18].mxu1 }
 0x363   : > { %v7649_v49 = vadd.f32 %v7381_v33, %v8654_v54  ;;  %v4065_v26 = vpop.f32.mrb[19].mxu1 }
 0x364   : > { %v7650_v34 = vadd.f32 %v4065_v26, %v8656_v55  ;;  %7426 = vmatprep.mubr.msk.f32.mxu0 %vm198_vm0, %v4190_v48  ;;  %v5348_v26 = vld [vmem:[#allocation2 + $0x117] sm:$0xff] }
 0x365   : > { %7427 = vmatmul.mubr.msk.f32.gmra.mrb[76].mxu0 %vm198_vm0, %v4191_v35  ;;  %v4193_v46 = vmax.f32 %v7649_v49, 0.0  ;;  %v5233_v35 = vld [vmem:[#allocation2 + $0x136] sm:$0xf] }
 0x366   : > { %v4192_v50 = vmax.f32 %v7650_v34, 0.0  ;;  %v7384_v37 = vpop.f32.mrb[20].mxu1  ;;  %v6440_v49 = vld [vmem:[%s9216_s2 + $0x18] sm:$0xf]  ;;  %v5349_v34 = vld [vmem:[#allocation2 + $0x11f] sm:$0xff] }
 0x367   : > { %v7651_v52 = vadd.f32 %v7384_v37, %v8662_v56  ;;  %v4075_v12 = vpop.f32.mrb[21].mxu1  ;;  %v5351_v37 = vld [vmem:[#allocation2 + $0x12f] sm:$0xff] }
 0x368   : > { %v7652_v36 = vadd.f32 %v4075_v12, %v8666_v59  ;;  %7429 = vmatprep.mubr.msk.f32.mxu0 %vm198_vm0, %v4192_v50  ;;  %v5350_v50 = vld [vmem:[#allocation2 + $0x127] sm:$0xff]  ;;  %v5469_v12 = vld [vmem:[#allocation2 + $0x137] sm:$0xff] }
 0x369   : > { %7430 = vmatmul.mubr.msk.f32.gmra.mrb[78].mxu0 %vm198_vm0, %v4193_v46  ;;  %v4195_v15 = vmax.f32 %v7651_v52, 0.0  ;;  %v5352_v46 = vld [vmem:[#allocation2 + $0x137] sm:$0xf]  ;;  %v6447_v52 = vld [vmem:[%s9216_s2 + $0x1c] sm:$0xf] }
 0x36a   : > { %v4194_v54 = vmax.f32 %v7652_v36, 0.0  ;;  %v7387_v13 = vpop.f32.mrb[22].mxu1  ;;  %v5470_v36 = vld [vmem:[#allocation2 + $0x13f] sm:$0xff] }
 0x36b   : > { %v7653_v55 = vadd.f32 %v7387_v13, %v8674_v63  ;;  %v4085_v38 = vpop.f32.mrb[23].mxu1  ;;  %v6454_v13 = vld [vmem:[%s9216_s2 + $0x20] sm:$0xf] }
 0x36c   : > { %v7654_v16 = vadd.f32 %v4085_v38, %v8676_v1  ;;  %7432 = vmatprep.mubr.msk.f32.mxu0 %vm198_vm0, %v4194_v54  ;;  %v5471_v54 = vld [vmem:[#allocation2 + $0x147] sm:$0xf]  ;;  %v4542_v38 = vld [vmem:[%s8120_s24 + $0x18] sm:$0xff] }
 0x36d   : > { %7433 = vmatmul.mubr.msk.f32.gmra.mrb[80].mxu0 %vm198_vm0, %v4195_v15  ;;  %v4197_v39 = vmax.f32 %v7653_v55, 0.0  ;;  %v5586_v15 = vld [vmem:[#allocation2 + $0x128] sm:$0xff]  ;;  %v4541_v55 = vld [vmem:[%s8120_s24 + $0x10] sm:$0xff] }
 0x36e   : > { %v4196_v56 = vmax.f32 %v7654_v16, 0.0  ;;  %v7390_v17 = vpop.f32.mrb[24].mxu1  ;;  %v5587_v16 = vld [vmem:[#allocation2 + $0x130] sm:$0xff] }
 0x36f   : > { %v7655_v59 = vadd.f32 %v7390_v17, %v8685_v2  ;;  %v4095_v18 = vpop.f32.mrb[25].mxu1  ;;  %v5588_v17 = vld [vmem:[#allocation2 + $0x138] sm:$0xff] }
 0x370   : > { %v7656_v20 = vadd.f32 %v4095_v18, %v8688_v11  ;;  %7435 = vmatprep.mubr.msk.f32.mxu0 %vm198_vm0, %v4196_v56  ;;  %v4534_v56 = vld [vmem:[%s8120_s24 + $0x8] sm:$0xff]  ;;  %v4533_v18 = vld [vmem:[%s8120_s24] sm:$0xff] }
 0x371   : > { %7436 = vmatmul.mubr.msk.f32.gmra.mrb[82].mxu0 %vm198_vm0, %v4197_v39  ;;  %v4199_v22 = vmax.f32 %v7655_v59, 0.0  ;;  %v4546_v39 = vrot.slane %v4541_v55, 6  ;;  %v4547_v59 = vrot.slane %v4542_v38, 6  ;;  %v4607_v55 = vld [vmem:[%s8120_s24 + $0x48] sm:$0xff] }
 0x372   : > { %v4198_v63 = vmax.f32 %v7656_v20, 0.0  ;;  %v7393_v40 = vpop.f32.mrb[26].mxu1  ;;  %v4563_v20 = vld [vmem:[%s8120_s24 + $0x20] sm:$0xff] }
 0x373   : > { %v7657_v1 = vadd.f32 %v7393_v40, %v8694_v4  ;;  %v4105_v23 = vpop.f32.mrb[27].mxu1 }
 0x374   : > { %v7658_v41 = vadd.f32 %v4105_v23, %v8696_v19  ;;  %7438 = vmatprep.mubr.msk.f32.mxu0 %vm198_vm0, %v4198_v63  ;;  %v4564_v63 = vld [vmem:[%s8120_s24 + $0x28] sm:$0xff] }
 0x375   : > { %7439 = vmatmul.mubr.msk.f32.gmra.mrb[84].mxu0 %vm198_vm0, %v4199_v22  ;;  %v4201_v28 = vmax.f32 %v7657_v1, 0.0 }
 0x376   : > { %v4200_v2 = vmax.f32 %v7658_v41, 0.0  ;;  %v7396_v24 = vpop.f32.mrb[28].mxu1  ;;  %v4548_v41 = vsel %vm4545_vm4, %v4546_v39, %v4547_v59 }
 0x377   : > { %v7659_v11 = vadd.f32 %v7396_v24, %v8700_v21  ;;  %v4115_v43 = vpop.f32.mrb[29].mxu1  ;;  %v4567_v24 = vrot.slane %v4563_v20, 4 }
 0x378   : > { %v7660_v30 = vadd.f32 %v4115_v43, %v8702_v29  ;;  %7441 = vmatprep.mubr.msk.f32.mxu0 %vm198_vm0, %v4200_v2  ;;  %v5589_v2 = vld [vmem:[#allocation2 + $0x140] sm:$0xff]  ;;  %v4584_v43 = vld [vmem:[%s8120_s24 + $0x30] sm:$0xff] }
 0x379   : > { %7442 = vmatmul.mubr.msk.f32.gmra.mrb[86].mxu0 %vm198_vm0, %v4201_v28  ;;  %v4203_v45 = vmax.f32 %v7659_v11, 0.0  ;;  %v4568_v28 = vrot.slane %v4564_v63, 4  ;;  %v5708_v63 = vld [vmem:[#allocation2 + $0x141] sm:$0xff] }
 0x37a   : > { %v4202_v4 = vmax.f32 %v7660_v30, 0.0  ;;  %v7399_v31 = vpop.f32.mrb[30].mxu1  ;;  %v9050_v30 = vld [vmem:[%s8120_s24 + $0x38] sm:$0xff] }
 0x37b   : > { %v7661_v19 = vadd.f32 %v7399_v31, %v8706_v9  ;;  %v4125_v32 = vpop.f32.mrb[31].mxu1 }
 0x37c   : > { %v7662_v58 = vadd.f32 %v4125_v32, %v8708_v42  ;;  %7444 = vmatprep.mubr.msk.f32.mxu0 %vm198_vm0, %v4202_v4  ;;  %v4768_v42 = vld [vmem:[%s9216_s2] sm:$0xf] }
 0x37d   : > { %7445 = vmatmul.mubr.msk.f32.gmra.mrb[88].mxu0 %vm198_vm0, %v4203_v45  ;;  %v4205_v44 = vmax.f32 %v7661_v19, 0.0 }
 0x37e   : > { %v4204_v21 = vmax.f32 %v7662_v58, 0.0  ;;  %v7402_v47 = vpop.f32.mrb[32].mxu1  ;;  %v4569_v58 = vsel %vm893_vm2, %v4567_v24, %v4568_v28 }
 0x37f   : > { %v7663_v29 = vadd.f32 %v7402_v47, %v8712_v51  ;;  %v4135_v8 = vpop.f32.mrb[33].mxu1  ;;  %v4773_v51 = vld [vmem:[#allocation2 + $0x124] sm:$0xf]  ;;  %v4589_v47 = vrot.slane %v4584_v43, 2 }
 0x380   : > { %v7664_v48 = vadd.f32 %v4135_v8, %v8714_v60  ;;  %7447 = vmatprep.mubr.msk.f32.mxu0 %vm198_vm0, %v4204_v21  ;;  %v6412_v60 = vld [vmem:[%s9216_s2 + $0x8] sm:$0xf] }
 0x381   : > { %7448 = vmatmul.mubr.msk.f32.gmra.mrb[90].mxu0 %vm198_vm0, %v4205_v44  ;;  %v4207_v33 = vmax.f32 %v7663_v29, 0.0  ;;  %v5590_v21 = vld [vmem:[#allocation2 + $0x148] sm:$0xf]  ;;  %v4590_v44 = vrot.slane %v9050_v30, 2 }
 0x382   : > { %v4206_v9 = vmax.f32 %v7664_v48, 0.0 }
 0x384   : > { %7450 = vmatprep.mubr.msk.f32.mxu0 %vm198_vm0, %v4206_v9 }
 0x385   : > { %7451 = vmatmul.mubr.msk.f32.gmra.mrb[92].mxu0 %vm198_vm0, %v4207_v33 }
 0x386   : > { %7455 = vmatprep.mubr.msk.f32.mxu0 %vm7988_vm3, %v7987_v3 }
 0x389   : > { %7456 = vmatmul.mubr.msk.f32.vlgmr.msra.gmra.mrb[94].mxu0 %vm198_vm0, %v8734_v61  ;;  %v5112_v61 = vld [vmem:[#allocation2 + $0x125] sm:$0xff] }
 0x38a   : > { %7471 = vmatpush3.msk.msra.mxu0 %vm893_vm2, %v4768_v42  ;;  %7458 = vmatprep.mubr.msk.f32.mxu0 %vm7988_vm3, %v7987_v3 }
 0x38b   : > { %7487 = vmatprep.subr.mxu0 %v7987_v3 }
 0x38d   : > { %7459 = vmatmul.mubr.msk.f32.gmra.mrb[96].mxu0 %vm198_vm0, %v8738_v6  ;;  %v5113_v6 = vld [vmem:[#allocation2 + $0x12d] sm:$0xff] }
 0x38e   : > { %7461 = vmatprep.mubr.msk.f32.mxu0 %vm7988_vm3, %v7987_v3 }
 0x391   : > { %7462 = vmatmul.mubr.msk.f32.gmra.mrb[98].mxu0 %vm198_vm0, %v8742_v14  ;;  %v5114_v14 = vld [vmem:[#allocation2 + $0x135] sm:$0xf] }
 0x392   : > { %7464 = vmatprep.mubr.msk.f32.mxu0 %vm7988_vm3, %v7987_v3 }
 0x395   : > { %7465 = vmatmul.mubr.msk.f32.gmra.mrb[100].mxu0 %vm198_vm0, %v8746_v7  ;;  %v6433_v7 = vld [vmem:[%s9216_s2 + $0x14] sm:$0xf] }
 0x396   : > { %7467 = vmatprep.mubr.msk.f32.mxu0 %vm7988_vm3, %v7987_v3 }
 0x399   : > { %7468 = vmatmul.mubr.msk.f32.gmra.mrb[102].mxu0 %vm198_vm0, %v4773_v51 }
 0x39a   : > { %7472 = vmatprep.mubr.msk.f32.mxu0 %vm7988_vm3, %v7987_v3 }
 0x39d   : > { %7473 = vmatmul.mubr.msk.f32.vlgmr.msra.gmra.mrb[94].mxu0 %vm198_vm0, %v8577_v25  ;;  %v4767_v25 = vld [vmem:[#allocation2 + $0x123] sm:$0xf] }
 0x39e   : > { %7488 = vmatpush3.msk.msra.mxu0 %vm893_vm2, %v6412_v60  ;;  %7475 = vmatprep.mubr.msk.f32.mxu0 %vm7988_vm3, %v7987_v3  ;;  %v4591_v60 = vsel %vm4588_vm6, %v4589_v47, %v4590_v44 }
 0x39f   : > { %7504 = vmatprep.subr.mxu0 %v7987_v3 }
 0x3a1   : > { %7476 = vmatmul.mubr.msk.f32.gmra.mrb[96].mxu0 %vm198_vm0, %v8581_v27  ;;  %v6419_v27 = vld [vmem:[%s9216_s2 + $0xc] sm:$0xf] }
 0x3a2   : > { %7478 = vmatprep.mubr.msk.f32.mxu0 %vm7988_vm3, %v7987_v3 }
 0x3a5   : > { %7479 = vmatmul.mubr.msk.f32.gmra.mrb[98].mxu0 %vm198_vm0, %v8664_v57  ;;  %v4995_v57 = vld [vmem:[#allocation2 + $0x125] sm:$0xf] }
 0x3a6   : > { %7481 = vmatprep.mubr.msk.f32.mxu0 %vm7988_vm3, %v7987_v3 }
 0x3a9   : > { %7482 = vmatmul.mubr.msk.f32.gmra.mrb[100].mxu0 %vm198_vm0, %v8670_v62  ;;  %v6426_v62 = vld [vmem:[%s9216_s2 + $0x10] sm:$0xf] }
 0x3aa   : > { %7484 = vmatprep.mubr.msk.f32.mxu0 %vm7988_vm3, %v7987_v3 }
 0x3ad   : > { %7485 = vmatmul.mubr.msk.f32.gmra.mrb[102].mxu0 %vm198_vm0, %v4767_v25 }
 0x3ae   : > { %7489 = vmatprep.mubr.msk.f32.mxu0 %vm7988_vm3, %v7987_v3 }
 0x3b1   : > { %7490 = vmatmul.mubr.msk.f32.vlgmr.msra.gmra.mrb[94].mxu0 %vm198_vm0, %v8778_v53  ;;  %v5229_v53 = vld [vmem:[#allocation2 + $0x116] sm:$0xff] }
 0x3b2   : > { %7505 = vmatpush3.msk.msra.mxu0 %vm893_vm2, %v6419_v27  ;;  %7492 = vmatprep.mubr.msk.f32.mxu0 %vm7988_vm3, %v7987_v3  ;;  %v5829_v27 = vld [vmem:[%s9217_s3] sm:$0xf] }
 0x3b3   : > { %7521 = vmatprep.subr.mxu0 %v7987_v3 }
 0x3b5   : > { %7493 = vmatmul.mubr.msk.f32.gmra.mrb[96].mxu0 %vm198_vm0, %v8782_v5  ;;  %v5230_v5 = vld [vmem:[#allocation2 + $0x11e] sm:$0xff] }
 0x3b6   : > { %7495 = vmatprep.mubr.msk.f32.mxu0 %vm7988_vm3, %v7987_v3 }
 0x3b9   : > { %7496 = vmatmul.mubr.msk.f32.gmra.mrb[98].mxu0 %vm198_vm0, %v8786_v0 }
 0x3ba   : > { %7498 = vmatprep.mubr.msk.f32.mxu0 %vm7988_vm3, %v7987_v3 }
 0x3bd   : > { %7499 = vmatmul.mubr.msk.f32.gmra.mrb[100].mxu0 %vm198_vm0, %v8790_v10 }
 0x3be   : > { %7501 = vmatprep.mubr.msk.f32.mxu0 %vm7988_vm3, %v7987_v3 }
 0x3c1   : > { %7502 = vmatmul.mubr.msk.f32.gmra.mrb[102].mxu0 %vm198_vm0, %v4995_v57 }
 0x3c2   : > { %7506 = vmatprep.mubr.msk.f32.mxu0 %vm7988_vm3, %v7987_v3 }
 0x3c5   : > { %7507 = vmatmul.mubr.msk.f32.vlgmr.msra.gmra.mrb[94].mxu0 %vm198_vm0, %v8786_v0  ;;  %v5231_v0 = vld [vmem:[#allocation2 + $0x126] sm:$0xff] }
 0x3c6   : > { %7522 = vmatpush3.msk.msra.mxu0 %vm893_vm2, %v6426_v62  ;;  %7509 = vmatprep.mubr.msk.f32.mxu0 %vm7988_vm3, %v7987_v3 }
 0x3c7   : > { %7538 = vmatprep.subr.mxu0 %v7987_v3 }
 0x3c9   : > { %7510 = vmatmul.mubr.msk.f32.gmra.mrb[96].mxu0 %vm198_vm0, %v8790_v10  ;;  %v5232_v10 = vld [vmem:[#allocation2 + $0x12e] sm:$0xff] }
 0x3ca   : > { %7512 = vmatprep.mubr.msk.f32.mxu0 %vm7988_vm3, %v7987_v3 }
 0x3cd   : > { %7513 = vmatmul.mubr.msk.f32.gmra.mrb[98].mxu0 %vm198_vm0, %v5112_v61 }
 0x3ce   : > { %7515 = vmatprep.mubr.msk.f32.mxu0 %vm7988_vm3, %v7987_v3 }
 0x3d1   : > { %7516 = vmatmul.mubr.msk.f32.gmra.mrb[100].mxu0 %vm198_vm0, %v5113_v6  ;;  %v5705_v6 = vld [vmem:[#allocation2 + $0x129] sm:$0xff] }
 0x3d2   : > { %7518 = vmatprep.mubr.msk.f32.mxu0 %vm7988_vm3, %v7987_v3 }
 0x3d5   : > { %7519 = vmatmul.mubr.msk.f32.gmra.mrb[102].mxu0 %vm198_vm0, %v5114_v14 }
 0x3d6   : > { %7523 = vmatprep.mubr.msk.f32.mxu0 %vm7988_vm3, %v7987_v3 }
 0x3d9   : > { %7524 = vmatmul.mubr.msk.f32.vlgmr.msra.gmra.mrb[94].mxu0 %vm198_vm0, %v5229_v53 }
 0x3da   : > { %7539 = vmatpush3.msk.msra.mxu0 %vm893_vm2, %v6433_v7  ;;  %7526 = vmatprep.mubr.msk.f32.mxu0 %vm7988_vm3, %v7987_v3 }
 0x3db   : > { %7555 = vmatprep.subr.mxu0 %v7987_v3 }
 0x3dd   : > { %7527 = vmatmul.mubr.msk.f32.gmra.mrb[96].mxu0 %vm198_vm0, %v5230_v5 }
 0x3de   : > { %7529 = vmatprep.mubr.msk.f32.mxu0 %vm7988_vm3, %v7987_v3 }
 0x3e1   : > { %7530 = vmatmul.mubr.msk.f32.gmra.mrb[98].mxu0 %vm198_vm0, %v5231_v0  ;;  %v4606_v0 = vld [vmem:[%s8120_s24 + $0x40] sm:$0xff] }
 0x3e2   : > { %7532 = vmatprep.mubr.msk.f32.mxu0 %vm7988_vm3, %v7987_v3 }
 0x3e5   : > { %7533 = vmatmul.mubr.msk.f32.gmra.mrb[100].mxu0 %vm198_vm0, %v5232_v10  ;;  %v4614_v10 = vld [vmem:[%s8120_s24 + $0x50] sm:$0xff] }
 0x3e6   : > { %7535 = vmatprep.mubr.msk.f32.mxu0 %vm7988_vm3, %v7987_v3 }
 0x3e9   : > { %7536 = vmatmul.mubr.msk.f32.gmra.mrb[102].mxu0 %vm198_vm0, %v5233_v35 }
 0x3ea   : > { %7540 = vmatprep.mubr.msk.f32.mxu0 %vm7988_vm3, %v7987_v3 }
 0x3ed   : > { %7541 = vmatmul.mubr.msk.f32.vlgmr.msra.gmra.mrb[94].mxu0 %vm198_vm0, %v5348_v26 }
 0x3ee   : > { %7556 = vmatpush3.msk.msra.mxu0 %vm893_vm2, %v6440_v49  ;;  %7543 = vmatprep.mubr.msk.f32.mxu0 %vm7988_vm3, %v7987_v3 }
 0x3ef   : > { %7572 = vmatprep.subr.mxu0 %v7987_v3 }
 0x3f1   : > { %7544 = vmatmul.mubr.msk.f32.gmra.mrb[96].mxu0 %vm198_vm0, %v5349_v34 }
 0x3f2   : > { %7546 = vmatprep.mubr.msk.f32.mxu0 %vm7988_vm3, %v7987_v3 }
 0x3f5   : > { %7547 = vmatmul.mubr.msk.f32.gmra.mrb[98].mxu0 %vm198_vm0, %v5350_v50 }
 0x3f6   : > { %7549 = vmatprep.mubr.msk.f32.mxu0 %vm7988_vm3, %v7987_v3 }
 0x3f9   : > { %7550 = vmatmul.mubr.msk.f32.gmra.mrb[100].mxu0 %vm198_vm0, %v5351_v37 }
 0x3fa   : > { %7552 = vmatprep.mubr.msk.f32.mxu0 %vm7988_vm3, %v7987_v3 }
 0x3fd   : > { %7553 = vmatmul.mubr.msk.f32.gmra.mrb[102].mxu0 %vm198_vm0, %v5352_v46 }
 0x3fe   : > { %7557 = vmatprep.mubr.msk.f32.mxu0 %vm7988_vm3, %v7987_v3 }
 0x401   : > { %7558 = vmatmul.mubr.msk.f32.vlgmr.msra.gmra.mrb[94].mxu0 %vm198_vm0, %v5350_v50  ;;  %v5706_v50 = vld [vmem:[#allocation2 + $0x131] sm:$0xff] }
 0x402   : > { %7573 = vmatpush3.msk.msra.mxu0 %vm893_vm2, %v6447_v52  ;;  %7560 = vmatprep.mubr.msk.f32.mxu0 %vm7988_vm3, %v7987_v3 }
 0x403   : > { %7589 = vmatprep.subr.mxu0 %v7987_v3 }
 0x405   : > { %7561 = vmatmul.mubr.msk.f32.gmra.mrb[96].mxu0 %vm198_vm0, %v5351_v37  ;;  %v4615_v37 = vld [vmem:[%s8120_s24 + $0x58] sm:$0xff] }
 0x406   : > { %7563 = vmatprep.mubr.msk.f32.mxu0 %vm7988_vm3, %v7987_v3  ;;  %v4619_v38 = vrot.slane %v4615_v37, 6 }
 0x409   : > { %7564 = vmatmul.mubr.msk.f32.gmra.mrb[98].mxu0 %vm198_vm0, %v5469_v12  ;;  %v4618_v12 = vrot.slane %v4614_v10, 6  ;;  %v4699_v10 = vld [vmem:[%s8120_s24 + $0xa8] sm:$0xff] }
 0x40a   : > { %7566 = vmatprep.mubr.msk.f32.mxu0 %vm7988_vm3, %v7987_v3 }
 0x40d   : > { %7567 = vmatmul.mubr.msk.f32.gmra.mrb[100].mxu0 %vm198_vm0, %v5470_v36 }
 0x40e   : > { %7569 = vmatprep.mubr.msk.f32.mxu0 %vm7988_vm3, %v7987_v3 }
 0x411   : > { %7570 = vmatmul.mubr.msk.f32.gmra.mrb[102].mxu0 %vm198_vm0, %v5471_v54  ;;  %v5707_v54 = vld [vmem:[#allocation2 + $0x139] sm:$0xff] }
 0x412   : > { %7574 = vmatprep.mubr.msk.f32.mxu0 %vm7988_vm3, %v7987_v3 }
 0x415   : > { %7575 = vmatmul.mubr.msk.f32.vlgmr.msra.gmra.mrb[94].mxu0 %vm198_vm0, %v5586_v15 }
 0x416   : > { %7590 = vmatpush3.msk.msra.mxu0 %vm893_vm2, %v6454_v13  ;;  %7577 = vmatprep.mubr.msk.f32.mxu0 %vm7988_vm3, %v7987_v3  ;;  %v4633_v13 = vld [vmem:[%s8120_s24 + $0x60] sm:$0xff] }
 0x417   : > { %7606 = vmatprep.subr.mxu0 %v7987_v3 }
 0x419   : > { %7578 = vmatmul.mubr.msk.f32.gmra.mrb[96].mxu0 %vm198_vm0, %v5587_v16 }
 0x41a   : > { %7580 = vmatprep.mubr.msk.f32.mxu0 %vm7988_vm3, %v7987_v3 }
 0x41c   : > { %v7407_v40 = vpop.f32.mrb[62].mxu0 }
 0x41d   : > { %v4536_v22 = vadd.f32 %v7407_v40, %v4534_v56  ;;  %v4374_v1 = vpop.f32.mrb[63].mxu0  ;;  %7581 = vmatmul.mubr.msk.f32.gmra.mrb[98].mxu0 %vm198_vm0, %v5588_v17  ;;  %v4634_v17 = vld [vmem:[%s8120_s24 + $0x68] sm:$0xff]  ;;  %v4652_v40 = vld [vmem:[%s8120_s24 + $0x70] sm:$0xff] }
 0x41e   : > { %v4535_v23 = vadd.f32 %v4533_v18, %v4374_v1  ;;  %7583 = vmatprep.mubr.msk.f32.mxu0 %vm7988_vm3, %v7987_v3  ;;  %v4637_v18 = vrot.slane %v4633_v13, 4  ;;  %v4620_v1 = vsel %vm4545_vm4, %v4618_v12, %v4619_v38  ;;  %v4656_v30 = vrot.slane %v4652_v40, 2 }
 0x41f   : > { %v4538_v11 = vmax.f32 %v4536_v22, 0.0 }
 0x420   : > { %v4537_v4 = vmax.f32 %v4535_v23, 0.0  ;;  %v7410_v31 = vpop.f32.mrb[64].mxu0  ;;  %v4638_v23 = vrot.slane %v4634_v17, 4 }
 0x421   : > { %4540 = vst.msk [vmem:[%s9043_s19 + $0x8] sm:$0xff] %vm273_vm1, %v4538_v11  ;;  %v4553_v45 = vadd.f32 %v7410_v31, %v4548_v41  ;;  %v4384_v19 = vpop.f32.mrb[65].mxu0  ;;  %7584 = vmatmul.mubr.msk.f32.gmra.mrb[100].mxu0 %vm198_vm0, %v5589_v2  ;;  %v5709_v31 = vld [vmem:[#allocation2 + $0x149] sm:$0xf] }
 0x422   : > { %4539 = vst.msk [vmem:[%s9043_s19] sm:$0xff] %vm273_vm1, %v4537_v4  ;;  %v4552_v32 = vadd.f32 %v4546_v39, %v4384_v19  ;;  %7586 = vmatprep.mubr.msk.f32.mxu0 %vm7988_vm3, %v7987_v3 }
 0x423   : > { %v4556_v29 = vmax.f32 %v4553_v45, 0.0 }
 0x424   : > { %v4555_v8 = vmax.f32 %v4552_v32, 0.0  ;;  %v7413_v48 = vpop.f32.mrb[66].mxu0  ;;  %v4639_v32 = vsel %vm893_vm2, %v4637_v18, %v4638_v23 }
 0x425   : > { %4560 = vst.msk [vmem:[%s9043_s19 + $0x16] sm:$0xff] %vm273_vm1, %v4556_v29  ;;  %v4574_v9 = vadd.f32 %v7413_v48, %v4569_v58  ;;  %v4394_v33 = vpop.f32.mrb[67].mxu0  ;;  %7587 = vmatmul.mubr.msk.f32.gmra.mrb[102].mxu0 %vm198_vm0, %v5590_v21 }
 0x426   : > { %4559 = vst.msk [vmem:[%s9043_s19 + $0xe] sm:$0xfc] %vm4558_vm5, %v4555_v8  ;;  %v4554_v42 = vadd.f32 %v4547_v59, %v4394_v33  ;;  %v4573_v51 = vadd.f32 %v4567_v24, %v4394_v33  ;;  %7591 = vmatprep.mubr.msk.f32.mxu0 %vm7988_vm3, %v7987_v3  ;;  %v4653_v24 = vld [vmem:[%s8120_s24 + $0x78] sm:$0xff] }
 0x427   : > { %v4577_v25 = vmax.f32 %v4574_v9, 0.0  ;;  %v4657_v58 = vrot.slane %v4653_v24, 2 }
 0x428   : > { %v4557_v57 = vmax.f32 %v4554_v42, 0.0  ;;  %v4576_v62 = vmax.f32 %v4573_v51, 0.0  ;;  %v7416_v61 = vpop.f32.mrb[68].mxu0  ;;  %v4679_v51 = vld [vmem:[%s8120_s24 + $0x90] sm:$0xff] }
 0x429   : > { %4581 = vst.msk [vmem:[%s9043_s19 + $0x24] sm:$0xff] %vm273_vm1, %v4577_v25  ;;  %v4596_v14 = vadd.f32 %v7416_v61, %v4591_v60  ;;  %v4404_v7 = vpop.f32.mrb[69].mxu0  ;;  %7592 = vmatmul.mubr.msk.f32.vlgmr.msra.gmra.mrb[94].mxu0 %vm198_vm0, %v5705_v6  ;;  %v4658_v42 = vsel %vm4588_vm6, %v4656_v30, %v4657_v58  ;;  %v4680_v60 = vld [vmem:[%s8120_s24 + $0x98] sm:$0xff]  ;;  %v4672_v6 = vld [vmem:[%s8120_s24 + $0x88] sm:$0xff] }
 0x42a   : > { %4562 = vst.msk [vmem:[%s9043_s19 + $0x1e] sm:$0x3] %vm4561_vm7, %v4557_v57  ;;  %v4575_v53 = vadd.f32 %v4568_v28, %v4404_v7  ;;  %v4595_v5 = vadd.f32 %v4589_v47, %v4404_v7  ;;  %7594 = vmatprep.mubr.msk.f32.mxu0 %vm7988_vm3, %v7987_v3  ;;  %7607 = vmatpush3.msk.msra.mxu0 %vm893_vm2, %v5829_v27  ;;  %v4684_v7 = vrot.slane %v4680_v60, 6 }
 0x42b   : > { %4580 = vst.msk [vmem:[%s9043_s19 + $0x1c] sm:$0xf0] %vm4579_vm8, %v4576_v62  ;;  %v4599_v35 = vmax.f32 %v4596_v14, 0.0  ;;  %v4683_v14 = vrot.slane %v4679_v51, 6 }
 0x42c   : > { %v4578_v49 = vmax.f32 %v4575_v53, 0.0  ;;  %v4598_v26 = vmax.f32 %v4595_v5, 0.0  ;;  %v7419_v34 = vpop.f32.mrb[70].mxu0  ;;  %v4671_v5 = vld [vmem:[%s8120_s24 + $0x80] sm:$0xff] }
 0x42d   : > { %4603 = vst.msk [vmem:[%s9043_s19 + $0x32] sm:$0xff] %vm273_vm1, %v4599_v35  ;;  %v4608_v46 = vadd.f32 %v7419_v34, %v4606_v0  ;;  %v4414_v52 = vpop.f32.mrb[71].mxu0  ;;  %7595 = vmatmul.mubr.msk.f32.gmra.mrb[96].mxu0 %vm198_vm0, %v5706_v50  ;;  %v4698_v0 = vld [vmem:[%s8120_s24 + $0xa0] sm:$0xff]  ;;  %v4685_v37 = vsel %vm4545_vm4, %v4683_v14, %v4684_v7 }
 0x42e   : > { %4583 = vst.msk [vmem:[%s9043_s19 + $0x2c] sm:$0xf] %vm4582_vm9, %v4578_v49  ;;  %v4597_v36 = vadd.f32 %v4590_v44, %v4414_v52  ;;  %7597 = vmatprep.mubr.msk.f32.mxu0 %vm7988_vm3, %v7987_v3  ;;  %v4703_v52 = vrot.slane %v4699_v10, 4 }
 0x42f   : > { %4602 = vst.msk [vmem:[%s9043_s19 + $0x2a] sm:$0xc0] %vm4601_vm10, %v4598_v26  ;;  %v4610_v15 = vmax.f32 %v4608_v46, 0.0  ;;  %v4702_v46 = vrot.slane %v4698_v0, 4 }
 0x430   : > { %v4600_v16 = vmax.f32 %v4597_v36, 0.0  ;;  %v7422_v56 = vpop.f32.mrb[72].mxu0  ;;  %v4717_v36 = vld [vmem:[%s8120_s24 + $0xb0] sm:$0xff] }
 0x431   : > { %4612 = vst.msk [vmem:[%s9043_s19 + $0x40] sm:$0xff] %vm273_vm1, %v4610_v15  ;;  %v4624_v39 = vadd.f32 %v7422_v56, %v4618_v12  ;;  %v4424_v59 = vpop.f32.mrb[73].mxu0  ;;  %7598 = vmatmul.mubr.msk.f32.gmra.mrb[98].mxu0 %vm198_vm0, %v5707_v54  ;;  %v4718_v54 = vld [vmem:[%s8120_s24 + $0xb8] sm:$0xff]  ;;  %v4704_v56 = vsel %vm893_vm2, %v4702_v46, %v4703_v52  ;;  %v4721_v17 = vrot.slane %v4717_v36, 2 }
 0x432   : > { %4605 = vst.msk [vmem:[%s9043_s19 + $0x3a] sm:$0x3f] %vm4604_vm11, %v4600_v16  ;;  %v4609_v20 = vadd.f32 %v4607_v55, %v4424_v59  ;;  %7600 = vmatprep.mubr.msk.f32.mxu0 %vm7988_vm3, %v7987_v3 }
 0x433   : > { %v4627_v22 = vmax.f32 %v4624_v39, 0.0  ;;  %v4722_v39 = vrot.slane %v4718_v54, 2 }
 0x434   : > { %v4611_v41 = vmax.f32 %v4609_v20, 0.0  ;;  %v7425_v2 = vpop.f32.mrb[74].mxu0 }
 0x435   : > { %4630 = vst.msk [vmem:[%s9043_s19 + $0x4e] sm:$0xfc] %vm4558_vm5, %v4627_v22  ;;  %v4626_v28 = vadd.f32 %v7425_v2, %v4619_v38  ;;  %v4643_v11 = vadd.f32 %v7425_v2, %v4637_v18  ;;  %v4434_v43 = vpop.f32.mrb[75].mxu0  ;;  %7601 = vmatmul.mubr.msk.f32.gmra.mrb[100].mxu0 %vm198_vm0, %v5708_v63 }
 0x436   : > { %4613 = vst.msk [vmem:[%s9043_s19 + $0x48] sm:$0xff] %vm273_vm1, %v4611_v41  ;;  %v4625_v4 = vadd.f32 %v4620_v1, %v4434_v43  ;;  %7603 = vmatprep.mubr.msk.f32.mxu0 %vm7988_vm3, %v7987_v3 }
 0x437   : > { %v4629_v45 = vmax.f32 %v4626_v28, 0.0  ;;  %v4646_v19 = vmax.f32 %v4643_v11, 0.0 }
 0x438   : > { %v4628_v21 = vmax.f32 %v4625_v4, 0.0  ;;  %v7428_v47 = vpop.f32.mrb[76].mxu0 }
 0x439   : > { %4632 = vst.msk [vmem:[%s9043_s19 + $0x5e] sm:$0x3] %vm4561_vm7, %v4629_v45  ;;  %v4645_v44 = vadd.f32 %v7428_v47, %v4638_v23  ;;  %v4662_v29 = vadd.f32 %v7428_v47, %v4656_v30  ;;  %v4444_v8 = vpop.f32.mrb[77].mxu0  ;;  %7604 = vmatmul.mubr.msk.f32.gmra.mrb[102].mxu0 %vm198_vm0, %v5709_v31  ;;  %v4723_v23 = vsel %vm4588_vm6, %v4721_v17, %v4722_v39  ;;  %v4736_v31 = vld [vmem:[%s8120_s24 + $0xc0] sm:$0xff]  ;;  %v4744_v45 = vld [vmem:[%s8120_s24 + $0xd0] sm:$0xff]  ;;  %v4745_v47 = vld [vmem:[%s8120_s24 + $0xd8] sm:$0xff] }
 0x43a   : > { %4649 = vst.msk [vmem:[%s9043_s19 + $0x5c] sm:$0xf0] %vm4579_vm8, %v4646_v19  ;;  %v4644_v48 = vadd.f32 %v4639_v32, %v4444_v8  ;;  %7608 = vmatprep.mubr.msk.f32.mxu0 %vm7988_vm3, %v7987_v3  ;;  %v4748_v8 = vrot.slane %v4744_v45, 6 }
 0x43b   : > { %4631 = vst.msk [vmem:[%s9043_s19 + $0x56] sm:$0xff] %vm273_vm1, %v4628_v21  ;;  %v4648_v9 = vmax.f32 %v4645_v44, 0.0  ;;  %v4665_v33 = vmax.f32 %v4662_v29, 0.0 }
 0x43c   : > { %v4647_v25 = vmax.f32 %v4644_v48, 0.0  ;;  %v7431_v27 = vpop.f32.mrb[78].mxu0 }
 0x43d   : > { %4651 = vst.msk [vmem:[%s9043_s19 + $0x6c] sm:$0xf] %vm4582_vm9, %v4648_v9  ;;  %v4664_v57 = vadd.f32 %v7431_v27, %v4657_v58  ;;  %v4454_v62 = vpop.f32.mrb[79].mxu0 }
 0x43e   : > { %4668 = vst.msk [vmem:[%s9043_s19 + $0x6a] sm:$0xc0] %vm4601_vm10, %v4665_v33  ;;  %v4663_v61 = vadd.f32 %v4658_v42, %v4454_v62  ;;  %v4737_v33 = vld [vmem:[%s8120_s24 + $0xc8] sm:$0xff]  ;;  %v4749_v42 = vrot.slane %v4745_v47, 6 }
 0x43f   : > { %4650 = vst.msk [vmem:[%s9043_s19 + $0x64] sm:$0xff] %vm273_vm1, %v4647_v25  ;;  %v4667_v53 = vmax.f32 %v4664_v57, 0.0 }
 0x440   : > { %v4666_v35 = vmax.f32 %v4663_v61, 0.0  ;;  %v7434_v49 = vpop.f32.mrb[80].mxu0  ;;  %v4750_v61 = vsel %vm4545_vm4, %v4748_v8, %v4749_v42 }
 0x441   : > { %4670 = vst.msk [vmem:[%s9043_s19 + $0x7a] sm:$0x3f] %vm4604_vm11, %v4667_v53  ;;  %v4674_v26 = vadd.f32 %v7434_v49, %v4672_v6  ;;  %v4464_v34 = vpop.f32.mrb[81].mxu0 }
 0x442   : > { %4669 = vst.msk [vmem:[%s9043_s19 + $0x72] sm:$0xff] %vm273_vm1, %v4666_v35  ;;  %v4673_v50 = vadd.f32 %v4671_v5, %v4464_v34 }
 0x443   : > { %v4676_v12 = vmax.f32 %v4674_v26, 0.0 }
 0x444   : > { %v4675_v13 = vmax.f32 %v4673_v50, 0.0  ;;  %v7437_v15 = vpop.f32.mrb[82].mxu0 }
 0x445   : > { %4678 = vst.msk [vmem:[%s9043_s19 + $0x88] sm:$0xff] %vm273_vm1, %v4676_v12  ;;  %v4690_v55 = vadd.f32 %v7437_v15, %v4685_v37  ;;  %v4474_v38 = vpop.f32.mrb[83].mxu0 }
 0x446   : > { %4677 = vst.msk [vmem:[%s9043_s19 + $0x80] sm:$0xff] %vm273_vm1, %v4675_v13  ;;  %v4689_v16 = vadd.f32 %v4683_v14, %v4474_v38 }
 0x447   : > { %v4693_v59 = vmax.f32 %v4690_v55, 0.0 }
 0x448   : > { %v4692_v18 = vmax.f32 %v4689_v16, 0.0  ;;  %v7440_v20 = vpop.f32.mrb[84].mxu0  ;;  %v5938_v16 = vld [vmem:[%s8120_s24 + $0xe0] sm:$0xff] }
 0x449   : > { %4696 = vst.msk [vmem:[%s9043_s19 + $0x96] sm:$0xff] %vm273_vm1, %v4693_v59  ;;  %v4709_v63 = vadd.f32 %v7440_v20, %v4704_v56  ;;  %v4484_v40 = vpop.f32.mrb[85].mxu0  ;;  %v5939_v59 = vld [vmem:[%s8120_s24 + $0xe8] sm:$0xff] }
 0x44a   : > { %4695 = vst.msk [vmem:[%s9043_s19 + $0x8e] sm:$0xfc] %vm4558_vm5, %v4692_v18  ;;  %v4691_v22 = vadd.f32 %v4684_v7, %v4484_v40  ;;  %v4708_v1 = vadd.f32 %v4702_v46, %v4484_v40  ;;  %v5946_v18 = vld [vmem:[%s8120_s24 + $0xf0] sm:$0xff] }
 0x44b   : > { %v4712_v41 = vmax.f32 %v4709_v63, 0.0  ;;  %v5947_v63 = vld [vmem:[%s8120_s24 + $0xf8] sm:$0xff] }
 0x44c   : > { %v4694_v2 = vmax.f32 %v4691_v22, 0.0  ;;  %v4711_v24 = vmax.f32 %v4708_v1, 0.0  ;;  %v7443_v28 = vpop.f32.mrb[86].mxu0 }
 0x44d   : > { %4715 = vst.msk [vmem:[%s9043_s19 + $0xa4] sm:$0xff] %vm273_vm1, %v4712_v41  ;;  %v4728_v11 = vadd.f32 %v7443_v28, %v4723_v23  ;;  %v4494_v43 = vpop.f32.mrb[87].mxu0  ;;  %v5951_v23 = vrot.slane %v5947_v63, 6 }
 0x44e   : > { %4697 = vst.msk [vmem:[%s9043_s19 + $0x9e] sm:$0x3] %vm4561_vm7, %v4694_v2  ;;  %v4710_v30 = vadd.f32 %v4703_v52, %v4494_v43  ;;  %v4727_v4 = vadd.f32 %v4721_v17, %v4494_v43 }
 0x44f   : > { %4714 = vst.msk [vmem:[%s9043_s19 + $0x9c] sm:$0xf0] %vm4579_vm8, %v4711_v24  ;;  %v4731_v19 = vmax.f32 %v4728_v11, 0.0 }
 0x450   : > { %v4713_v32 = vmax.f32 %v4710_v30, 0.0  ;;  %v4730_v58 = vmax.f32 %v4727_v4, 0.0  ;;  %v7446_v21 = vpop.f32.mrb[88].mxu0 }
 0x451   : > { %4734 = vst.msk [vmem:[%s9043_s19 + $0xb2] sm:$0xff] %vm273_vm1, %v4731_v19  ;;  %v4738_v44 = vadd.f32 %v7446_v21, %v4736_v31  ;;  %v4504_v29 = vpop.f32.mrb[89].mxu0 }
 0x452   : > { %4716 = vst.msk [vmem:[%s9043_s19 + $0xac] sm:$0xf] %vm4582_vm9, %v4713_v32  ;;  %v4729_v48 = vadd.f32 %v4722_v39, %v4504_v29 }
 0x453   : > { %4733 = vst.msk [vmem:[%s9043_s19 + $0xaa] sm:$0xc0] %vm4601_vm10, %v4730_v58  ;;  %v4740_v9 = vmax.f32 %v4738_v44, 0.0 }
 0x454   : > { %v4732_v51 = vmax.f32 %v4729_v48, 0.0  ;;  %v7449_v60 = vpop.f32.mrb[90].mxu0 }
 0x455   : > { %4742 = vst.msk [vmem:[%s9043_s19 + $0xc0] sm:$0xff] %vm273_vm1, %v4740_v9  ;;  %v4754_v25 = vadd.f32 %v7449_v60, %v4748_v8  ;;  %v4514_v27 = vpop.f32.mrb[91].mxu0 }
 0x456   : > { %4735 = vst.msk [vmem:[%s9043_s19 + $0xba] sm:$0x3f] %vm4604_vm11, %v4732_v51  ;;  %v4739_v57 = vadd.f32 %v4737_v33, %v4514_v27 }
 0x457   : > { %v4757_v62 = vmax.f32 %v4754_v25, 0.0 }
 0x458   : > { %v4741_v6 = vmax.f32 %v4739_v57, 0.0  ;;  %v7452_v14 = vpop.f32.mrb[92].mxu0 }
 0x459   : > { %4760 = vst.msk [vmem:[%s9043_s19 + $0xce] sm:$0xfc] %vm4558_vm5, %v4757_v62  ;;  %v4756_v7 = vadd.f32 %v7452_v14, %v4749_v42  ;;  %v4524_v53 = vpop.f32.mrb[93].mxu0 }
 0x45a   : > { %4743 = vst.msk [vmem:[%s9043_s19 + $0xc8] sm:$0xff] %vm273_vm1, %v4741_v6  ;;  %v4755_v5 = vadd.f32 %v4750_v61, %v4524_v53 }
 0x45b   : > { %v4759_v0 = vmax.f32 %v4756_v7, 0.0 }
 0x45c   : > { %v4758_v10 = vmax.f32 %v4755_v5, 0.0 }
 0x45d   : > { %4762 = vst.msk [vmem:[%s9043_s19 + $0xde] sm:$0x3] %vm4561_vm7, %v4759_v0 }
 0x45e   : > { %4761 = vst.msk [vmem:[%s9043_s19 + $0xd6] sm:$0xff] %vm273_vm1, %v4758_v10 }
 0x4fc   : > { %v5795_v35 = vpop.f32.mrb[94].mxu0 }
 0x4fd   : > { %v5824_v49 = vmax.f32 %v5795_v35, 0.0  ;;  %v7593_v26 = vpop.f32.mrb[95].mxu0 }
 0x4ff   : > { %7609 = vmatmul.mubr.msk.f32.vlgmr.msra.gmra.mrb[104].mxu0 %vm198_vm0, %v5824_v49 }
 0x500   : > { %v5800_v34 = vpop.f32.mrb[96].mxu0  ;;  %7611 = vmatprep.mubr.msk.f32.mxu0 %vm7988_vm3, %v7987_v3 }
 0x501   : > { %v5825_v50 = vmax.f32 %v5800_v34, 0.0  ;;  %v7596_v37 = vpop.f32.mrb[97].mxu0 }
 0x503   : > { %7612 = vmatmul.mubr.msk.f32.gmra.mrb[106].mxu0 %vm198_vm0, %v5825_v50 }
 0x504   : > { %v5805_v46 = vpop.f32.mrb[98].mxu0  ;;  %7614 = vmatprep.mubr.msk.f32.mxu0 %vm7988_vm3, %v7987_v3 }
 0x505   : > { %v5826_v52 = vmax.f32 %v5805_v46, 0.0  ;;  %v7599_v12 = vpop.f32.mrb[99].mxu0 }
 0x507   : > { %7615 = vmatmul.mubr.msk.f32.gmra.mrb[108].mxu0 %vm198_vm0, %v5826_v52 }
 0x508   : > { %v5810_v36 = vpop.f32.mrb[100].mxu0  ;;  %7617 = vmatprep.mubr.msk.f32.mxu0 %vm7988_vm3, %v7987_v3 }
 0x509   : > { %v5827_v54 = vmax.f32 %v5810_v36, 0.0  ;;  %v7602_v13 = vpop.f32.mrb[101].mxu0 }
 0x50b   : > { %7618 = vmatmul.mubr.msk.f32.gmra.mrb[110].mxu0 %vm198_vm0, %v5827_v54 }
 0x50c   : > { %v5815_v15 = vpop.f32.mrb[102].mxu0  ;;  %7620 = vmatprep.mubr.msk.f32.mxu0 %vm7988_vm3, %v7987_v3  ;;  %v5950_v3 = vrot.slane %v5946_v18, 6 }
 0x50d   : > { %v5828_v55 = vmax.f32 %v5815_v15, 0.0  ;;  %v7605_v38 = vpop.f32.mrb[103].mxu0 }
 0x50e   : > { %v5952_v11 = vsel %vm4545_vm4, %v5950_v3, %v5951_v23 }
 0x50f   : > { %7621 = vmatmul.mubr.msk.f32.gmra.mrb[112].mxu0 %vm198_vm0, %v5828_v55 }
 0x5d2   : > { %v5914_v56 = vpop.f32.mrb[104].mxu0 }
 0x5d3   : > { %v5940_v17 = vadd.f32 %v5938_v16, %v5914_v56  ;;  %v7610_v39 = vpop.f32.mrb[105].mxu0 }
 0x5d5   : > { %v5942_v20 = vmax.f32 %v5940_v17, 0.0 }
 0x5d6   : > { %v5919_v40 = vpop.f32.mrb[106].mxu0 }
 0x5d7   : > { %5944 = vst.msk [vmem:[%s9043_s19 + $0xe0] sm:$0xff] %vm273_vm1, %v5942_v20  ;;  %v5941_v22 = vadd.f32 %v5939_v59, %v5919_v40  ;;  %v7613_v1 = vpop.f32.mrb[107].mxu0 }
 0x5d9   : > { %v5943_v41 = vmax.f32 %v5941_v22, 0.0 }
 0x5da   : > { %v5924_v2 = vpop.f32.mrb[108].mxu0 }
 0x5db   : > { %5945 = vst.msk [vmem:[%s9043_s19 + $0xe8] sm:$0xff] %vm273_vm1, %v5943_v41  ;;  %v5956_v24 = vadd.f32 %v5950_v3, %v5924_v2  ;;  %v7616_v28 = vpop.f32.mrb[109].mxu0 }
 0x5dd   : > { %v5959_v43 = vmax.f32 %v5956_v24, 0.0 }
 0x5de   : > { %v5929_v30 = vpop.f32.mrb[110].mxu0 }
 0x5df   : > { %5962 = vst.msk [vmem:[%s9043_s19 + $0xee] sm:$0xfc] %vm4558_vm5, %v5959_v43  ;;  %v5957_v4 = vadd.f32 %v5952_v11, %v5929_v30  ;;  %v7619_v31 = vpop.f32.mrb[111].mxu0 }
 0x5e1   : > { %v5960_v45 = vmax.f32 %v5957_v4, 0.0 }
 0x5e2   : > { %v5934_v19 = vpop.f32.mrb[112].mxu0 }
 0x5e3   : > { %5963 = vst.msk [vmem:[%s9043_s19 + $0xf6] sm:$0xff] %vm273_vm1, %v5960_v45  ;;  %v5958_v32 = vadd.f32 %v5951_v23, %v5934_v19  ;;  %v7622_v58 = vpop.f32.mrb[113].mxu0 }
 0x5e5   : > { %v5961_v21 = vmax.f32 %v5958_v32, 0.0 }
 0x5e7   : > { %5964 = vst.msk [vmem:[%s9043_s19 + $0xfe] sm:$0x3] %vm4561_vm7, %v5961_v21 }
 0x5e8 PF: > { %s14_s15 = sadd.s32 1, %s7985_s15  }
 0x5e9   : > { %p11_p4 = scmp.ge.s32.totalorder %s14_s15, 4  }
 0x5eb   :  { %13 = sbr.rel (!%p11_p4) target bundleno = 1 (0x1), region = 74 }

</bundles_post_ra>
